<compile_context>
chip_gen: v7x
topology: tpu7x:2x2x1
jax: 0.10.0
libtpu: 0.0.40
codegen_flags: <defaults>
</compile_context>

<pallas_src>
import math

import jax
import jax.numpy as jnp
from jax import lax
from jax.experimental import pallas as pl
from jax.experimental.pallas import tpu as pltpu


def _layernorm(x, eps=1e-6):
    # elementwise_affine=False LayerNorm over last axis (eps=1e-6 as in module).
    mu = jnp.mean(x, axis=-1, keepdims=True)
    var = jnp.mean((x - mu) ** 2, axis=-1, keepdims=True)
    return (x - mu) * lax.rsqrt(var + eps)


def _gelu_tanh(x):
    # torch.nn.GELU(approximate='tanh')
    c = math.sqrt(2.0 / math.pi)
    return 0.5 * x * (1.0 + jnp.tanh(c * (x + 0.044715 * x * x * x)))


def _round_up(x, m):
    return ((x + m - 1) // m) * m


def resnet_stack_kernel(x_ref,
                        w1a_ref, b1a_ref, w2a_ref, b2a_ref,
                        w1b_ref, b1b_ref, w2b_ref, b2b_ref,
                        o_ref, acc_ref):
    """Applies ResNetBlock[blk] to one resident token tile.

    Grid = (token_tiles, num_blocks); acc_ref keeps the f32 activations in
    VMEM across the (arbitrary) block axis. Output is written only once, on
    the last block.
    """
    blk = pl.program_id(1)
    wdt = w1a_ref.dtype  # matmul operand dtype (bf16)

    @pl.when(blk == 0)
    def _():
        acc_ref[...] = x_ref[...].astype(jnp.float32)

    x = acc_ref[...]

    # --- sub-block 1: x = norm1(x); x = x + mlp1(x) ---
    y = _layernorm(x)
    h = _gelu_tanh(
        jnp.dot(y.astype(wdt), w1a_ref[...],
                preferred_element_type=jnp.float32) + b1a_ref[...])
    x = y + (jnp.dot(h.astype(wdt), w2a_ref[...],
                     preferred_element_type=jnp.float32) + b2a_ref[...])

    # --- sub-block 2: x = norm2(x); x = x + mlp2(x) ---
    y = _layernorm(x)
    h = _gelu_tanh(
        jnp.dot(y.astype(wdt), w1b_ref[...],
                preferred_element_type=jnp.float32) + b1b_ref[...])
    x = y + (jnp.dot(h.astype(wdt), w2b_ref[...],
                     preferred_element_type=jnp.float32) + b2b_ref[...])

    acc_ref[...] = x

    @pl.when(blk == pl.num_programs(1) - 1)
    def _():
        o_ref[...] = x.astype(o_ref.dtype)


def resnet_forward(x, params, *, tm=256):
    """x: (B, N, C) -> (B, N, C). Single fused pallas_call over all blocks."""
    B, N, C = x.shape
    T = B * N
    NB, _, H = params["w1a"].shape

    # Token tile: multiple of 8 sublanes, no larger than (padded) T.
    tm = _round_up(max(8, min(tm, _round_up(T, 8))), 8)
    T_pad = _round_up(T, tm)

    tokens = x.reshape(T, C)
    if T_pad != T:
        tokens = jnp.pad(tokens, ((0, T_pad - T), (0, 0)))

    # Explicit VMEM budget: double-buffered bf16 weights + f32 biases,
    # double-buffered in/out token tiles, f32 accumulator scratch, headroom.
    xb = tokens.dtype.itemsize
    wb = params["w1a"].dtype.itemsize
    need = (2 * (4 * C * H * wb + 2 * (H + C) * 4)
            + 2 * tm * C * xb + 2 * tm * C * xb
            + tm * C * 4 + tm * H * 4)
    # <=48 MiB keeps v7x (64 MiB/TC) safe; v5e/v6e could go higher if needed.
    vmem_limit = int(min(max(1.5 * need, 32 * 2 ** 20), 48 * 2 ** 20))

    tok_spec = pl.BlockSpec((tm, C), lambda i, b: (i, 0))

    def wspec(shape):
        # Stacked (NB, *shape) weight/bias, indexed by the block axis.
        return pl.BlockSpec((None,) + shape, lambda i, b: (b, 0, 0))

    out = pl.pallas_call(
        resnet_stack_kernel,
        out_shape=jax.ShapeDtypeStruct((T_pad, C), tokens.dtype),
        grid_spec=pltpu.PrefetchScalarGridSpec(
            num_scalar_prefetch=0,
            grid=(T_pad // tm, NB),
            in_specs=[
                tok_spec,
                wspec((C, H)), wspec((1, H)), wspec((H, C)), wspec((1, C)),
                wspec((C, H)), wspec((1, H)), wspec((H, C)), wspec((1, C)),
            ],
            out_specs=tok_spec,
            scratch_shapes=[pltpu.VMEM((tm, C), jnp.float32)],
        ),
        compiler_params=pltpu.CompilerParams(
            dimension_semantics=("parallel", "arbitrary"),
            vmem_limit_bytes=vmem_limit,
        ),
    )(tokens,
      params["w1a"], params["b1a"], params["w2a"], params["b2a"],
      params["w1b"], params["b1b"], params["w2b"], params["b2b"])

    return out[:T].reshape(B, N, C)


def _xavier_uniform(key, fan_in, fan_out, dtype):
    # nn.init.xavier_uniform_; stored as (in, out) for x @ W.
    bound = math.sqrt(6.0 / (fan_in + fan_out))
    w = jax.random.uniform(key, (fan_in, fan_out), jnp.float32,
                           minval=-bound, maxval=bound)
    return w.astype(dtype)


def init_resnet_params(key, hidden_size, num_blocks, mlp_ratio=4.0,
                       weight_dtype=jnp.bfloat16):
    C = hidden_size
    H = int(hidden_size * mlp_ratio)
    cols = {k: [] for k in
            ("w1a", "b1a", "w2a", "b2a", "w1b", "b1b", "w2b", "b2b")}
    for _ in range(num_blocks):
        key, k1, k2, k3, k4 = jax.random.split(key, 5)
        cols["w1a"].append(_xavier_uniform(k1, C, H, weight_dtype))
        cols["b1a"].append(jnp.zeros((1, H), jnp.float32))
        cols["w2a"].append(_xavier_uniform(k2, H, C, weight_dtype))
        cols["b2a"].append(jnp.zeros((1, C), jnp.float32))
        cols["w1b"].append(_xavier_uniform(k3, C, H, weight_dtype))
        cols["b1b"].append(jnp.zeros((1, H), jnp.float32))
        cols["w2b"].append(_xavier_uniform(k4, H, C, weight_dtype))
        cols["b2b"].append(jnp.zeros((1, C), jnp.float32))
    return {k: jnp.stack(v, axis=0) for k, v in cols.items()}


def _reference_forward(x, params):
    """Pure-JAX reference of the PyTorch forward (same bf16 matmul boundary)."""
    B, N, C = x.shape
    t = x.reshape(B * N, C).astype(jnp.float32)
    NB = params["w1a"].shape[0]
    wdt = params["w1a"].dtype
    for b in range(NB):
        for (w1, b1, w2, b2) in (("w1a", "b1a", "w2a", "b2a"),
                                 ("w1b", "b1b", "w2b", "b2b")):
            y = _layernorm(t)
            h = _gelu_tanh(
                jnp.dot(y.astype(wdt), params[w1][b],
                        preferred_element_type=jnp.float32) + params[b1][b])
            t = y + (jnp.dot(h.astype(wdt), params[w2][b],
                             preferred_element_type=jnp.float32) + params[b2][b])
    return t.reshape(B, N, C).astype(x.dtype)


if __name__ == "__main__":
    B, N, C = 2, 128, 128       # batch, seq, hidden_size (lane-aligned C)
    num_blocks = 2
    mlp_ratio = 4.0

    key = jax.random.PRNGKey(0)
    kx, kp = jax.random.split(key)
    x = jax.random.normal(kx, (B, N, C), jnp.float32)
    params = init_resnet_params(kp, C, num_blocks, mlp_ratio)

    out = jax.block_until_ready(resnet_forward(x, params, tm=128))
    ref = _reference_forward(x, params)

    assert out.shape == (B, N, C)
    assert jnp.allclose(out, ref, atol=2e-2, rtol=2e-2), \
        float(jnp.max(jnp.abs(out - ref)))

    print("KERNEL_OK")
</pallas_src>

<mosaic_0001>
module attributes {stable_mosaic.version = 11 : i64} {
  func.func @resnet_stack_kernel(%arg0: i32, %arg1: i32, %arg2: memref<128x128xf32, #tpu.memory_space<vmem>>, %arg3: memref<1x128x512xbf16, #tpu.memory_space<vmem>>, %arg4: memref<1x1x512xf32, #tpu.memory_space<vmem>>, %arg5: memref<1x512x128xbf16, #tpu.memory_space<vmem>>, %arg6: memref<1x1x128xf32, #tpu.memory_space<vmem>>, %arg7: memref<1x128x512xbf16, #tpu.memory_space<vmem>>, %arg8: memref<1x1x512xf32, #tpu.memory_space<vmem>>, %arg9: memref<1x512x128xbf16, #tpu.memory_space<vmem>>, %arg10: memref<1x1x128xf32, #tpu.memory_space<vmem>>, %arg11: memref<128x128xf32, #tpu.memory_space<vmem>>, %arg12: memref<128x128xf32, #tpu.memory_space<vmem>>) attributes {dimension_semantics = [#tpu.dimension_semantics<parallel>, #tpu.dimension_semantics<arbitrary>], iteration_bounds = array<i64: 2, 2>, scalar_prefetch = 0 : i64, scratch_operands = 1 : i64, tpu.core_type = #tpu.core_type<tc>, window_params = [{transform_indices = @transform_0, window_bounds = array<i64: 128, 128>}, {transform_indices = @transform_1, window_bounds = array<i64: 1, 128, 512>}, {transform_indices = @transform_2, window_bounds = array<i64: 1, 1, 512>}, {transform_indices = @transform_3, window_bounds = array<i64: 1, 512, 128>}, {transform_indices = @transform_4, window_bounds = array<i64: 1, 1, 128>}, {transform_indices = @transform_5, window_bounds = array<i64: 1, 128, 512>}, {transform_indices = @transform_6, window_bounds = array<i64: 1, 1, 512>}, {transform_indices = @transform_7, window_bounds = array<i64: 1, 512, 128>}, {transform_indices = @transform_8, window_bounds = array<i64: 1, 1, 128>}, {transform_indices = @transform_9, window_bounds = array<i64: 128, 128>}]} {
    %c0_i32 = arith.constant 0 : i32
    %0 = arith.cmpi eq, %arg1, %c0_i32 : i32
    %1 = arith.extui %0 : i1 to i32
    %c0_i32_0 = arith.constant 0 : i32
    %2 = arith.cmpi ne, %1, %c0_i32_0 : i32
    scf.if %2 {
      %c0_50 = arith.constant 0 : index
      %c0_51 = arith.constant 0 : index
      %104 = vector.load %arg2[%c0_50, %c0_51] : memref<128x128xf32, #tpu.memory_space<vmem>>, vector<128x128xf32>
      %c0_52 = arith.constant 0 : index
      %c0_53 = arith.constant 0 : index
      %105 = vector.load %arg12[%c0_52, %c0_53] : memref<128x128xf32, #tpu.memory_space<vmem>>, vector<128x128xf32>
      tpu.vector_store %arg12[%c0_52, %c0_53], %104 {strides = array<i32>} : memref<128x128xf32, #tpu.memory_space<vmem>>, vector<128x128xf32>,
    } else {
    }
    %c0 = arith.constant 0 : index
    %c0_1 = arith.constant 0 : index
    %3 = vector.load %arg12[%c0, %c0_1] : memref<128x128xf32, #tpu.memory_space<vmem>>, vector<128x128xf32>
    %cst = arith.constant dense<0.000000e+00> : vector<128xf32>
    %4 = vector.multi_reduction <add>, %3, %cst [1] : vector<128x128xf32> to vector<128xf32>
    %5 = vector.shape_cast %4 : vector<128xf32> to vector<128x1xf32>
    %cst_2 = arith.constant 1.280000e+02 : f32
    %6 = vector.broadcast %cst_2 : f32 to vector<128x1xf32>
    %7 = arith.divf %5, %6 : vector<128x1xf32>
    %8 = vector.broadcast %7 : vector<128x1xf32> to vector<128x128xf32>
    %9 = arith.subf %3, %8 : vector<128x128xf32>
    %10 = arith.mulf %9, %9 : vector<128x128xf32>
    %cst_3 = arith.constant dense<0.000000e+00> : vector<128xf32>
    %11 = vector.multi_reduction <add>, %10, %cst_3 [1] : vector<128x128xf32> to vector<128xf32>
    %12 = vector.shape_cast %11 : vector<128xf32> to vector<128x1xf32>
    %cst_4 = arith.constant 1.280000e+02 : f32
    %13 = vector.broadcast %cst_4 : f32 to vector<128x1xf32>
    %14 = arith.divf %12, %13 : vector<128x1xf32>
    %15 = vector.broadcast %7 : vector<128x1xf32> to vector<128x128xf32>
    %16 = arith.subf %3, %15 : vector<128x128xf32>
    %cst_5 = arith.constant 9.99999997E-7 : f32
    %17 = vector.broadcast %cst_5 : f32 to vector<128x1xf32>
    %18 = arith.addf %14, %17 : vector<128x1xf32>
    %19 = math.rsqrt %18 : vector<128x1xf32>
    %20 = vector.broadcast %19 : vector<128x1xf32> to vector<128x128xf32>
    %21 = arith.mulf %16, %20 : vector<128x128xf32>
    %22 = arith.truncf %21 : vector<128x128xf32> to vector<128x128xbf16>
    %c0_6 = arith.constant 0 : index
    %c0_7 = arith.constant 0 : index
    %c0_8 = arith.constant 0 : index
    %23 = vector.load %arg3[%c0_6, %c0_7, %c0_8] : memref<1x128x512xbf16, #tpu.memory_space<vmem>>, vector<1x128x512xbf16>
    %24 = vector.shape_cast %23 : vector<1x128x512xbf16> to vector<128x512xbf16>
    %cst_9 = arith.constant dense<0.000000e+00> : vector<128x512xf32>
    %25 = tpu.matmul %22, %24, %cst_9 {dimension_numbers = #tpu.dot_dimension_numbers<[1], [0], [0], [1], [0, 0, 1, 1], [], []>} : vector<128x128xbf16>, vector<128x512xbf16>, vector<128x512xf32> -> vector<128x512xf32>
    %c0_10 = arith.constant 0 : index
    %c0_11 = arith.constant 0 : index
    %c0_12 = arith.constant 0 : index
    %26 = vector.load %arg4[%c0_10, %c0_11, %c0_12] : memref<1x1x512xf32, #tpu.memory_space<vmem>>, vector<1x1x512xf32>
    %27 = vector.shape_cast %26 : vector<1x1x512xf32> to vector<1x512xf32>
    %28 = vector.broadcast %27 : vector<1x512xf32> to vector<128x512xf32>
    %29 = arith.addf %25, %28 : vector<128x512xf32>
    %cst_13 = arith.constant 5.000000e-01 : f32
    %30 = vector.broadcast %cst_13 : f32 to vector<128x512xf32>
    %31 = arith.mulf %30, %29 : vector<128x512xf32>
    %cst_14 = arith.constant 4.471500e-02 : f32
    %32 = vector.broadcast %cst_14 : f32 to vector<128x512xf32>
    %33 = arith.mulf %32, %29 : vector<128x512xf32>
    %34 = arith.mulf %33, %29 : vector<128x512xf32>
    %35 = arith.mulf %34, %29 : vector<128x512xf32>
    %36 = arith.addf %29, %35 : vector<128x512xf32>
    %cst_15 = arith.constant 0.797884583 : f32
    %37 = vector.broadcast %cst_15 : f32 to vector<128x512xf32>
    %38 = arith.mulf %37, %36 : vector<128x512xf32>
    %39 = math.tanh %38 : vector<128x512xf32>
    %cst_16 = arith.constant 1.000000e+00 : f32
    %40 = vector.broadcast %cst_16 : f32 to vector<128x512xf32>
    %41 = arith.addf %40, %39 : vector<128x512xf32>
    %42 = arith.mulf %31, %41 : vector<128x512xf32>
    %43 = arith.truncf %42 : vector<128x512xf32> to vector<128x512xbf16>
    %c0_17 = arith.constant 0 : index
    %c0_18 = arith.constant 0 : index
    %c0_19 = arith.constant 0 : index
    %44 = vector.load %arg5[%c0_17, %c0_18, %c0_19] : memref<1x512x128xbf16, #tpu.memory_space<vmem>>, vector<1x512x128xbf16>
    %45 = vector.shape_cast %44 : vector<1x512x128xbf16> to vector<512x128xbf16>
    %cst_20 = arith.constant dense<0.000000e+00> : vector<128x128xf32>
    %46 = tpu.matmul %43, %45, %cst_20 {dimension_numbers = #tpu.dot_dimension_numbers<[1], [0], [0], [1], [0, 0, 1, 1], [], []>} : vector<128x512xbf16>, vector<512x128xbf16>, vector<128x128xf32> -> vector<128x128xf32>
    %c0_21 = arith.constant 0 : index
    %c0_22 = arith.constant 0 : index
    %c0_23 = arith.constant 0 : index
    %47 = vector.load %arg6[%c0_21, %c0_22, %c0_23] : memref<1x1x128xf32, #tpu.memory_space<vmem>>, vector<1x1x128xf32>
    %48 = vector.shape_cast %47 : vector<1x1x128xf32> to vector<1x128xf32>
    %49 = vector.broadcast %48 : vector<1x128xf32> to vector<128x128xf32>
    %50 = arith.addf %46, %49 : vector<128x128xf32>
    %51 = arith.addf %21, %50 : vector<128x128xf32>
    %cst_24 = arith.constant dense<0.000000e+00> : vector<128xf32>
    %52 = vector.multi_reduction <add>, %51, %cst_24 [1] : vector<128x128xf32> to vector<128xf32>
    %53 = vector.shape_cast %52 : vector<128xf32> to vector<128x1xf32>
    %cst_25 = arith.constant 1.280000e+02 : f32
    %54 = vector.broadcast %cst_25 : f32 to vector<128x1xf32>
    %55 = arith.divf %53, %54 : vector<128x1xf32>
    %56 = vector.broadcast %55 : vector<128x1xf32> to vector<128x128xf32>
    %57 = arith.subf %51, %56 : vector<128x128xf32>
    %58 = arith.mulf %57, %57 : vector<128x128xf32>
    %cst_26 = arith.constant dense<0.000000e+00> : vector<128xf32>
    %59 = vector.multi_reduction <add>, %58, %cst_26 [1] : vector<128x128xf32> to vector<128xf32>
    %60 = vector.shape_cast %59 : vector<128xf32> to vector<128x1xf32>
    %cst_27 = arith.constant 1.280000e+02 : f32
    %61 = vector.broadcast %cst_27 : f32 to vector<128x1xf32>
    %62 = arith.divf %60, %61 : vector<128x1xf32>
    %63 = vector.broadcast %55 : vector<128x1xf32> to vector<128x128xf32>
    %64 = arith.subf %51, %63 : vector<128x128xf32>
    %cst_28 = arith.constant 9.99999997E-7 : f32
    %65 = vector.broadcast %cst_28 : f32 to vector<128x1xf32>
    %66 = arith.addf %62, %65 : vector<128x1xf32>
    %67 = math.rsqrt %66 : vector<128x1xf32>
    %68 = vector.broadcast %67 : vector<128x1xf32> to vector<128x128xf32>
    %69 = arith.mulf %64, %68 : vector<128x128xf32>
    %70 = arith.truncf %69 : vector<128x128xf32> to vector<128x128xbf16>
    %c0_29 = arith.constant 0 : index
    %c0_30 = arith.constant 0 : index
    %c0_31 = arith.constant 0 : index
    %71 = vector.load %arg7[%c0_29, %c0_30, %c0_31] : memref<1x128x512xbf16, #tpu.memory_space<vmem>>, vector<1x128x512xbf16>
    %72 = vector.shape_cast %71 : vector<1x128x512xbf16> to vector<128x512xbf16>
    %cst_32 = arith.constant dense<0.000000e+00> : vector<128x512xf32>
    %73 = tpu.matmul %70, %72, %cst_32 {dimension_numbers = #tpu.dot_dimension_numbers<[1], [0], [0], [1], [0, 0, 1, 1], [], []>} : vector<128x128xbf16>, vector<128x512xbf16>, vector<128x512xf32> -> vector<128x512xf32>
    %c0_33 = arith.constant 0 : index
    %c0_34 = arith.constant 0 : index
    %c0_35 = arith.constant 0 : index
    %74 = vector.load %arg8[%c0_33, %c0_34, %c0_35] : memref<1x1x512xf32, #tpu.memory_space<vmem>>, vector<1x1x512xf32>
    %75 = vector.shape_cast %74 : vector<1x1x512xf32> to vector<1x512xf32>
    %76 = vector.broadcast %75 : vector<1x512xf32> to vector<128x512xf32>
    %77 = arith.addf %73, %76 : vector<128x512xf32>
    %cst_36 = arith.constant 5.000000e-01 : f32
    %78 = vector.broadcast %cst_36 : f32 to vector<128x512xf32>
    %79 = arith.mulf %78, %77 : vector<128x512xf32>
    %cst_37 = arith.constant 4.471500e-02 : f32
    %80 = vector.broadcast %cst_37 : f32 to vector<128x512xf32>
    %81 = arith.mulf %80, %77 : vector<128x512xf32>
    %82 = arith.mulf %81, %77 : vector<128x512xf32>
    %83 = arith.mulf %82, %77 : vector<128x512xf32>
    %84 = arith.addf %77, %83 : vector<128x512xf32>
    %cst_38 = arith.constant 0.797884583 : f32
    %85 = vector.broadcast %cst_38 : f32 to vector<128x512xf32>
    %86 = arith.mulf %85, %84 : vector<128x512xf32>
    %87 = math.tanh %86 : vector<128x512xf32>
    %cst_39 = arith.constant 1.000000e+00 : f32
    %88 = vector.broadcast %cst_39 : f32 to vector<128x512xf32>
    %89 = arith.addf %88, %87 : vector<128x512xf32>
    %90 = arith.mulf %79, %89 : vector<128x512xf32>
    %91 = arith.truncf %90 : vector<128x512xf32> to vector<128x512xbf16>
    %c0_40 = arith.constant 0 : index
    %c0_41 = arith.constant 0 : index
    %c0_42 = arith.constant 0 : index
    %92 = vector.load %arg9[%c0_40, %c0_41, %c0_42] : memref<1x512x128xbf16, #tpu.memory_space<vmem>>, vector<1x512x128xbf16>
    %93 = vector.shape_cast %92 : vector<1x512x128xbf16> to vector<512x128xbf16>
    %cst_43 = arith.constant dense<0.000000e+00> : vector<128x128xf32>
    %94 = tpu.matmul %91, %93, %cst_43 {dimension_numbers = #tpu.dot_dimension_numbers<[1], [0], [0], [1], [0, 0, 1, 1], [], []>} : vector<128x512xbf16>, vector<512x128xbf16>, vector<128x128xf32> -> vector<128x128xf32>
    %c0_44 = arith.constant 0 : index
    %c0_45 = arith.constant 0 : index
    %c0_46 = arith.constant 0 : index
    %95 = vector.load %arg10[%c0_44, %c0_45, %c0_46] : memref<1x1x128xf32, #tpu.memory_space<vmem>>, vector<1x1x128xf32>
    %96 = vector.shape_cast %95 : vector<1x1x128xf32> to vector<1x128xf32>
    %97 = vector.broadcast %96 : vector<1x128xf32> to vector<128x128xf32>
    %98 = arith.addf %94, %97 : vector<128x128xf32>
    %99 = arith.addf %69, %98 : vector<128x128xf32>
    %c0_47 = arith.constant 0 : index
    %c0_48 = arith.constant 0 : index
    %100 = vector.load %arg12[%c0_47, %c0_48] : memref<128x128xf32, #tpu.memory_space<vmem>>, vector<128x128xf32>
    tpu.vector_store %arg12[%c0_47, %c0_48], %99 {strides = array<i32>} : memref<128x128xf32, #tpu.memory_space<vmem>>, vector<128x128xf32>,
    %c1_i32 = arith.constant 1 : i32
    %101 = arith.cmpi eq, %arg1, %c1_i32 : i32
    %102 = arith.extui %101 : i1 to i32
    %c0_i32_49 = arith.constant 0 : i32
    %103 = arith.cmpi ne, %102, %c0_i32_49 : i32
    scf.if %103 {
      %c0_50 = arith.constant 0 : index
      %c0_51 = arith.constant 0 : index
      %104 = vector.load %arg11[%c0_50, %c0_51] : memref<128x128xf32, #tpu.memory_space<vmem>>, vector<128x128xf32>
      tpu.vector_store %arg11[%c0_50, %c0_51], %99 {strides = array<i32>} : memref<128x128xf32, #tpu.memory_space<vmem>>, vector<128x128xf32>,
    } else {
    }
    return
  }
  func.func @transform_0(%arg0: i32, %arg1: i32) -> (i32, i32) {
    %c0_i32 = arith.constant 0 : i32
    %c0_i32_0 = arith.constant 0 : i32
    return %arg0, %c0_i32 : i32, i32
  }
  func.func @transform_1(%arg0: i32, %arg1: i32) -> (i32, i32, i32) {
    %c0_i32 = arith.constant 0 : i32
    %c0_i32_0 = arith.constant 0 : i32
    %c0_i32_1 = arith.constant 0 : i32
    return %arg1, %c0_i32, %c0_i32_0 : i32, i32, i32
  }
  func.func @transform_2(%arg0: i32, %arg1: i32) -> (i32, i32, i32) {
    %c0_i32 = arith.constant 0 : i32
    %c0_i32_0 = arith.constant 0 : i32
    %c0_i32_1 = arith.constant 0 : i32
    return %arg1, %c0_i32, %c0_i32_0 : i32, i32, i32
  }
  func.func @transform_3(%arg0: i32, %arg1: i32) -> (i32, i32, i32) {
    %c0_i32 = arith.constant 0 : i32
    %c0_i32_0 = arith.constant 0 : i32
    %c0_i32_1 = arith.constant 0 : i32
    return %arg1, %c0_i32, %c0_i32_0 : i32, i32, i32
  }
  func.func @transform_4(%arg0: i32, %arg1: i32) -> (i32, i32, i32) {
    %c0_i32 = arith.constant 0 : i32
    %c0_i32_0 = arith.constant 0 : i32
    %c0_i32_1 = arith.constant 0 : i32
    return %arg1, %c0_i32, %c0_i32_0 : i32, i32, i32
  }
  func.func @transform_5(%arg0: i32, %arg1: i32) -> (i32, i32, i32) {
    %c0_i32 = arith.constant 0 : i32
    %c0_i32_0 = arith.constant 0 : i32
    %c0_i32_1 = arith.constant 0 : i32
    return %arg1, %c0_i32, %c0_i32_0 : i32, i32, i32
  }
  func.func @transform_6(%arg0: i32, %arg1: i32) -> (i32, i32, i32) {
    %c0_i32 = arith.constant 0 : i32
    %c0_i32_0 = arith.constant 0 : i32
    %c0_i32_1 = arith.constant 0 : i32
    return %arg1, %c0_i32, %c0_i32_0 : i32, i32, i32
  }
  func.func @transform_7(%arg0: i32, %arg1: i32) -> (i32, i32, i32) {
    %c0_i32 = arith.constant 0 : i32
    %c0_i32_0 = arith.constant 0 : i32
    %c0_i32_1 = arith.constant 0 : i32
    return %arg1, %c0_i32, %c0_i32_0 : i32, i32, i32
  }
  func.func @transform_8(%arg0: i32, %arg1: i32) -> (i32, i32, i32) {
    %c0_i32 = arith.constant 0 : i32
    %c0_i32_0 = arith.constant 0 : i32
    %c0_i32_1 = arith.constant 0 : i32
    return %arg1, %c0_i32, %c0_i32_0 : i32, i32, i32
  }
  func.func @transform_9(%arg0: i32, %arg1: i32) -> (i32, i32) {
    %c0_i32 = arith.constant 0 : i32
    %c0_i32_0 = arith.constant 0 : i32
    return %arg0, %c0_i32 : i32, i32
  }
}

</mosaic_0001>

<bundles_post_ra>
// kernel: tpu_custom_call.1
= control target key start
LH: loop header
LB: loop body
LE: loop exit
PB: predicated region body
PF: predicated region fallthrough
CT: control target
= control target key end

     0   :  { %s8482_s0 = inlined_call_operand.hbm [shape: f32[256,128], index: 0, kind: input, shape index: {}]   ;;  %s8483_s1 = inlined_call_operand.hbm [shape: bf16[2,128,512], index: 1, kind: input, shape index: {}]   ;;  %s8484_s2 = inlined_call_operand.hbm [shape: f32[2,1,512], index: 2, kind: input, shape index: {}]   ;;  %s8485_s3 = inlined_call_operand.hbm [shape: bf16[2,512,128], index: 3, kind: input, shape index: {}]   ;;  %s8486_s4 = inlined_call_operand.vmem [shape: f32[2,1,128], index: 4, kind: input, shape index: {}]   ;;  %s8487_s5 = inlined_call_operand.hbm [shape: bf16[2,128,512], index: 5, kind: input, shape index: {}]   ;;  %s8488_s6 = inlined_call_operand.vmem [shape: f32[2,1,512], index: 6, kind: input, shape index: {}]   ;;  %s8489_s7 = inlined_call_operand.hbm [shape: bf16[2,512,128], index: 7, kind: input, shape index: {}]   ;;  %s8490_s8 = inlined_call_operand.vmem [shape: f32[2,1,128], index: 8, kind: input, shape index: {}]   ;;  %s8491_s9 = inlined_call_operand.hbm [shape: f32[256,128], index: 9, kind: output, shape index: {}]  }
   0x1   :  { %8629 = sst [smem:[#allocation106_spill]] %s8482_s0 }
   0x2   :  { %8630 = sst [smem:[#allocation107_spill]] %s8483_s1 }
   0x3   :  { %8631 = sst [smem:[#allocation108_spill]] %s8484_s2 }
   0x4   :  { %8632 = sst [smem:[#allocation109_spill]] %s8485_s3 }
   0x5   :  { %8633 = sst [smem:[#allocation110_spill]] %s8486_s4 }
   0x6   :  { %8634 = sst [smem:[#allocation111_spill]] %s8487_s5 }
   0x7   :  { %8635 = sst [smem:[#allocation112_spill]] %s8488_s6 }
   0x8   :  { %8636 = sst [smem:[#allocation113_spill]] %s8490_s8 }
   0x9   :  { %8637 = sst [smem:[#allocation114_spill]] %s8491_s9 }
   0xa   :  { %14 = vsyncpa [#allocation4], 0 }
   0xb   :  { %16 = vsyncpa [#allocation4 + $0x1], 0 }
   0xc   :  { %17 = vsyncpa [#allocation7], 0 }
   0xd   :  { %19 = vsyncpa [#allocation7 + $0x1], 0 }
   0xe   :  { %20 = vsyncpa [#allocation10], 0 }
   0xf   :  { %22 = vsyncpa [#allocation10 + $0x1], 0 }
  0x10   :  { %23 = vsyncpa [#allocation13], 0 }
  0x11   :  { %25 = vsyncpa [#allocation13 + $0x1], 0 }
  0x12   :  { %26 = vsyncpa [#allocation5], 0 }
  0x13   :  { %28 = vsyncpa [#allocation5 + $0x1], 0  ;;  %s5768_s30 = smov 0   ;;  %s5770_s10 = smov 0  }
  0x14   :  { %s5772_s11 = smov 0   ;;  %s5774_s12 = smov 0  }
  0x15   :  { %s5776_s13 = smov 0   ;;  %s5778_s14 = smov 0  }
  0x16   :  { %s5780_s15 = smov 0   ;;  %s5782_s16 = smov 0  }
  0x17   :  { %s5784_s17 = smov 0   ;;  %s5786_s18 = smov 0  }
  0x18   :  { %s5788_s19 = smov 0  }
  0x19 LB: > { %8638 = sst [smem:[#allocation20_spill]] %s5664_s10  ;;  %s43_s20 = sadd.s32 1, %s5692_s17  ;;  %s5700_s19 = sphi %s5788_s19, %s34_s19   ;;  %s5696_s18 = sphi %s5786_s18, %s8944_s18   ;;  %s5692_s17 = sphi %s5784_s17, %s8948_s17   ;;  %s5688_s16 = sphi %s5782_s16, %s8942_s16   ;;  %s5684_s15 = sphi %s5780_s15, %s8947_s15   ;;  %s5680_s14 = sphi %s5778_s14, %s8941_s14   ;;  %s5676_s13 = sphi %s5776_s13, %s8946_s13   ;;  %s5672_s12 = sphi %s5774_s12, %s8945_s12   ;;  %s5668_s11 = sphi %s5772_s11, %s8939_s11   ;;  %s5664_s10 = sphi %s5770_s10, %s8938_s10   ;;  %s5660_s30 = sphi %s5768_s30, %s8937_s30  }
  0x1a   : > { %8639 = sst [smem:[#allocation21_spill]] %s5668_s11  ;;  %p8496_p0 = scmp.eq.s32.totalorder %s5700_s19, 0 }
  0x1b   : > { %8640 = sst [smem:[#allocation22_spill]] %s5680_s14  ;;  %p5825_p1 = scmp.ge.s32.totalorder %s43_s20, 2 }
  0x1c   : > { %8641 = sst [smem:[#allocation23_spill]] %s5684_s15  ;;  %s79_s22 = sadd.s32 1, %s5668_s11 }
  0x1d   : > { %8642 = sst [smem:[#allocation24_spill]] %s5688_s16  ;;  %p86_p2 = scmp.ne.s32.totalorder %s5668_s11, %s5664_s10 }
  0x1e   : > { %8643 = sst [smem:[#allocation25_spill]] %s5696_s18  ;;  %s8950_s20 = smov (%p5825_p1, %s43_s20), 0 }
  0x1f   : > { %s8644_s21 = scalar_select %p5825_p1, 1, 0 }
  0x20   : > { %8645 = sst [smem:[#allocation26_spill]] %s8950_s20  ;;  %p88_p4 = por %p86_p2, %p8496_p0 }
  0x21   : > { %s76_s23 = ssub.s32 %s5692_s17, %s8950_s20  ;;  %p8495_p5 = scmp.lt.s32.totalorder %s5700_s19, 4 }
  0x22   : > { %p77_p6 = scmp.eq.s32.totalorder %s76_s23, 0  ;;  %s5845_s25 = sand.u32 1, %s5668_s11  }
  0x23   : > { %s5851_s27 = sshll.u32 %s5845_s25, 8  ;;  %s5854_s28 = sshll.u32 %s5692_s17, 12 }
  0x24   : > { %s5848_s26 = scalar_select %p77_p6, %s5668_s11, %s79_s22  }
  0x25   : > { %s8647_s1 = sld [smem:[#allocation107_spill]]  ;;  %s349_s23 = scalar_lea.vmem [#allocation6], %s5851_s27 }
  0x26   : > { %8646 = sst [smem:[#allocation27_spill]] %s5848_s26  ;;  %s356_s24 = sshll.u32 %s349_s23, 4  ;;  %s5869_s24 = int_to_ptr.vmem [resolvable:$true] %s356_s24 }
  0x27   : > { %p5865_p7 = pnand %p8495_p5, %p88_p4  ;;  %s8649_s20 = sand.u32 1, %s5700_s19  }
  0x28   : > { %s5873_s26 = scalar_lea.sflag [#allocation7], %s8649_s20 }
  0x29   : > { %s8648_s22 = scalar_select %p5865_p7, 1, 0 }
  0x2a   : > { %p5879_p9 = pneg %p5865_p7 }
  0x2b   : > { %s5860_s16 = scalar_lea.hbm %s8647_s1, %s5854_s28  ;;  %s5391_s8 = scalar_lea.hbm %s8647_s1, 8192 }
  0x2c   : > { %s5386_s9 = scalar_lea.hbm %s5860_s16, 4096  ;;  %p5392_p12 = scmp.lt.u32.totalorder %s5860_s16, %s8647_s1 }
  0x2d   : > { %p5387_p8 = scmp.ne.s32.totalorder %s5860_s16, %s5386_s9  ;;  %p5393_p13 = scmp.lt.u32.totalorder %s5391_s8, %s5386_s9 }
  0x2e   : > { %p5395_p4 = scmp.lt.u32.totalorder %s5386_s9, %s5860_s16 }
  0x2f   : > { %p5389_p10 = pnand %p5879_p9, %p5387_p8  ;;  %p5394_p2 = por %p5393_p13, %p5392_p12 }
  0x31   : > { %p5390_p11 = pneg %p5389_p10  ;;  %p5396_p6 = por %p5395_p4, %p5394_p2 }
  0x33   : > { %p5397_p5 = pnand %p5396_p6, %p5390_p11 }
  0x35   : > { %5400 = shalt.err (!%p5397_p5)
}
  0x36   : > { %s5401_s20 = scalar_lea.vmem %s5869_s24, 4096  ;;  %s5702_s11 = smov [#allocation6]  }
  0x37   : > { %p5402_p8 = scmp.ne.s32.totalorder %s5869_s24, %s5401_s20  ;;  %s5406_s23 = sshll.u32 %s5702_s11, 4  ;;  %s5407_s23 = int_to_ptr.vmem [resolvable:$false] %s5406_s23 }
  0x38   : > { %s5408_s4 = scalar_lea.vmem %s5407_s23, 8192  ;;  %p5409_p0 = scmp.lt.s32.totalorder %s5869_s24, %s5407_s23 }
  0x39   : > { %p5404_p10 = pnand %p5402_p8, %p5879_p9  ;;  %p5410_p1 = scmp.lt.s32.totalorder %s5408_s4, %s5401_s20 }
  0x3b   : > { %p5405_p3 = pneg %p5404_p10  ;;  %p5411_p12 = por %p5410_p1, %p5409_p0 }
  0x3d   : > { %p5412_p13 = pnand %p5411_p12, %p5405_p3 }
  0x3f   : > { %5415 = shalt.err (!%p5412_p13)
}
  0x40   : > { %s8498_s6 = smov 256   ;;  %s8499_s8 = smov 16  }
  0x41   : > { %4790 = dma.hbm_to_vmem [thread:$0]  (!%p5865_p7), %s5860_s16, 4096, %s5869_s24, %s5873_s26, %s8498_s6, %s8498_s6, %s8499_s8  }
  0x42   : > { %p4361_p0 = scmp.ge.s32.totalorder %s5700_s19, 1  ;;  %p465_p1 = scmp.lt.s32.totalorder %s5700_s19, 5 }
  0x43   : > { %s8653_s3 = sld [smem:[#allocation109_spill]]  ;;  %s389_s4 = scalar_lea.vmem [#allocation9], %s5851_s27 }
  0x44   : > { %p5908_p3 = pnand %p4361_p0, %p465_p1  ;;  %s396_s1 = sshll.u32 %s389_s4, 4  ;;  %s5919_s1 = int_to_ptr.vmem [resolvable:$true] %s396_s1 }
  0x45   : > { %s8654_s16 = sand.u32 1, %s5700_s19  }
  0x46   : > { %s8651_s9 = scalar_select %p5908_p3, 1, 0 }
  0x47   : > { %s5923_s24 = scalar_lea.sflag [#allocation10], %s8654_s16 }
  0x48   : > { %8652 = sst [smem:[#allocation28_spill]] %s8651_s9 }
  0x49   : > { %s5916_s23 = scalar_lea.hbm %s8653_s3, %s5854_s28  ;;  %s5421_s11 = scalar_lea.hbm %s8653_s3, 8192 }
  0x4a   : > { %s5416_s6 = scalar_lea.hbm %s5916_s23, 4096  ;;  %p5422_p4 = scmp.lt.u32.totalorder %s5916_s23, %s8653_s3 }
  0x4b   : > { %p5417_p5 = scmp.ne.s32.totalorder %s5916_s23, %s5416_s6  ;;  %p5423_p6 = scmp.lt.u32.totalorder %s5421_s11, %s5416_s6 }
  0x4c   : > { %p5425_p10 = scmp.lt.u32.totalorder %s5416_s6, %s5916_s23 }
  0x4d   : > { %p5419_p11 = pnand %p5417_p5, %p5879_p9  ;;  %p5424_p8 = por %p5423_p6, %p5422_p4 }
  0x4f   : > { %p5420_p2 = pneg %p5419_p11  ;;  %p5426_p12 = por %p5425_p10, %p5424_p8 }
  0x51   : > { %p5427_p13 = pnand %p5426_p12, %p5420_p2 }
  0x53   : > { %5430 = shalt.err (!%p5427_p13)
}
  0x54   : > { %s5431_s4 = scalar_lea.vmem %s5919_s1, 4096  ;;  %s5705_s8 = smov [#allocation9]  }
  0x55   : > { %p5432_p0 = scmp.ne.s32.totalorder %s5919_s1, %s5431_s4  ;;  %s5436_s16 = sshll.u32 %s5705_s8, 4  ;;  %s5437_s16 = int_to_ptr.vmem [resolvable:$false] %s5436_s16 }
  0x56   : > { %s5438_s15 = scalar_lea.vmem %s5437_s16, 8192  ;;  %p5439_p11 = scmp.lt.s32.totalorder %s5919_s1, %s5437_s16 }
  0x57   : > { %p5434_p1 = pnand %p5432_p0, %p5879_p9  ;;  %p5440_p3 = scmp.lt.s32.totalorder %s5438_s15, %s5431_s4 }
  0x59   : > { %p5435_p5 = pneg %p5434_p1  ;;  %p5441_p4 = por %p5440_p3, %p5439_p11 }
  0x5b   : > { %p5442_p6 = pnand %p5441_p4, %p5435_p5 }
  0x5d   : > { %5445 = shalt.err (!%p5442_p6)
}
  0x5e   : > { %s8502_s6 = smov 64   ;;  %s8503_s9 = smov 4  }
  0x5f   : > { %4796 = dma.hbm_to_vmem [thread:$0]  (!%p5865_p7), %s5916_s23, 4096, %s5919_s1, %s5923_s24, %s8502_s6, %s8502_s6, %s8503_s9  }
  0x60   : > { %s5951_s20 = sadd.s32 4294967295, %s5700_s19   ;;  %s4340_s11 = sadd.s32 4294967294, %s5700_s19  }
  0x61   : > { %8655 = sst [smem:[#allocation29_spill]] %s5951_s20  ;;  %s46_s4 = sadd.s32 1, %s5696_s18 }
  0x62   : > { %s53_s8 = sadd.s32 1, %s5680_s14  ;;  %p8656_p3 = scmp.ne.s32.totalorder %s8644_s21, 0 }
  0x63   : > { %p60_p2 = scmp.ne.s32.totalorder %s5680_s14, %s5676_s13  ;;  %p66_p8 = scmp.ne.s32.totalorder %s5676_s13, %s5672_s12 }
  0x64   : > { %s8952_s4 = smov (!%p8656_p3, %s46_s4), %s5696_s18  ;;  %p67_p12 = scmp.eq.s32.totalorder %s5951_s20, 0 }
  0x65   : > { %p48_p10 = scmp.ge.s32.totalorder %s8952_s4, 2  ;;  %p8657_p13 = scmp.eq.s32.totalorder %s5700_s19, 0 }
  0x66   : > { %p298_p1 = scmp.eq.s32.totalorder %s5951_s20, 3  ;;  %p5976_p5 = por %p67_p12, %p66_p8 }
  0x67   : > { %p5966_p0 = por %p8657_p13, %p60_p2  ;;  %s8954_s4 = smov (%p48_p10, %s8952_s4), 0 }
  0x68   : > { %8659 = sst [smem:[#allocation30_spill]] %s8954_s4  ;;  %p8662_p11 = scmp.ne.s32.totalorder %s5664_s10, %s5660_s30 }
  0x69   : > { %s8660_s21 = scalar_select %p5976_p5, 1, 0 }
  0x6a   : > { %p5983_p4 = por %p8662_p11, %p67_p12  ;;  %s50_s16 = ssub.s32 %s5696_s18, %s8954_s4 }
  0x6b   : > { %8661 = sst [smem:[#allocation31_spill]] %s8660_s21  ;;  %p5989_p6 = por %p298_p1, %p60_p2 }
  0x6c   : > { %s8663_s23 = scalar_select %p5983_p4, 1, 0 }
  0x6d   : > { %s8664_s15 = scalar_select %p5989_p6, 1, 0 }
  0x6e   : > { %p51_p3 = scmp.eq.s32.totalorder %s50_s16, 0  ;;  %p304_p10 = scmp.eq.s32.totalorder %s4340_s11, 3 }
  0x6f   : > { %s324_s6 = sand.u32 1, %s5680_s14   ;;  %s4507_s9 = sshll.u32 %s5696_s18, 11 }
  0x70   : > { %s5996_s3 = scalar_select %p51_p3, %s5680_s14, %s53_s8  }
  0x71   : > { %p6001_p13 = por %p304_p10, %p66_p8  ;;  %s4343_s30 = sshll.u32 %s324_s6, 7 }
  0x72   : > { %8665 = sst [smem:[#allocation32_spill]] %s5996_s3  ;;  %p8668_p2 = scmp.lt.s32.totalorder %s5700_s19, 4 }
  0x73   : > { %s8666_s20 = scalar_select %p6001_p13, 1, 0 }
  0x74   : > { %s8667_s0 = sld [smem:[#allocation106_spill]]  ;;  %p6014_p12 = pnand %p8668_p2, %p5966_p0 }
  0x75   : > { %s328_s8 = scalar_lea.vmem [#allocation3], %s4343_s30  ;;  %s4349_s18 = sshll.u32 %s5845_s25, 2 }
  0x76   : > { %s335_s16 = sshll.u32 %s328_s8, 4  ;;  %s6021_s10 = scalar_lea.sflag [#allocation4], %s324_s6  ;;  %s6018_s16 = int_to_ptr.vmem [resolvable:$true] %s335_s16 }
  0x77   : > { %p5448_p1 = pneg %p6014_p12 }
  0x7a   : > { %s6008_s4 = scalar_lea.hbm %s8667_s0, %s4507_s9  ;;  %s5451_s3 = scalar_lea.hbm %s8667_s0, 4096 }
  0x7b   : > { %s5446_s9 = scalar_lea.hbm %s6008_s4, 2048  ;;  %p5452_p3 = scmp.lt.u32.totalorder %s6008_s4, %s8667_s0 }
  0x7c   : > { %p5447_p8 = scmp.ne.s32.totalorder %s6008_s4, %s5446_s9  ;;  %p5453_p10 = scmp.lt.u32.totalorder %s5451_s3, %s5446_s9 }
  0x7d   : > { %p5455_p13 = scmp.lt.u32.totalorder %s5446_s9, %s6008_s4 }
  0x7e   : > { %p5449_p11 = pnand %p5448_p1, %p5447_p8  ;;  %p5454_p2 = por %p5453_p10, %p5452_p3 }
  0x80   : > { %p5450_p0 = pneg %p5449_p11  ;;  %p5456_p6 = por %p5455_p13, %p5454_p2 }
  0x82   : > { %p5457_p4 = pnand %p5456_p6, %p5450_p0 }
  0x84   : > { %5460 = shalt.err (!%p5457_p4)
}
  0x85   : > { %s5461_s6 = scalar_lea.vmem %s6018_s16, 2048  ;;  %s5708_s8 = smov [#allocation3]  }
  0x86   : > { %p5462_p8 = scmp.ne.s32.totalorder %s6018_s16, %s5461_s6  ;;  %s5466_s1 = sshll.u32 %s5708_s8, 4  ;;  %s5467_s1 = int_to_ptr.vmem [resolvable:$false] %s5466_s1 }
  0x87   : > { %s5468_s14 = scalar_lea.vmem %s5467_s1, 4096  ;;  %p5469_p7 = scmp.lt.s32.totalorder %s6018_s16, %s5467_s1 }
  0x88   : > { %p5464_p11 = pnand %p5462_p8, %p5448_p1  ;;  %p5470_p3 = scmp.lt.s32.totalorder %s5468_s14, %s5461_s6 }
  0x8a   : > { %p5465_p5 = pneg %p5464_p11  ;;  %p5471_p10 = por %p5470_p3, %p5469_p7 }
  0x8c   : > { %p5472_p13 = pnand %p5471_p10, %p5465_p5 }
  0x8e   : > { %5475 = shalt.err (!%p5472_p13)
}
  0x8f   : > { %s5709_s3 = smov 128   ;;  %s5710_s9 = smov 8  }
  0x90   : > { %4787 = dma.hbm_to_vmem [thread:$0]  (!%p6014_p12), %s6008_s4, 2048, %s6018_s16, %s6021_s10, %s5709_s3, %s5709_s3, %s5710_s9  }
  0x91   : > { %s4509_s21 = sshll.u32 %s5692_s17, 6  ;;  %s8670_s2 = sld [smem:[#allocation108_spill]] }
  0x92   : > { %s370_s6 = scalar_lea.vmem [#allocation8], %s4349_s18 }
  0x93   : > { %s378_s14 = sshll.u32 %s370_s6, 4  ;;  %s379_s14 = int_to_ptr.vmem [resolvable:$true] %s378_s14 }
  0x97   : > { %s6053_s1 = scalar_lea.hbm %s8670_s2, %s4509_s21  ;;  %s5481_s16 = scalar_lea.hbm %s8670_s2, 128 }
  0x98   : > { %s5476_s0 = scalar_lea.hbm %s6053_s1, 64  ;;  %p5482_p6 = scmp.lt.u32.totalorder %s6053_s1, %s8670_s2 }
  0x99   : > { %p5477_p7 = scmp.ne.s32.totalorder %s6053_s1, %s5476_s0  ;;  %p5483_p12 = scmp.lt.u32.totalorder %s5481_s16, %s5476_s0 }
  0x9a   : > { %p5485_p0 = scmp.lt.u32.totalorder %s5476_s0, %s6053_s1 }
  0x9b   : > { %p5479_p5 = pnand %p5477_p7, %p5879_p9  ;;  %p5484_p1 = por %p5483_p12, %p5482_p6 }
  0x9d   : > { %p5480_p4 = pneg %p5479_p5  ;;  %p5486_p2 = por %p5485_p0, %p5484_p1 }
  0x9f   : > { %p5487_p8 = pnand %p5486_p2, %p5480_p4 }
  0xa1   : > { %5490 = shalt.err (!%p5487_p8)
}
  0xa2   : > { %s5491_s18 = scalar_lea.vmem %s379_s14, 64  ;;  %s5711_s9 = smov [#allocation8]  }
  0xa3   : > { %p5492_p11 = scmp.ne.s32.totalorder %s379_s14, %s5491_s18  ;;  %s5496_s21 = sshll.u32 %s5711_s9, 4  ;;  %s5497_s21 = int_to_ptr.vmem [resolvable:$false] %s5496_s21 }
  0xa4   : > { %s5498_s30 = scalar_lea.vmem %s5497_s21, 128  ;;  %p5499_p13 = scmp.lt.s32.totalorder %s379_s14, %s5497_s21 }
  0xa5   : > { %p5494_p3 = pnand %p5492_p11, %p5879_p9  ;;  %p5500_p7 = scmp.lt.s32.totalorder %s5498_s30, %s5491_s18 }
  0xa7   : > { %p5495_p10 = pneg %p5494_p3  ;;  %p5501_p5 = por %p5500_p7, %p5499_p13 }
  0xa9   : > { %p5502_p6 = pnand %p5501_p5, %p5495_p10 }
  0xab   : > { %5505 = shalt.err (!%p5502_p6)
}
  0xac   : > { %p8671_p12 = scmp.ne.s32.totalorder %s8648_s22, 0  ;;  %s8672_s5 = sld [smem:[#allocation111_spill]] }
  0xad   : > { %s416_s4 = scalar_lea.vmem [#allocation11], %s5851_s27 }
  0xae   : > { %4793 = dma.hbm_to_vmem [thread:$0]  (!%p8671_p12), %s6053_s1, 64, %s379_s14, %s5873_s26  }
  0xaf   : > { %s423_s11 = sshll.u32 %s416_s4, 4  ;;  %s6082_s11 = int_to_ptr.vmem [resolvable:$true] %s423_s11 }
  0xb2   : > { %s6079_s6 = scalar_lea.hbm %s8672_s5, %s5854_s28  ;;  %s5511_s1 = scalar_lea.hbm %s8672_s5, 8192 }
  0xb3   : > { %s5506_s16 = scalar_lea.hbm %s6079_s6, 4096  ;;  %p5512_p2 = scmp.lt.u32.totalorder %s6079_s6, %s8672_s5 }
  0xb4   : > { %p5507_p4 = scmp.ne.s32.totalorder %s6079_s6, %s5506_s16  ;;  %p5513_p8 = scmp.lt.u32.totalorder %s5511_s1, %s5506_s16 }
  0xb5   : > { %p5515_p3 = scmp.lt.u32.totalorder %s5506_s16, %s6079_s6 }
  0xb6   : > { %p5509_p1 = pnand %p5507_p4, %p5879_p9  ;;  %p5514_p11 = por %p5513_p8, %p5512_p2 }
  0xb8   : > { %p5510_p0 = pneg %p5509_p1  ;;  %p5516_p10 = por %p5515_p3, %p5514_p11 }
  0xba   : > { %p5517_p13 = pnand %p5516_p10, %p5510_p0 }
  0xbc   : > { %5520 = shalt.err (!%p5517_p13)
}
  0xbd   : > { %s5521_s18 = scalar_lea.vmem %s6082_s11, 4096  ;;  %s5712_s9 = smov [#allocation11]  }
  0xbe   : > { %p5522_p7 = scmp.ne.s32.totalorder %s6082_s11, %s5521_s18  ;;  %s5526_s21 = sshll.u32 %s5712_s9, 4  ;;  %s5527_s21 = int_to_ptr.vmem [resolvable:$false] %s5526_s21 }
  0xbf   : > { %s5528_s30 = scalar_lea.vmem %s5527_s21, 8192  ;;  %p5529_p4 = scmp.lt.s32.totalorder %s6082_s11, %s5527_s21 }
  0xc0   : > { %p5524_p5 = pnand %p5522_p7, %p5879_p9  ;;  %p5530_p1 = scmp.lt.s32.totalorder %s5528_s30, %s5521_s18 }
  0xc2   : > { %p5525_p6 = pneg %p5524_p5  ;;  %p5531_p2 = por %p5530_p1, %p5529_p4 }
  0xc4   : > { %p5532_p8 = pnand %p5531_p2, %p5525_p6 }
  0xc6   : > { %5535 = shalt.err (!%p5532_p8)
}
  0xc7   : > { %s8673_s0 = smov 16   ;;  %s8674_s8 = smov 256  }
  0xc8   : > { %4799 = dma.hbm_to_vmem [thread:$0]  (!%p8671_p12), %s6079_s6, 4096, %s6082_s11, %s5923_s24, %s8674_s8, %s8674_s8, %s8673_s0  }
  0xc9   : > { %s6113_s10 = scalar_lea.hbm %s8489_s7, %s5854_s28  ;;  %s444_s26 = scalar_lea.vmem [#allocation12], %s5851_s27 }
  0xca   : > { %s451_s1 = sshll.u32 %s444_s26, 4  ;;  %s441_s14 = scalar_lea.sflag [#allocation13], %s5845_s25  ;;  %s6116_s1 = int_to_ptr.vmem [resolvable:$true] %s451_s1 }
  0xcb   : > { %s5536_s3 = scalar_lea.hbm %s6113_s10, 4096  ;;  %s5541_s11 = scalar_lea.hbm %s8489_s7, 8192 }
  0xcc   : > { %p5537_p0 = scmp.ne.s32.totalorder %s6113_s10, %s5536_s3  ;;  %p5542_p10 = scmp.lt.u32.totalorder %s6113_s10, %s8489_s7 }
  0xcd   : > { %p5543_p13 = scmp.lt.u32.totalorder %s5541_s11, %s5536_s3  ;;  %p5545_p5 = scmp.lt.u32.totalorder %s5536_s3, %s6113_s10 }
  0xce   : > { %p5539_p11 = pnand %p5537_p0, %p5879_p9 }
  0xcf   : > { %p5544_p7 = por %p5543_p13, %p5542_p10 }
  0xd0   : > { %p5540_p3 = pneg %p5539_p11 }
  0xd1   : > { %p5546_p6 = por %p5545_p5, %p5544_p7 }
  0xd3   : > { %p5547_p4 = pnand %p5546_p6, %p5540_p3 }
  0xd5   : > { %5550 = shalt.err (!%p5547_p4)
}
  0xd6   : > { %s5551_s27 = scalar_lea.vmem %s6116_s1, 4096  ;;  %s5713_s9 = smov [#allocation12]  }
  0xd7   : > { %p5552_p1 = scmp.ne.s32.totalorder %s6116_s1, %s5551_s27  ;;  %s5556_s21 = sshll.u32 %s5713_s9, 4  ;;  %s5557_s21 = int_to_ptr.vmem [resolvable:$false] %s5556_s21 }
  0xd8   : > { %s5558_s30 = scalar_lea.vmem %s5557_s21, 8192  ;;  %p5559_p0 = scmp.lt.s32.totalorder %s6116_s1, %s5557_s21 }
  0xd9   : > { %p5554_p2 = pnand %p5552_p1, %p5879_p9  ;;  %p5560_p11 = scmp.lt.s32.totalorder %s5558_s30, %s5551_s27 }
  0xdb   : > { %p5555_p8 = pneg %p5554_p2  ;;  %p5561_p10 = por %p5560_p11, %p5559_p0 }
  0xdd   : > { %p5562_p13 = pnand %p5561_p10, %p5555_p8 }
  0xdf   : > { %5565 = shalt.err (!%p5562_p13)
}
  0xe0   : > { %s8675_s0 = smov 4   ;;  %s8676_s8 = smov 64  }
  0xe1   : > { %4802 = dma.hbm_to_vmem [thread:$0]  (!%p8671_p12), %s6113_s10, 4096, %s6116_s1, %s441_s14, %s8676_s8, %s8676_s8, %s8675_s0  }
  0xe2   : > { %s8677_s29 = sld [smem:[#allocation28_spill]] }
  0xe8   : > { %p8678_p9 = scmp.ne.s32.totalorder %s8677_s29, 0 }
  0xea   : > { %469 = sbr.rel (%p8678_p9) target bundleno = 2053 (0x805), region = 56 }
  0xf1   : > { %s8679_s4 = sld [smem:[#allocation31_spill]]  ;;  %s6148_s16 = sand.u32 1, %s5676_s13  }
  0xf2   : > { %s8516_s26 = sshll.u32 %s6148_s16, 7  ;;  %s472_s22 = scalar_lea.sflag [#allocation4], %s6148_s16 }
  0xf3   : > { %s6154_s3 = scalar_lea.vmem [#allocation3], %s8516_s26 }
  0xf7   : > { %p8680_p3 = scmp.ne.s32.totalorder %s8679_s4, 0 }
  0xf9   : > { %5639 = dma.done.wait (%p8680_p3), %s472_s22, 2048  }
  0xfa   : > { %5641 = vsyncadd (%p8680_p3), %s472_s22, 4294965248  ;;  %s8681_s25 = sld [smem:[#allocation29_spill]]  ;;  %s8682_s10 = sld [smem:[#allocation20_spill]] }
  0xfb   : > { %p8683_p12 = scmp.ne.s32.totalorder %s8663_s23, 0 }
 0x100   : > { %s480_s1 = sand.u32 1, %s8681_s25   ;;  %s482_s14 = sand.u32 1, %s8682_s10  }
 0x101   : > { %s4363_s24 = sshll.u32 %s482_s14, 8  ;;  %s481_s6 = scalar_lea.sflag [#allocation7], %s480_s1 }
 0x102   : > { %s6162_s11 = scalar_lea.vmem [#allocation6], %s4363_s24 }
 0x103   : > { %5643 = dma.done.wait (%p8683_p12), %s481_s6, 4160  }
 0x104   : > { %5645 = vsyncadd (%p8683_p12), %s481_s6, 4294963136  ;;  %s4364_s28 = sshll.u32 %s482_s14, 2  ;;  %s499_s27 = scalar_lea.sflag [#allocation10], %s480_s1 }
 0x105   : > { %s6168_s18 = scalar_lea.vmem [#allocation8], %s4364_s28  ;;  %s6170_s9 = scalar_lea.vmem [#allocation9], %s4363_s24 }
 0x106   : > { %5647 = dma.done.wait (%p8683_p12), %s499_s27, 8192  }
 0x107   : > { %5649 = vsyncadd (%p8683_p12), %s499_s27, 4294959104  ;;  %s6176_s21 = scalar_lea.vmem [#allocation11], %s4363_s24  ;;  %s517_s30 = scalar_lea.sflag [#allocation13], %s482_s14 }
 0x108   : > { %s6178_s0 = scalar_lea.vmem [#allocation12], %s4363_s24 }
 0x109   : > { %5651 = dma.done.wait (%p8683_p12), %s517_s30, 4096  }
 0x10a   : > { %5653 = vsyncadd (%p8683_p12), %s517_s30, 4294963200  ;;  %s8684_s8 = sld [smem:[#allocation23_spill]]  ;;  %s8685_s25 = sld [smem:[#allocation110_spill]] }
 0x10b   : > { %s8686_s6 = sld [smem:[#allocation112_spill]]  ;;  %s8687_s30 = sld [smem:[#allocation113_spill]] }
 0x10c   : > { %s8688_s2 = sshll.u32 %s6148_s16, 7 }
 0x10d   : > { %s6204_s5 = scalar_lea.vmem [#allocation14], %s8688_s2 }
 0x110   : > { %p591_p7 = scmp.lt.s32.totalorder %s8684_s8, 1  ;;  %p4370_p5 = scmp.ne.s32.totalorder %s8684_s8, 0 }
 0x111   : > { %v607_v0 = vld [vmem:[%s6154_s3] sm:$0xff] (!%p4370_p5)  ;;  %v608_v1 = vld [vmem:[%s6154_s3 + $0x8] sm:$0xff] (!%p4370_p5)  ;;  %v609_v2 = vld [vmem:[%s6154_s3 + $0x10] sm:$0xff] (!%p4370_p5) }
 0x112   : > { %s6186_s29 = scalar_select %p591_p7, %s8684_s8, 1 }
 0x113   : > { %606 = sbr.rel (%p4370_p5) target bundleno = 283 (0x11b), region = 84  ;;  %623 = vst [vmem:[#allocation2] sm:$0xff] (!%p4370_p5), %v607_v0  ;;  %624 = vst [vmem:[#allocation2 + $0x8] sm:$0xff] (!%p4370_p5), %v608_v1  ;;  %v610_v3 = vld [vmem:[%s6154_s3 + $0x18] sm:$0xff] (!%p4370_p5)  ;;  %v611_v4 = vld [vmem:[%s6154_s3 + $0x20] sm:$0xff] (!%p4370_p5) }
 0x114   : > { %s593_s10 = scalar_lea.vmem %s8685_s25, %s6186_s29  ;;  %s4369_s1 = sshll.u32 %s6186_s29, 2  ;;  %625 = vst [vmem:[#allocation2 + $0x10] sm:$0xff] (!%p4370_p5), %v609_v2  ;;  %v612_v5 = vld [vmem:[%s6154_s3 + $0x28] sm:$0xff] (!%p4370_p5)  ;;  %626 = vst [vmem:[#allocation2 + $0x18] sm:$0xff] (!%p4370_p5), %v610_v3  ;;  %v613_v6 = vld [vmem:[%s6154_s3 + $0x30] sm:$0xff] (!%p4370_p5) }
 0x115   : > { %s6196_s28 = scalar_lea.vmem %s8686_s6, %s4369_s1  ;;  %s600_s26 = scalar_lea.vmem %s8687_s30, %s6186_s29  ;;  %627 = vst [vmem:[#allocation2 + $0x20] sm:$0xff] (!%p4370_p5), %v611_v4  ;;  %628 = vst [vmem:[#allocation2 + $0x28] sm:$0xff] (!%p4370_p5), %v612_v5  ;;  %v614_v7 = vld [vmem:[%s6154_s3 + $0x38] sm:$0xff] (!%p4370_p5)  ;;  %v615_v8 = vld [vmem:[%s6154_s3 + $0x40] sm:$0xff] (!%p4370_p5) }
 0x116   : > { %629 = vst [vmem:[#allocation2 + $0x30] sm:$0xff] (!%p4370_p5), %v613_v6  ;;  %630 = vst [vmem:[#allocation2 + $0x38] sm:$0xff] (!%p4370_p5), %v614_v7  ;;  %v616_v9 = vld [vmem:[%s6154_s3 + $0x48] sm:$0xff] (!%p4370_p5)  ;;  %v617_v10 = vld [vmem:[%s6154_s3 + $0x50] sm:$0xff] (!%p4370_p5) }
 0x117   : > { %631 = vst [vmem:[#allocation2 + $0x40] sm:$0xff] (!%p4370_p5), %v615_v8  ;;  %v618_v11 = vld [vmem:[%s6154_s3 + $0x58] sm:$0xff] (!%p4370_p5)  ;;  %632 = vst [vmem:[#allocation2 + $0x48] sm:$0xff] (!%p4370_p5), %v616_v9  ;;  %v619_v12 = vld [vmem:[%s6154_s3 + $0x60] sm:$0xff] (!%p4370_p5) }
 0x118   : > { %633 = vst [vmem:[#allocation2 + $0x50] sm:$0xff] (!%p4370_p5), %v617_v10  ;;  %634 = vst [vmem:[#allocation2 + $0x58] sm:$0xff] (!%p4370_p5), %v618_v11  ;;  %v620_v13 = vld [vmem:[%s6154_s3 + $0x68] sm:$0xff] (!%p4370_p5)  ;;  %v621_v14 = vld [vmem:[%s6154_s3 + $0x70] sm:$0xff] (!%p4370_p5) }
 0x119   : > { %635 = vst [vmem:[#allocation2 + $0x60] sm:$0xff] (!%p4370_p5), %v619_v12  ;;  %636 = vst [vmem:[#allocation2 + $0x68] sm:$0xff] (!%p4370_p5), %v620_v13  ;;  %v622_v15 = vld [vmem:[%s6154_s3 + $0x78] sm:$0xff] (!%p4370_p5) }
 0x11a   : > { %637 = vst [vmem:[#allocation2 + $0x70] sm:$0xff] %v621_v14  ;;  %638 = vst [vmem:[#allocation2 + $0x78] sm:$0xff] %v622_v15 }
 0x11b PF: > { %v639_v16 = vld [vmem:[#allocation2] sm:$0xff]  ;;  %v640_v18 = vld [vmem:[#allocation2 + $0x8] sm:$0xff] }
 0x11c   : > { %v641_v17 = vld [vmem:[#allocation2 + $0x10] sm:$0xff]  ;;  %655 = vadd.xlane.f32.xlu0 %v639_v16  ;;  %v642_v19 = vld [vmem:[#allocation2 + $0x18] sm:$0xff] }
 0x11d   : > { %659 = vadd.xlane.f32.xlu1 %v641_v17  ;;  %v6223_v20 = vld [vmem:[#allocation2 + $0x20] sm:$0xff]  ;;  %v6225_v21 = vld [vmem:[#allocation2 + $0x28] sm:$0xff] }
 0x11e   : > { %v6227_v22 = vld [vmem:[#allocation2 + $0x30] sm:$0xff]  ;;  %v6229_v23 = vld [vmem:[#allocation2 + $0x38] sm:$0xff] }
 0x11f   : > { %v6233_v24 = vld [vmem:[#allocation2 + $0x40] sm:$0xff]  ;;  %v6235_v25 = vld [vmem:[#allocation2 + $0x48] sm:$0xff] }
 0x120   : > { %657 = vadd.xlane.f32.xlu0 %v640_v18  ;;  %v6239_v26 = vld [vmem:[#allocation2 + $0x50] sm:$0xff]  ;;  %v6241_v27 = vld [vmem:[#allocation2 + $0x58] sm:$0xff] }
 0x121   : > { %661 = vadd.xlane.f32.xlu1 %v642_v19  ;;  %v6245_v28 = vld [vmem:[#allocation2 + $0x60] sm:$0xff]  ;;  %v6247_v29 = vld [vmem:[#allocation2 + $0x68] sm:$0xff]  ;;  %v6251_v30 = vld [vmem:[#allocation2 + $0x70] sm:$0xff] }
 0x122   : > { %v6253_v31 = vld [vmem:[#allocation2 + $0x78] sm:$0xff]  ;;  %v4906_v32 = vld [vmem:[%s6162_s11 + $0x4] ss:$16 sps:$4 sm:$0xff]   ;;  %v4910_v34 = vld [vmem:[%s6162_s11] ss:$16 sps:$4 sm:$0xff]  }
 0x123   : > { %v4908_v33 = vld [vmem:[%s6162_s11 + $0xc] ss:$16 sps:$4 sm:$0xff]   ;;  %v4911_v35 = vld [vmem:[%s6162_s11 + $0x8] ss:$16 sps:$4 sm:$0xff]   ;;  %v4912_v36 = vld [vmem:[%s6162_s11 + $0x24] ss:$16 sps:$4 sm:$0xff]   ;;  %1054 = vmatprep.subr.bf16.mxu0 %v4906_v32 }
 0x124   : > { %663 = vadd.xlane.f32.xlu0 %v6223_v20  ;;  %v4914_v37 = vld [vmem:[%s6162_s11 + $0x2c] ss:$16 sps:$4 sm:$0xff]   ;;  %1167 = vmatprep.subr.bf16.mxu1 %v4908_v33  ;;  %v4916_v38 = vld [vmem:[%s6162_s11 + $0x20] ss:$16 sps:$4 sm:$0xff]   ;;  %v4917_v39 = vld [vmem:[%s6162_s11 + $0x28] ss:$16 sps:$4 sm:$0xff]  }
 0x125   : > { %665 = vadd.xlane.f32.xlu1 %v6225_v21  ;;  %v4918_v40 = vld [vmem:[%s6162_s11 + $0x44] ss:$16 sps:$4 sm:$0xff]   ;;  %1055 = vmatpush1.bf16.msra.mxu0 %v4910_v34  ;;  %v4920_v41 = vld [vmem:[%s6162_s11 + $0x4c] ss:$16 sps:$4 sm:$0xff]  }
 0x126   : > { %1168 = vmatpush1.bf16.msra.mxu1 %v4911_v35  ;;  %1056 = vmatprep.subr.bf16.mxu0 %v4912_v36  ;;  %v4928_v36 = vld [vmem:[%s6162_s11 + $0x60] ss:$16 sps:$4 sm:$0xff]  }
 0x127   : > { %1169 = vmatprep.subr.bf16.mxu1 %v4914_v37  ;;  %v4929_v37 = vld [vmem:[%s6162_s11 + $0x68] ss:$16 sps:$4 sm:$0xff]  }
 0x128   : > { %667 = vadd.xlane.f32.xlu0 %v6227_v22 }
 0x129   : > { %669 = vadd.xlane.f32.xlu1 %v6229_v23  ;;  %1057 = vmatpush1.bf16.msra.mxu0 %v4916_v38 }
 0x12a   : > { %1170 = vmatpush1.bf16.msra.mxu1 %v4917_v39  ;;  %1058 = vmatprep.subr.bf16.mxu0 %v4918_v40 }
 0x12b   : > { %1171 = vmatprep.subr.bf16.mxu1 %v4920_v41 }
 0x12c   : > { %671 = vadd.xlane.f32.xlu0 %v6233_v24 }
 0x12d   : > { %673 = vadd.xlane.f32.xlu1 %v6235_v25 }
 0x130   : > { %675 = vadd.xlane.f32.xlu0 %v6239_v26 }
 0x131   : > { %677 = vadd.xlane.f32.xlu1 %v6241_v27 }
 0x134   : > { %679 = vadd.xlane.f32.xlu0 %v6245_v28 }
 0x135   : > { %681 = vadd.xlane.f32.xlu1 %v6247_v29 }
 0x138   : > { %683 = vadd.xlane.f32.xlu0 %v6251_v30 }
 0x139   : > { %685 = vadd.xlane.f32.xlu1 %v6253_v31 }
 0x1a9   : > { %v656_v42 = vpop.xlane.xlu0 %655 }
 0x1aa   : > { %v660_v43 = vpop.xlane.xlu1 %659  ;;  %v688_v44 = vmul.f32 0.0078125, %v656_v42  ;;  %v4930_v42 = vld [vmem:[%s6162_s11 + $0x84] ss:$16 sps:$4 sm:$0xff]  }
 0x1ab   : > { %v690_v45 = vmul.f32 0.0078125, %v660_v43  ;;  %v4932_v43 = vld [vmem:[%s6162_s11 + $0x8c] ss:$16 sps:$4 sm:$0xff]  }
 0x1ac   : > { %v6269_v46 = vsub.f32 %v639_v16, %v688_v44  ;;  %v4922_v16 = vld [vmem:[%s6162_s11 + $0x40] ss:$16 sps:$4 sm:$0xff]  }
 0x1ad   : > { %v6271_v47 = vsub.f32 %v641_v17, %v690_v45  ;;  %v658_v48 = vpop.xlane.xlu0 %657  ;;  %v4923_v17 = vld [vmem:[%s6162_s11 + $0x48] ss:$16 sps:$4 sm:$0xff]   ;;  %1059 = vmatpush1.bf16.msra.mxu0 %v4922_v16 }
 0x1ae   : > { %v662_v49 = vpop.xlane.xlu1 %661  ;;  %v689_v50 = vmul.f32 0.0078125, %v658_v48  ;;  %v720_v51 = vmul.f32 %v6269_v46, %v6269_v46  ;;  %1172 = vmatpush1.bf16.msra.mxu1 %v4923_v17  ;;  %v4934_v48 = vld [vmem:[%s6162_s11 + $0x80] ss:$16 sps:$4 sm:$0xff]  }
 0x1af   : > { %v691_v52 = vmul.f32 0.0078125, %v662_v49  ;;  %v722_v55 = vmul.f32 %v6271_v47, %v6271_v47  ;;  %v4935_v49 = vld [vmem:[%s6162_s11 + $0x88] ss:$16 sps:$4 sm:$0xff]  }
 0x1b0   : > { %v6275_v53 = vsub.f32 %v640_v18, %v689_v50  ;;  %736 = vadd.xlane.f32.xlu0 %v720_v51 }
 0x1b1   : > { %v6277_v54 = vsub.f32 %v642_v19, %v691_v52  ;;  %v664_v56 = vpop.xlane.xlu0 %663 }
 0x1b2   : > { %v666_v57 = vpop.xlane.xlu1 %665  ;;  %v692_v58 = vmul.f32 0.0078125, %v664_v56  ;;  %v721_v59 = vmul.f32 %v6275_v53, %v6275_v53  ;;  %v4936_v56 = vld [vmem:[%s6162_s11 + $0xa4] ss:$16 sps:$4 sm:$0xff]  }
 0x1b3   : > { %v693_v60 = vmul.f32 0.0078125, %v666_v57  ;;  %v723_v63 = vmul.f32 %v6277_v54, %v6277_v54  ;;  %v4938_v57 = vld [vmem:[%s6162_s11 + $0xac] ss:$16 sps:$4 sm:$0xff]  }
 0x1b4   : > { %v6284_v61 = vsub.f32 %v6223_v20, %v692_v58  ;;  %740 = vadd.xlane.f32.xlu0 %v722_v55  ;;  %738 = vadd.xlane.f32.xlu1 %v721_v59  ;;  %v4940_v58 = vld [vmem:[%s6162_s11 + $0xa0] ss:$16 sps:$4 sm:$0xff]   ;;  %v4941_v59 = vld [vmem:[%s6162_s11 + $0xa8] ss:$16 sps:$4 sm:$0xff]  }
 0x1b5   : > { %v6287_v62 = vsub.f32 %v6225_v21, %v693_v60  ;;  %v668_v0 = vpop.xlane.xlu0 %667  ;;  %v4942_v60 = vld [vmem:[%s6162_s11 + $0xc4] ss:$16 sps:$4 sm:$0xff]  }
 0x1b6   : > { %v670_v1 = vpop.xlane.xlu1 %669  ;;  %v694_v2 = vmul.f32 0.0078125, %v668_v0  ;;  %v724_v3 = vmul.f32 %v6284_v61, %v6284_v61  ;;  %v4946_v0 = vld [vmem:[%s6162_s11 + $0xc0] ss:$16 sps:$4 sm:$0xff]  }
 0x1b7   : > { %v695_v4 = vmul.f32 0.0078125, %v670_v1  ;;  %v725_v7 = vmul.f32 %v6287_v62, %v6287_v62  ;;  %v4947_v1 = vld [vmem:[%s6162_s11 + $0xc8] ss:$16 sps:$4 sm:$0xff]  }
 0x1b8   : > { %v6294_v5 = vsub.f32 %v6227_v22, %v694_v2  ;;  %742 = vadd.xlane.f32.xlu1 %v723_v63  ;;  %744 = vadd.xlane.f32.xlu0 %v724_v3  ;;  %v4944_v63 = vld [vmem:[%s6162_s11 + $0xcc] ss:$16 sps:$4 sm:$0xff]   ;;  %v4948_v2 = vld [vmem:[%s6162_s11 + $0xe4] ss:$16 sps:$4 sm:$0xff]  }
 0x1b9   : > { %v6297_v6 = vsub.f32 %v6229_v23, %v695_v4  ;;  %v672_v8 = vpop.xlane.xlu0 %671  ;;  %v4924_v23 = vld [vmem:[%s6162_s11 + $0x64] ss:$16 sps:$4 sm:$0xff]   ;;  %v4950_v3 = vld [vmem:[%s6162_s11 + $0xec] ss:$16 sps:$4 sm:$0xff]   ;;  %v4952_v4 = vld [vmem:[%s6162_s11 + $0xe0] ss:$16 sps:$4 sm:$0xff]  }
 0x1ba   : > { %v674_v9 = vpop.xlane.xlu1 %673  ;;  %v696_v10 = vmul.f32 0.0078125, %v672_v8  ;;  %v726_v11 = vmul.f32 %v6294_v5, %v6294_v5  ;;  %1060 = vmatprep.subr.bf16.mxu0 %v4924_v23  ;;  %v8521_v8 = vmov 0  }
 0x1bb   : > { %v697_v12 = vmul.f32 0.0078125, %v674_v9  ;;  %v727_v15 = vmul.f32 %v6297_v6, %v6297_v6  ;;  %1061 = vmatpush1.bf16.msra.mxu0 %v4928_v36  ;;  %1086 = vmatprep.mubr.bf16.mxu0 %v8521_v8  ;;  %v4954_v9 = vld [vmem:[%s6170_s9 + $0x40] sm:$0xff]  }
 0x1bc   : > { %v6304_v13 = vsub.f32 %v6233_v24, %v696_v10  ;;  %746 = vadd.xlane.f32.xlu1 %v725_v7  ;;  %748 = vadd.xlane.f32.xlu0 %v726_v11  ;;  %v4926_v24 = vld [vmem:[%s6162_s11 + $0x6c] ss:$16 sps:$4 sm:$0xff]   ;;  %v4953_v7 = vld [vmem:[%s6162_s11 + $0xe8] ss:$16 sps:$4 sm:$0xff]  }
 0x1bd   : > { %v6307_v14 = vsub.f32 %v6235_v25, %v697_v12  ;;  %v676_v18 = vpop.xlane.xlu0 %675  ;;  %1173 = vmatprep.subr.bf16.mxu1 %v4926_v24  ;;  %1062 = vmatprep.subr.bf16.mxu0 %v4930_v42  ;;  %v4956_v10 = vld [vmem:[%s6170_s9 + $0xc0] sm:$0xff]  }
 0x1be   : > { %v678_v19 = vpop.xlane.xlu1 %677  ;;  %v698_v20 = vmul.f32 0.0078125, %v676_v18  ;;  %v728_v21 = vmul.f32 %v6304_v13, %v6304_v13  ;;  %1174 = vmatpush1.bf16.msra.mxu1 %v4929_v37  ;;  %1199 = vmatprep.mubr.bf16.mxu1 %v8521_v8 }
 0x1bf   : > { %v699_v22 = vmul.f32 0.0078125, %v678_v19  ;;  %v729_v33 = vmul.f32 %v6307_v14, %v6307_v14  ;;  %1175 = vmatprep.subr.bf16.mxu1 %v4932_v43  ;;  %1063 = vmatpush1.bf16.msra.mxu0 %v4934_v48 }
 0x1c0   : > { %v6318_v25 = vsub.f32 %v6239_v26, %v698_v20  ;;  %750 = vadd.xlane.f32.xlu1 %v727_v15  ;;  %752 = vadd.xlane.f32.xlu0 %v728_v21 }
 0x1c1   : > { %v6321_v32 = vsub.f32 %v6241_v27, %v699_v22  ;;  %v680_v34 = vpop.xlane.xlu0 %679  ;;  %1064 = vmatprep.subr.bf16.mxu0 %v4936_v56  ;;  %v4960_v56 = vld [vmem:[%s6170_s9 + $0xc8] sm:$0xff]  }
 0x1c2   : > { %v682_v35 = vpop.xlane.xlu1 %681  ;;  %v700_v26 = vmul.f32 0.0078125, %v680_v34  ;;  %v730_v38 = vmul.f32 %v6318_v25, %v6318_v25  ;;  %1176 = vmatpush1.bf16.msra.mxu1 %v4935_v49  ;;  %v4955_v49 = vld [vmem:[%s6170_s9] sm:$0xff]  }
 0x1c3   : > { %v701_v39 = vmul.f32 0.0078125, %v682_v35  ;;  %v731_v41 = vmul.f32 %v6321_v32, %v6321_v32  ;;  %1177 = vmatprep.subr.bf16.mxu1 %v4938_v57  ;;  %1065 = vmatpush1.bf16.msra.mxu0 %v4940_v58 }
 0x1c4   : > { %v6330_v27 = vsub.f32 %v6245_v28, %v700_v26  ;;  %754 = vadd.xlane.f32.xlu1 %v729_v33  ;;  %756 = vadd.xlane.f32.xlu0 %v730_v38 }
 0x1c5   : > { %v6333_v40 = vsub.f32 %v6247_v29, %v701_v39  ;;  %v684_v44 = vpop.xlane.xlu0 %683  ;;  %1066 = vmatprep.subr.bf16.mxu0 %v4942_v60  ;;  %v4962_v60 = vld [vmem:[%s6170_s9 + $0x50] sm:$0xff]  }
 0x1c6   : > { %v686_v45 = vpop.xlane.xlu1 %685  ;;  %v702_v28 = vmul.f32 0.0078125, %v684_v44  ;;  %v732_v50 = vmul.f32 %v6330_v27, %v6330_v27  ;;  %1178 = vmatpush1.bf16.msra.mxu1 %v4941_v59  ;;  %v4959_v59 = vld [vmem:[%s6170_s9 + $0x8] sm:$0xff]  }
 0x1c7   : > { %v703_v51 = vmul.f32 0.0078125, %v686_v45  ;;  %v733_v55 = vmul.f32 %v6333_v40, %v6333_v40  ;;  %1179 = vmatprep.subr.bf16.mxu1 %v4944_v63  ;;  %1067 = vmatpush1.bf16.msra.mxu0 %v4946_v0  ;;  %v4964_v63 = vld [vmem:[%s6170_s9 + $0xd0] sm:$0xff]  }
 0x1c8   : > { %v6344_v29 = vsub.f32 %v6251_v30, %v702_v28  ;;  %758 = vadd.xlane.f32.xlu1 %v731_v41  ;;  %760 = vadd.xlane.f32.xlu0 %v732_v50  ;;  %v4957_v28 = vld [vmem:[%s6170_s9 + $0x80] sm:$0xff]  }
 0x1c9   : > { %v6347_v52 = vsub.f32 %v6253_v31, %v703_v51  ;;  %1068 = vmatprep.subr.bf16.mxu0 %v4948_v2 }
 0x1ca   : > { %v734_v30 = vmul.f32 %v6344_v29, %v6344_v29  ;;  %1180 = vmatpush1.bf16.msra.mxu1 %v4947_v1 }
 0x1cb   : > { %v735_v31 = vmul.f32 %v6347_v52, %v6347_v52  ;;  %1181 = vmatprep.subr.bf16.mxu1 %v4950_v3  ;;  %1069 = vmatpush1.bf16.msra.mxu0 %v4952_v4  ;;  %v4963_v3 = vld [vmem:[%s6170_s9 + $0x10] sm:$0xff]  }
 0x1cc   : > { %762 = vadd.xlane.f32.xlu1 %v733_v55  ;;  %764 = vadd.xlane.f32.xlu0 %v734_v30  ;;  %v4958_v55 = vld [vmem:[%s6170_s9 + $0x48] sm:$0xff]   ;;  %v4965_v4 = vld [vmem:[%s6170_s9 + $0x90] sm:$0xff]  }
 0x1cd   : > { %4514 = vmatprep.subr.bf16.mxu0 %v4954_v9  ;;  %v4961_v30 = vld [vmem:[%s6170_s9 + $0x88] sm:$0xff]  }
 0x1ce   : > { %1182 = vmatpush1.bf16.msra.mxu1 %v4953_v7 }
 0x1cf   : > { %4578 = vmatprep.subr.bf16.mxu1 %v4956_v10  ;;  %v4966_v10 = vld [vmem:[%s6170_s9 + $0x58] sm:$0xff]  }
 0x1d0   : > { %766 = vadd.xlane.f32.xlu1 %v735_v31 }
 0x23d   : > { %v737_v11 = vpop.xlane.xlu0 %736 }
 0x23e   : > { %v768_v12 = vmul.f32 0.0078125, %v737_v11  ;;  %v4968_v11 = vld [vmem:[%s6170_s9 + $0xd8] sm:$0xff]  }
 0x240   : > { %v784_v15 = vadd.f32 1e-06, %v768_v12 }
 0x241   : > { %v739_v16 = vpop.xlane.xlu1 %738  ;;  %v741_v17 = vpop.xlane.xlu0 %740 }
 0x242   : > { %v769_v18 = vmul.f32 0.0078125, %v739_v16  ;;  %5066 = vrsqrt.f32 %v784_v15  ;;  %v770_v20 = vmul.f32 0.0078125, %v741_v17  ;;  %v4967_v17 = vld [vmem:[%s6170_s9 + $0x18] sm:$0xff]  }
 0x244   : > { %v785_v19 = vadd.f32 1e-06, %v769_v18  ;;  %v786_v23 = vadd.f32 1e-06, %v770_v20  ;;  %v4969_v18 = vld [vmem:[%s6170_s9 + $0x98] sm:$0xff]  }
 0x245   : > { %v743_v21 = vpop.xlane.xlu1 %742  ;;  %v745_v33 = vpop.xlane.xlu0 %744 }
 0x246   : > { %5068 = vrsqrt.f32 %v785_v19  ;;  %v771_v22 = vmul.f32 0.0078125, %v743_v21  ;;  %v772_v36 = vmul.f32 0.0078125, %v745_v33 }
 0x248   : > { %v787_v24 = vadd.f32 1e-06, %v771_v22  ;;  %v788_v41 = vadd.f32 1e-06, %v772_v36 }
 0x249   : > { %v747_v34 = vpop.xlane.xlu1 %746  ;;  %v749_v42 = vpop.xlane.xlu0 %748 }
 0x24a   : > { %5070 = vrsqrt.f32 %v787_v24  ;;  %v773_v35 = vmul.f32 0.0078125, %v747_v34  ;;  %v774_v51 = vmul.f32 0.0078125, %v749_v42 }
 0x24b   : > { %5072 = vrsqrt.f32 %v786_v23 }
 0x24c   : > { %v5067_v37 = vpop.eup %5066  ;;  %v789_v26 = vadd.f32 1e-06, %v773_v35  ;;  %v790_v31 = vadd.f32 1e-06, %v774_v51 }
 0x24d   : > { %v751_v38 = vpop.xlane.xlu1 %750  ;;  %v6372_v43 = vmul.f32 %v5067_v37, %v6269_v46  ;;  %v753_v0 = vpop.xlane.xlu0 %752 }
 0x24e   : > { %5074 = vrsqrt.f32 %v789_v26  ;;  %v775_v45 = vmul.f32 0.0078125, %v751_v38  ;;  %v776_v9 = vmul.f32 0.0078125, %v753_v0 }
 0x24f   : > { %8689 = vst [vmem:[#allocation33_spill] sm:$0xff] %v6372_v43  ;;  %5076 = vrsqrt.f32 %v788_v41 }
 0x250   : > { %v5069_v39 = vpop.eup %5068  ;;  %v792_v19 = vadd.f32 1e-06, %v776_v9  ;;  %v4973_v9 = vld [vmem:[%s6170_s9 + $0xa0] sm:$0xff]  }
 0x251   : > { %v6375_v44 = vmul.f32 %v5069_v39, %v6275_v53  ;;  %v791_v53 = vadd.f32 1e-06, %v775_v45  ;;  %v755_v57 = vpop.xlane.xlu1 %754  ;;  %v757_v20 = vpop.xlane.xlu0 %756 }
 0x252   : > { %v778_v24 = vmul.f32 0.0078125, %v757_v20  ;;  %v4983_v20 = vld [vmem:[%s6170_s9 + $0x38] sm:$0xff]  }
 0x253   : > { %8690 = vst [vmem:[#allocation34_spill] sm:$0xff] %v6375_v44  ;;  %v832_v48 = vpack.c.bf16 %v6375_v44, %v6372_v43  ;;  %5078 = vrsqrt.f32 %v791_v53 }
 0x254   : > { %v5071_v50 = vpop.eup %5070  ;;  %5080 = vrsqrt.f32 %v790_v31  ;;  %v794_v36 = vadd.f32 1e-06, %v778_v24 }
 0x255   : > { %1087 = vmatmul.mubr.bf16.vlgmr.msra.gmra.mrb[0].mxu0 %v832_v48  ;;  %1200 = vmatmul.mubr.bf16.vlgmr.msra.gmra.mrb[0].mxu1 %v832_v48  ;;  %v5073_v46 = vpop.eup %5072  ;;  %v6386_v58 = vmul.f32 %v5071_v50, %v6277_v54  ;;  %v777_v54 = vmul.f32 0.0078125, %v755_v57  ;;  %v759_v15 = vpop.xlane.xlu1 %758 }
 0x256   : > { %1096 = vmatprep.mubr.bf16.mxu0 %v8521_v8  ;;  %1209 = vmatprep.mubr.bf16.mxu1 %v8521_v8  ;;  %v6393_v1 = vmul.f32 %v5073_v46, %v6271_v47  ;;  %v779_v22 = vmul.f32 0.0078125, %v759_v15  ;;  %v761_v37 = vpop.xlane.xlu0 %760  ;;  %v4980_v15 = vld [vmem:[%s6170_s9 + $0xf0] sm:$0xff]  }
 0x257   : > { %8691 = vst [vmem:[#allocation35_spill] sm:$0xff] %v6386_v58  ;;  %4515 = vmatpush3.bf16.msra.mxu0 %v4955_v49  ;;  %4579 = vmatpush3.bf16.msra.mxu1 %v4957_v28  ;;  %v793_v12 = vadd.f32 1e-06, %v777_v54  ;;  %v780_v42 = vmul.f32 0.0078125, %v761_v37 }
 0x258   : > { %4516 = vmatprep.subr.bf16.mxu0 %v4958_v55  ;;  %4580 = vmatprep.subr.bf16.mxu1 %v4960_v56  ;;  %8692 = vst [vmem:[#allocation36_spill] sm:$0xff] %v6393_v1  ;;  %v833_v2 = vpack.c.bf16 %v6386_v58, %v6393_v1  ;;  %v5075_v7 = vpop.eup %5074  ;;  %v795_v34 = vadd.f32 1e-06, %v779_v22  ;;  %v4985_v22 = vld [vmem:[%s6170_s9 + $0xb8] sm:$0xff]  }
 0x259   : > { %v5077_v47 = vpop.eup %5076  ;;  %v6404_v16 = vmul.f32 %v5075_v7, %v6287_v62  ;;  %5082 = vrsqrt.f32 %v793_v12  ;;  %v796_v49 = vadd.f32 1e-06, %v780_v42  ;;  %v4972_v7 = vld [vmem:[%s6170_s9 + $0xe0] sm:$0xff]   ;;  %v4979_v12 = vld [vmem:[%s6170_s9 + $0x30] sm:$0xff]  }
 0x25a   : > { %v6409_v21 = vmul.f32 %v5077_v47, %v6284_v61  ;;  %5084 = vrsqrt.f32 %v792_v19  ;;  %v763_v61 = vpop.xlane.xlu1 %762  ;;  %v765_v28 = vpop.xlane.xlu0 %764  ;;  %v4978_v47 = vld [vmem:[%s6170_s9 + $0x70] sm:$0xff]   ;;  %v4984_v19 = vld [vmem:[%s6170_s9 + $0xf8] sm:$0xff]  }
 0x25b   : > { %4517 = vmatpush3.bf16.msra.mxu0 %v4959_v59  ;;  %4581 = vmatpush3.bf16.msra.mxu1 %v4961_v30  ;;  %8693 = vst [vmem:[#allocation37_spill] sm:$0xff] %v6404_v16  ;;  %5086 = vrsqrt.f32 %v795_v34  ;;  %v781_v38 = vmul.f32 0.0078125, %v763_v61  ;;  %v782_v46 = vmul.f32 0.0078125, %v765_v28  ;;  %v872_v34 = vld [vmem:[%s6168_s18] sm:$0xf] }
 0x25c   : > { %4518 = vmatprep.subr.bf16.mxu0 %v4962_v60  ;;  %4582 = vmatprep.subr.bf16.mxu1 %v4964_v63  ;;  %8694 = vst [vmem:[#allocation38_spill] sm:$0xff] %v6409_v21  ;;  %v834_v23 = vpack.c.bf16 %v6404_v16, %v6409_v21  ;;  %5088 = vrsqrt.f32 %v794_v36 }
 0x25d   : > { %1097 = vmatmul.mubr.bf16.gmra.mrb[4].mxu0 %v833_v2  ;;  %1210 = vmatmul.mubr.bf16.gmra.mrb[4].mxu1 %v833_v2  ;;  %v5079_v62 = vpop.eup %5078  ;;  %v797_v48 = vadd.f32 1e-06, %v781_v38 }
 0x25e   : > { %1106 = vmatprep.mubr.bf16.mxu0 %v8521_v8  ;;  %1219 = vmatprep.mubr.bf16.mxu1 %v8521_v8  ;;  %v5081_v33 = vpop.eup %5080  ;;  %v6416_v35 = vmul.f32 %v5079_v62, %v6297_v6  ;;  %v767_v6 = vpop.xlane.xlu1 %766 }
 0x25f   : > { %4519 = vmatpush3.bf16.msra.mxu0 %v4963_v3  ;;  %4583 = vmatpush3.bf16.msra.mxu1 %v4965_v4  ;;  %v6419_v26 = vmul.f32 %v5081_v33, %v6294_v5  ;;  %5090 = vrsqrt.f32 %v797_v48  ;;  %v783_v51 = vmul.f32 0.0078125, %v767_v6  ;;  %v4970_v3 = vld [vmem:[%s6170_s9 + $0x60] sm:$0xff]  }
 0x260   : > { %4520 = vmatprep.subr.bf16.mxu0 %v4966_v10  ;;  %4584 = vmatprep.subr.bf16.mxu1 %v4968_v11  ;;  %8695 = vst [vmem:[#allocation39_spill] sm:$0xff] %v6416_v35  ;;  %5092 = vrsqrt.f32 %v796_v49  ;;  %v4971_v4 = vld [vmem:[%s6170_s9 + $0x20] sm:$0xff]   ;;  %v4976_v10 = vld [vmem:[%s6170_s9 + $0xe8] sm:$0xff]  }
 0x261   : > { %8696 = vst [vmem:[#allocation40_spill] sm:$0xff] %v6419_v26  ;;  %v835_v39 = vpack.c.bf16 %v6416_v35, %v6419_v26  ;;  %v799_v57 = vadd.f32 1e-06, %v783_v51  ;;  %v4977_v11 = vld [vmem:[%s6170_s9 + $0xa8] sm:$0xff]  }
 0x263   : > { %4521 = vmatpush3.bf16.msra.mxu0 %v4967_v17  ;;  %4585 = vmatpush3.bf16.msra.mxu1 %v4969_v18  ;;  %v5083_v41 = vpop.eup %5082  ;;  %5094 = vrsqrt.f32 %v799_v57  ;;  %v4981_v17 = vld [vmem:[%s6170_s9 + $0xb0] sm:$0xff]   ;;  %v4982_v18 = vld [vmem:[%s6170_s9 + $0x78] sm:$0xff]  }
 0x264   : > { %v5085_v45 = vpop.eup %5084  ;;  %v6426_v5 = vmul.f32 %v5083_v41, %v6307_v14  ;;  %4522 = vmatprep.subr.bf16.mxu0 %v4970_v3  ;;  %4586 = vmatprep.subr.bf16.mxu1 %v4972_v7 }
 0x265   : > { %1107 = vmatmul.mubr.bf16.gmra.mrb[8].mxu0 %v834_v23  ;;  %1220 = vmatmul.mubr.bf16.gmra.mrb[8].mxu1 %v834_v23  ;;  %v6429_v50 = vmul.f32 %v5085_v45, %v6304_v13  ;;  %v5087_v56 = vpop.eup %5086  ;;  %v798_v13 = vadd.f32 1e-06, %v782_v46  ;;  %v874_v23 = vlaneseq }
 0x266   : > { %1116 = vmatprep.mubr.bf16.mxu0 %v8521_v8  ;;  %1229 = vmatprep.mubr.bf16.mxu1 %v8521_v8  ;;  %8697 = vst [vmem:[#allocation41_spill] sm:$0xff] %v6426_v5  ;;  %v5089_v53 = vpop.eup %5088  ;;  %v6436_v14 = vmul.f32 %v5087_v56, %v6321_v32 }
 0x267   : > { %8698 = vst [vmem:[#allocation42_spill] sm:$0xff] %v6429_v50  ;;  %v836_v55 = vpack.c.bf16 %v6426_v5, %v6429_v50  ;;  %v6439_v59 = vmul.f32 %v5089_v53, %v6318_v25  ;;  %5096 = vrsqrt.f32 %v798_v13  ;;  %4523 = vmatpush3.bf16.msra.mxu0 %v4971_v4  ;;  %4587 = vmatpush3.bf16.msra.mxu1 %v4973_v9  ;;  %v6479_v62 = vshrl.u32 %v874_v23, 7 }
 0x268   : > { %8699 = vst [vmem:[#allocation43_spill] sm:$0xff] %v6436_v14  ;;  %4588 = vmatprep.subr.bf16.mxu1 %v4976_v10 }
 0x269   : > { %8700 = vst [vmem:[#allocation44_spill] sm:$0xff] %v6439_v59  ;;  %v837_v30 = vpack.c.bf16 %v6436_v14, %v6439_v59  ;;  %v5091_v31 = vpop.eup %5090  ;;  %8705 = vst [vmem:[#allocation49_spill] sm:$0xff] %v6479_v62  ;;  %v8520_v24 = vsub.s32 0, %v6479_v62  ;;  %v8519_v33 = vsub.s32 2, %v6479_v62  ;;  %v8518_v61 = vsub.s32 1, %v6479_v62 }
 0x26a   : > { %v5093_v60 = vpop.eup %5092  ;;  %v6446_v32 = vmul.f32 %v5091_v31, %v6333_v40  ;;  %v8517_v36 = vsub.s32 3, %v6479_v62 }
 0x26b   : > { %v6449_v25 = vmul.f32 %v5093_v60, %v6330_v27  ;;  %4589 = vmatpush3.bf16.msra.mxu1 %v4977_v11  ;;  %v6488_v37 = vrot.slane %v872_v34, %v8520_v24  ;;  %v6492_v38 = vrot.slane %v872_v34, %v8519_v33 }
 0x26c   : > { %8701 = vst [vmem:[#allocation45_spill] sm:$0xff] %v6446_v32  ;;  %4590 = vmatprep.subr.bf16.mxu1 %v4980_v15  ;;  %v6500_v41 = vrot.slane %v872_v34, %v8517_v36 }
 0x26d   : > { %1117 = vmatmul.mubr.bf16.gmra.mrb[12].mxu0 %v835_v39  ;;  %1230 = vmatmul.mubr.bf16.gmra.mrb[12].mxu1 %v835_v39  ;;  %8702 = vst [vmem:[#allocation46_spill] sm:$0xff] %v6449_v25  ;;  %v838_v63 = vpack.c.bf16 %v6446_v32, %v6449_v25  ;;  %v5095_v0 = vpop.eup %5094  ;;  %v6496_v39 = vrot.slane %v872_v34, %v8518_v61 }
 0x26e   : > { %1126 = vmatprep.mubr.bf16.mxu0 %v8521_v8  ;;  %1239 = vmatprep.mubr.bf16.mxu1 %v8521_v8  ;;  %v6456_v40 = vmul.f32 %v5095_v0, %v6347_v52  ;;  %v4975_v52 = vld [vmem:[%s6170_s9 + $0x28] sm:$0xff]  }
 0x26f   : > { %4591 = vmatpush3.bf16.msra.mxu1 %v4981_v17 }
 0x270   : > { %8703 = vst [vmem:[#allocation47_spill] sm:$0xff] %v6456_v40  ;;  %4592 = vmatprep.subr.bf16.mxu1 %v4984_v19 }
 0x271   : > { %v5097_v54 = vpop.eup %5096 }
 0x272   : > { %v6459_v27 = vmul.f32 %v5097_v54, %v6344_v29  ;;  %v4974_v29 = vld [vmem:[%s6170_s9 + $0x68] sm:$0xff]  }
 0x273   : > { %4524 = vmatprep.subr.bf16.mxu0 %v4974_v29  ;;  %4593 = vmatpush3.bf16.msra.mxu1 %v4985_v22 }
 0x274   : > { %8704 = vst [vmem:[#allocation48_spill] sm:$0xff] %v6459_v27  ;;  %v839_v2 = vpack.c.bf16 %v6456_v40, %v6459_v27  ;;  %4525 = vmatpush3.bf16.msra.mxu0 %v4975_v52 }
 0x275   : > { %1127 = vmatmul.mubr.bf16.gmra.mrb[16].mxu0 %v836_v55  ;;  %1240 = vmatmul.mubr.bf16.gmra.mrb[16].mxu1 %v836_v55 }
 0x276   : > { %1136 = vmatprep.mubr.bf16.mxu0 %v8521_v8  ;;  %1249 = vmatprep.mubr.bf16.mxu1 %v8521_v8 }
 0x277   : > { %4526 = vmatprep.subr.bf16.mxu0 %v4978_v47 }
 0x278   : > { %4527 = vmatpush3.bf16.msra.mxu0 %v4979_v12 }
 0x279   : > { %4528 = vmatprep.subr.bf16.mxu0 %v4982_v18 }
 0x27c   : > { %4529 = vmatpush3.bf16.msra.mxu0 %v4983_v20 }
 0x27d   : > { %1137 = vmatmul.mubr.bf16.gmra.mrb[20].mxu0 %v837_v30  ;;  %1250 = vmatmul.mubr.bf16.gmra.mrb[20].mxu1 %v837_v30 }
 0x27e   : > { %1146 = vmatprep.mubr.bf16.mxu0 %v8521_v8  ;;  %1259 = vmatprep.mubr.bf16.mxu1 %v8521_v8 }
 0x285   : > { %1147 = vmatmul.mubr.bf16.gmra.mrb[24].mxu0 %v838_v63  ;;  %1260 = vmatmul.mubr.bf16.gmra.mrb[24].mxu1 %v838_v63 }
 0x286   : > { %1156 = vmatprep.mubr.bf16.mxu0 %v8521_v8  ;;  %1269 = vmatprep.mubr.bf16.mxu1 %v8521_v8 }
 0x28d   : > { %1157 = vmatmul.mubr.bf16.gmra.mrb[28].mxu0 %v839_v2  ;;  %1270 = vmatmul.mubr.bf16.gmra.mrb[28].mxu1 %v839_v2 }
 0x328   : > { %v1088_v42 = vpop.f32.mrb[0].mxu0  ;;  %v1201_v45 = vpop.f32.mrb[0].mxu1 }
 0x329   : > { %v1089_v48 = vadd.f32 %v1088_v42, %v6488_v37  ;;  %v1202_v6 = vadd.f32 %v1201_v45, %v6492_v38  ;;  %v1090_v49 = vpop.f32.mrb[1].mxu0  ;;  %v1203_v28 = vpop.f32.mrb[1].mxu1 }
 0x32a   : > { %v6505_v51 = vadd.f32 %v1090_v49, %v6496_v39  ;;  %v6508_v55 = vadd.f32 %v1203_v28, %v6500_v41  ;;  %v1092_v56 = vpop.f32.mrb[2].mxu0  ;;  %v1205_v46 = vpop.f32.mrb[2].mxu1 }
 0x32b   : > { %v1344_v53 = vmul.f32 0.044715, %v1089_v48  ;;  %v1346_v57 = vmul.f32 0.044715, %v1202_v6  ;;  %v1093_v13 = vadd.f32 %v1092_v56, %v6488_v37  ;;  %v1206_v30 = vadd.f32 %v1205_v46, %v6492_v38  ;;  %v1094_v31 = vpop.f32.mrb[3].mxu0  ;;  %v1207_v60 = vpop.f32.mrb[3].mxu1 }
 0x32c   : > { %v1345_v54 = vmul.f32 0.044715, %v6505_v51  ;;  %v1347_v2 = vmul.f32 0.044715, %v6508_v55  ;;  %v6515_v29 = vadd.f32 %v1094_v31, %v6496_v39  ;;  %v6518_v10 = vadd.f32 %v1207_v60, %v6500_v41 }
 0x32d   : > { %v1408_v63 = vmul.f32 %v1344_v53, %v1089_v48  ;;  %v1410_v0 = vmul.f32 %v1346_v57, %v1202_v6  ;;  %v1348_v3 = vmul.f32 0.044715, %v1093_v13  ;;  %v1350_v9 = vmul.f32 0.044715, %v1206_v30 }
 0x32e   : > { %v1409_v15 = vmul.f32 %v1345_v54, %v6505_v51  ;;  %v1411_v20 = vmul.f32 %v1347_v2, %v6508_v55  ;;  %v6528_v49 = vmul.f32 0.5, %v1089_v48  ;;  %v1349_v46 = vmul.f32 0.044715, %v6515_v29 }
 0x32f   : > { %v1472_v4 = vmul.f32 %v1408_v63, %v1089_v48  ;;  %v1474_v7 = vmul.f32 %v1410_v0, %v1202_v6  ;;  %v1412_v52 = vmul.f32 %v1348_v3, %v1093_v13  ;;  %v1414_v17 = vmul.f32 %v1350_v9, %v1206_v30 }
 0x330   : > { %v1098_v11 = vpop.f32.mrb[4].mxu0  ;;  %v1211_v47 = vpop.f32.mrb[4].mxu1  ;;  %v6531_v60 = vmul.f32 0.5, %v1202_v6  ;;  %v1351_v0 = vmul.f32 0.044715, %v6518_v10  ;;  %v6545_v9 = vmul.f32 0.5, %v1093_v13 }
 0x331   : > { %v1536_v12 = vadd.f32 %v1472_v4, %v1089_v48  ;;  %v1100_v18 = vpop.f32.mrb[5].mxu0  ;;  %v1213_v19 = vpop.f32.mrb[5].mxu1  ;;  %v1476_v22 = vmul.f32 %v1412_v52, %v1093_v13  ;;  %v6523_v23 = vadd.f32 %v1098_v11, %v6488_v37  ;;  %v6526_v34 = vadd.f32 %v1211_v47, %v6492_v38 }
 0x332   : > { %v1102_v42 = vpop.f32.mrb[6].mxu0  ;;  %v1215_v45 = vpop.f32.mrb[6].mxu1  ;;  %v1538_v28 = vadd.f32 %v1474_v7, %v1202_v6  ;;  %v1478_v56 = vmul.f32 %v1414_v17, %v1206_v30  ;;  %v6537_v48 = vadd.f32 %v1100_v18, %v6496_v39  ;;  %v6540_v4 = vmul.f32 %v1409_v15, %v6505_v51 }
 0x333   : > { %8706 = vst [vmem:[#allocation50_spill] sm:$0xff] %v6523_v23  ;;  %8707 = vst [vmem:[#allocation51_spill] sm:$0xff] %v6526_v34  ;;  %v1104_v53 = vpop.f32.mrb[7].mxu0  ;;  %v1217_v57 = vpop.f32.mrb[7].mxu1  ;;  %v1600_v31 = vmul.f32 0.7978846, %v1536_v12  ;;  %v1540_v63 = vadd.f32 %v1476_v22, %v1093_v13  ;;  %v6543_v7 = vmul.f32 %v1411_v20, %v6508_v55  ;;  %v1413_v11 = vmul.f32 %v1349_v46, %v6515_v29 }
 0x334   : > { %v1542_v54 = vadd.f32 %v1478_v56, %v1206_v30  ;;  %v1352_v2 = vmul.f32 0.044715, %v6523_v23  ;;  %v1354_v3 = vmul.f32 0.044715, %v6526_v34  ;;  %v6547_v6 = vmul.f32 0.5, %v1206_v30 }
 0x335   : > { %v1602_v52 = vmul.f32 0.7978846, %v1538_v28  ;;  %v6551_v47 = vadd.f32 %v1213_v19, %v6500_v41  ;;  %v6554_v12 = vadd.f32 %v1102_v42, %v6488_v37  ;;  %v1604_v17 = vmul.f32 0.7978846, %v1540_v63 }
 0x336   : > { %v1415_v15 = vmul.f32 %v1351_v0, %v6518_v10  ;;  %v1353_v18 = vmul.f32 0.044715, %v6537_v48  ;;  %v6559_v20 = vadd.f32 %v1215_v45, %v6492_v38  ;;  %5098 = vtanh.f32 %v1600_v31 }
 0x337   : > { %8708 = vst [vmem:[#allocation52_spill] sm:$0xff] %v6551_v47  ;;  %8709 = vst [vmem:[#allocation53_spill] sm:$0xff] %v6554_v12  ;;  %v1606_v22 = vmul.f32 0.7978846, %v1542_v54  ;;  %v1416_v28 = vmul.f32 %v1352_v2, %v6523_v23  ;;  %v1418_v19 = vmul.f32 %v1354_v3, %v6526_v34  ;;  %v1355_v42 = vmul.f32 0.044715, %v6551_v47 }
 0x338   : > { %8710 = vst [vmem:[#allocation54_spill] sm:$0xff] %v6559_v20  ;;  %v1108_v13 = vpop.f32.mrb[8].mxu0  ;;  %v1221_v30 = vpop.f32.mrb[8].mxu1  ;;  %v6565_v63 = vadd.f32 %v1104_v53, %v6496_v39  ;;  %v6568_v0 = vadd.f32 %v1217_v57, %v6500_v41  ;;  %5100 = vtanh.f32 %v1602_v52  ;;  %v1356_v54 = vmul.f32 0.044715, %v6554_v12 }
 0x339   : > { %v1110_v56 = vpop.f32.mrb[9].mxu0  ;;  %v1223_v46 = vpop.f32.mrb[9].mxu1  ;;  %v6571_v45 = vadd.f32 %v1108_v13, %v6488_v37  ;;  %v1358_v2 = vmul.f32 0.044715, %v6559_v20  ;;  %v6576_v3 = vadd.f32 %v1221_v30, %v6492_v38  ;;  %5102 = vtanh.f32 %v1604_v17 }
 0x33a   : > { %8711 = vst [vmem:[#allocation55_spill] sm:$0xff] %v6568_v0  ;;  %v1112_v36 = vpop.f32.mrb[10].mxu0  ;;  %v1225_v31 = vpop.f32.mrb[10].mxu1  ;;  %v6579_v53 = vmul.f32 %v1413_v11, %v6515_v29  ;;  %v1417_v57 = vmul.f32 %v1353_v18, %v6537_v48  ;;  %v1357_v13 = vmul.f32 0.044715, %v6565_v63  ;;  %v6587_v62 = vadd.f32 %v1110_v56, %v6496_v39 }
 0x33b   : > { %8712 = vst [vmem:[#allocation56_spill] sm:$0xff] %v6571_v45  ;;  %8713 = vst [vmem:[#allocation57_spill] sm:$0xff] %v6576_v3  ;;  %v1114_v61 = vpop.f32.mrb[11].mxu0  ;;  %v1227_v33 = vpop.f32.mrb[11].mxu1  ;;  %v1359_v24 = vmul.f32 0.044715, %v6568_v0  ;;  %5104 = vtanh.f32 %v1606_v22  ;;  %v6590_v30 = vmul.f32 %v1415_v15, %v6518_v10  ;;  %v6593_v11 = vmul.f32 %v1416_v28, %v6523_v23 }
 0x33c   : > { %v1360_v52 = vmul.f32 0.044715, %v6571_v45  ;;  %v1362_v8 = vmul.f32 0.044715, %v6576_v3  ;;  %8714 = vst [vmem:[#allocation58_spill] sm:$0xff] %v6587_v62  ;;  %v6596_v17 = vmul.f32 %v1418_v19, %v6526_v34  ;;  %v1419_v18 = vmul.f32 %v1355_v42, %v6551_v47 }
 0x33d   : > { %8715 = vst [vmem:[#allocation59_spill] sm:$0xff] %v6593_v11  ;;  %v1420_v40 = vmul.f32 %v1356_v54, %v6554_v12  ;;  %v1422_v27 = vmul.f32 %v1358_v2, %v6559_v20  ;;  %v1361_v32 = vmul.f32 0.044715, %v6587_v62  ;;  %v1421_v56 = vmul.f32 %v1357_v13, %v6565_v63 }
 0x33e   : > { %8716 = vst [vmem:[#allocation60_spill] sm:$0xff] %v6596_v17  ;;  %v6604_v22 = vadd.f32 %v1223_v46, %v6500_v41  ;;  %v6607_v15 = vadd.f32 %v1112_v36, %v6488_v37  ;;  %v6610_v28 = vadd.f32 %v1225_v31, %v6492_v38  ;;  %v6613_v42 = vmul.f32 %v1417_v57, %v6537_v48 }
 0x33f   : > { %v1423_v54 = vmul.f32 %v1359_v24, %v6568_v0  ;;  %v1424_v2 = vmul.f32 %v1360_v52, %v6571_v45  ;;  %v1426_v13 = vmul.f32 %v1362_v8, %v6576_v3  ;;  %v1425_v59 = vmul.f32 %v1361_v32, %v6587_v62 }
 0x340   : > { %8717 = vst [vmem:[#allocation61_spill] sm:$0xff] %v6604_v22  ;;  %v1118_v19 = vpop.f32.mrb[12].mxu0  ;;  %v1231_v25 = vpop.f32.mrb[12].mxu1  ;;  %v6620_v36 = vadd.f32 %v1114_v61, %v6496_v39  ;;  %v6623_v31 = vadd.f32 %v1227_v33, %v6500_v41  ;;  %v6631_v52 = vmul.f32 %v1419_v18, %v6551_v47  ;;  %v6634_v8 = vmul.f32 %v1420_v40, %v6554_v12 }
 0x341   : > { %v1120_v14 = vpop.f32.mrb[13].mxu0  ;;  %v1233_v46 = vpop.f32.mrb[13].mxu1  ;;  %v6626_v5 = vadd.f32 %v1118_v19, %v6488_v37  ;;  %v6637_v32 = vmul.f32 %v1422_v27, %v6559_v20  ;;  %v6640_v61 = vadd.f32 %v1231_v25, %v6492_v38  ;;  %v6643_v19 = vmul.f32 %v1421_v56, %v6565_v63 }
 0x342   : > { %v1122_v57 = vpop.f32.mrb[14].mxu0  ;;  %v1235_v50 = vpop.f32.mrb[14].mxu1  ;;  %8719 = vst [vmem:[#allocation63_spill] sm:$0xff] %v6631_v52  ;;  %8720 = vst [vmem:[#allocation64_spill] sm:$0xff] %v6634_v8  ;;  %v1363_v26 = vmul.f32 0.044715, %v6604_v22  ;;  %v6651_v40 = vmul.f32 %v1423_v54, %v6568_v0  ;;  %v6656_v58 = vadd.f32 %v1120_v14, %v6496_v39  ;;  %v6661_v1 = vmul.f32 %v1424_v2, %v6571_v45 }
 0x343   : > { %8718 = vst [vmem:[#allocation62_spill] sm:$0xff] %v6626_v5  ;;  %v6628_v24 = vpop.eup %5098  ;;  %8721 = vst [vmem:[#allocation65_spill] sm:$0xff] %v6637_v32  ;;  %v1124_v33 = vpop.f32.mrb[15].mxu0  ;;  %v1364_v16 = vmul.f32 0.044715, %v6607_v15  ;;  %v6664_v44 = vmul.f32 %v1426_v13, %v6576_v3  ;;  %v6667_v43 = vmul.f32 %v1425_v59, %v6587_v62  ;;  %v6673_v14 = vadd.f32 %v1233_v46, %v6500_v41 }
 0x344   : > { %8722 = vst [vmem:[#allocation66_spill] sm:$0xff] %v6640_v61  ;;  %v1237_v35 = vpop.f32.mrb[15].mxu1  ;;  %8723 = vst [vmem:[#allocation67_spill] sm:$0xff] %v6643_v19  ;;  %v1366_v18 = vmul.f32 0.044715, %v6610_v28  ;;  %v6648_v21 = vpop.eup %5100  ;;  %v6676_v17 = vadd.f32 %v1122_v57, %v6488_v37  ;;  %v1427_v13 = vmul.f32 %v1363_v26, %v6604_v22  ;;  %v6684_v3 = vadd.f32 %v1235_v50, %v6492_v38 }
 0x345   : > { %8724 = vst [vmem:[#allocation68_spill] sm:$0xff] %v6651_v40  ;;  %v1365_v27 = vmul.f32 0.044715, %v6620_v36  ;;  %v1367_v25 = vmul.f32 0.044715, %v6623_v31  ;;  %8725 = vst [vmem:[#allocation69_spill] sm:$0xff] %v6656_v58  ;;  %v6658_v56 = vpop.eup %5102  ;;  %v6695_v50 = vadd.f32 %v1237_v35, %v6500_v41 }
 0x346   : > { %8726 = vst [vmem:[#allocation70_spill] sm:$0xff] %v6661_v1  ;;  %8727 = vst [vmem:[#allocation71_spill] sm:$0xff] %v6664_v44  ;;  %v1368_v54 = vmul.f32 0.044715, %v6626_v5  ;;  %v1370_v32 = vmul.f32 0.044715, %v6640_v61  ;;  %v6678_v2 = vpop.eup %5104  ;;  %v1428_v44 = vmul.f32 %v1364_v16, %v6607_v15  ;;  %v1430_v59 = vmul.f32 %v1366_v18, %v6610_v28 }
 0x347   : > { %8728 = vst [vmem:[#allocation72_spill] sm:$0xff] %v6667_v43  ;;  %v1369_v20 = vmul.f32 0.044715, %v6656_v58  ;;  %8729 = vst [vmem:[#allocation73_spill] sm:$0xff] %v6673_v14  ;;  %v1429_v43 = vmul.f32 %v1365_v27, %v6620_v36  ;;  %v1431_v46 = vmul.f32 %v1367_v25, %v6623_v31  ;;  %v1371_v57 = vmul.f32 0.044715, %v6673_v14 }
 0x348   : > { %8730 = vst [vmem:[#allocation74_spill] sm:$0xff] %v6676_v17  ;;  %8731 = vst [vmem:[#allocation75_spill] sm:$0xff] %v6684_v3  ;;  %v1128_v1 = vpop.f32.mrb[16].mxu0  ;;  %v1241_v45 = vpop.f32.mrb[16].mxu1  ;;  %v1372_v62 = vmul.f32 0.044715, %v6676_v17  ;;  %v6692_v16 = vadd.f32 %v1124_v33, %v6496_v39  ;;  %v1432_v25 = vmul.f32 %v1368_v54, %v6626_v5  ;;  %v1434_v11 = vmul.f32 %v1370_v32, %v6640_v61 }
 0x349   : > { %v1130_v34 = vpop.f32.mrb[17].mxu0  ;;  %v1243_v8 = vpop.f32.mrb[17].mxu1  ;;  %v1374_v26 = vmul.f32 0.044715, %v6684_v3  ;;  %8733 = vst [vmem:[#allocation77_spill] sm:$0xff] %v6695_v50  ;;  %v6698_v18 = vadd.f32 %v1128_v1, %v6488_v37  ;;  %v1433_v23 = vmul.f32 %v1369_v20, %v6656_v58  ;;  %v6704_v40 = vadd.f32 %v1241_v45, %v6492_v38 }
 0x34a   : > { %8732 = vst [vmem:[#allocation76_spill] sm:$0xff] %v6692_v16  ;;  %v1132_v27 = vpop.f32.mrb[18].mxu0  ;;  %v1245_v12 = vpop.f32.mrb[18].mxu1  ;;  %v1435_v35 = vmul.f32 %v1371_v57, %v6673_v14  ;;  %v1436_v1 = vmul.f32 %v1372_v62, %v6676_v17  ;;  %v1373_v47 = vmul.f32 0.044715, %v6692_v16  ;;  %v6715_v54 = vmul.f32 %v1427_v13, %v6604_v22 }
 0x34b   : > { %8734 = vst [vmem:[#allocation78_spill] sm:$0xff] %v6698_v18  ;;  %8735 = vst [vmem:[#allocation79_spill] sm:$0xff] %v6704_v40  ;;  %v6706_v0 = vpop.f32.mrb[19].mxu0  ;;  %v6708_v33 = vpop.f32.mrb[19].mxu1  ;;  %v1438_v52 = vmul.f32 %v1374_v26, %v6684_v3  ;;  %v1375_v20 = vmul.f32 0.044715, %v6695_v50  ;;  %v6721_v19 = vmul.f32 %v1428_v44, %v6607_v15  ;;  %v6724_v57 = vmul.f32 %v1430_v59, %v6610_v28 }
 0x34c   : > { %8736 = vst [vmem:[#allocation80_spill] sm:$0xff] %v6715_v54  ;;  %v1376_v45 = vmul.f32 0.044715, %v6698_v18  ;;  %v1378_v32 = vmul.f32 0.044715, %v6704_v40  ;;  %v6727_v62 = vmul.f32 %v1429_v43, %v6620_v36  ;;  %v6730_v26 = vadd.f32 %v1130_v34, %v6496_v39 }
 0x34d   : > { %8737 = vst [vmem:[#allocation81_spill] sm:$0xff] %v6724_v57  ;;  %v6733_v13 = vmul.f32 %v1431_v46, %v6623_v31  ;;  %v6736_v54 = vmul.f32 %v1432_v25, %v6626_v5  ;;  %v6739_v22 = vmul.f32 %v1434_v11, %v6640_v61  ;;  %v1437_v44 = vmul.f32 %v1373_v47, %v6692_v16 }
 0x34e   : > { %8738 = vst [vmem:[#allocation82_spill] sm:$0xff] %v6730_v26  ;;  %v6743_v59 = vmul.f32 %v1433_v23, %v6656_v58  ;;  %v6746_v43 = vmul.f32 %v1435_v35, %v6673_v14  ;;  %v6749_v34 = vmul.f32 %v1436_v1, %v6676_v17  ;;  %v6752_v46 = vmul.f32 %v1438_v52, %v6684_v3 }
 0x34f   : > { %8739 = vst [vmem:[#allocation83_spill] sm:$0xff] %v6736_v54  ;;  %8740 = vst [vmem:[#allocation84_spill] sm:$0xff] %v6739_v22  ;;  %v1439_v54 = vmul.f32 %v1375_v20, %v6695_v50  ;;  %v1440_v11 = vmul.f32 %v1376_v45, %v6698_v18  ;;  %v1442_v47 = vmul.f32 %v1378_v32, %v6704_v40  ;;  %v1377_v1 = vmul.f32 0.044715, %v6730_v26 }
 0x350   : > { %8741 = vst [vmem:[#allocation85_spill] sm:$0xff] %v6743_v59  ;;  %8742 = vst [vmem:[#allocation86_spill] sm:$0xff] %v6746_v43  ;;  %v1138_v57 = vpop.f32.mrb[20].mxu0  ;;  %v1251_v25 = vpop.f32.mrb[20].mxu1  ;;  %v1537_v23 = vadd.f32 %v6540_v4, %v6505_v51  ;;  %v6763_v61 = vadd.f32 %v1243_v8, %v6500_v41  ;;  %v1541_v52 = vadd.f32 %v6579_v53, %v6515_v29 }
 0x351   : > { %8743 = vst [vmem:[#allocation87_spill] sm:$0xff] %v6749_v34  ;;  %8744 = vst [vmem:[#allocation88_spill] sm:$0xff] %v6752_v46  ;;  %v1140_v22 = vpop.f32.mrb[21].mxu0  ;;  %v6759_v35 = vpop.f32.mrb[21].mxu1  ;;  %v1539_v20 = vadd.f32 %v6543_v7, %v6508_v55  ;;  %v6774_v4 = vmul.f32 %v1437_v44, %v6692_v16  ;;  %v6777_v46 = vmul.f32 0.5, %v6505_v51  ;;  %v1543_v8 = vadd.f32 %v6590_v30, %v6518_v10 }
 0x352   : > { %8745 = vst [vmem:[#allocation89_spill] sm:$0xff] %v6763_v61  ;;  %v6769_v45 = vpop.f32.mrb[22].mxu0  ;;  %v6771_v32 = vpop.f32.mrb[22].mxu1  ;;  %v1601_v3 = vmul.f32 0.7978846, %v1537_v23  ;;  %v6786_v5 = vadd.f32 %v1132_v27, %v6488_v37  ;;  %v6789_v43 = vadd.f32 %v1245_v12, %v6492_v38  ;;  %v6792_v44 = vmul.f32 %v1439_v54, %v6695_v50 }
 0x353   : > { %8746 = vst [vmem:[#allocation90_spill] sm:$0xff] %v6774_v4  ;;  %v6781_v34 = vpop.f32.mrb[23].mxu0  ;;  %v6783_v53 = vpop.f32.mrb[23].mxu1  ;;  %v1605_v17 = vmul.f32 0.7978846, %v1541_v52  ;;  %v1728_v23 = vadd.f32 1.0, %v6628_v24  ;;  %v1441_v54 = vmul.f32 %v1377_v1, %v6730_v26 }
 0x354   : > { %v1603_v7 = vmul.f32 0.7978846, %v1539_v20  ;;  %8747 = vst [vmem:[#allocation91_spill] sm:$0xff] %v6786_v5  ;;  %8748 = vst [vmem:[#allocation92_spill] sm:$0xff] %v6789_v43  ;;  %5106 = vtanh.f32 %v1601_v3  ;;  %v1607_v51 = vmul.f32 0.7978846, %v1543_v8 }
 0x355   : > { %8749 = vst [vmem:[#allocation93_spill] sm:$0xff] %v6792_v44  ;;  %v1379_v30 = vmul.f32 0.044715, %v6763_v61  ;;  %5108 = vtanh.f32 %v1605_v17  ;;  %v1380_v14 = vmul.f32 0.044715, %v6786_v5  ;;  %v1732_v52 = vadd.f32 1.0, %v6658_v56 }
 0x356   : > { %5110 = vtanh.f32 %v1603_v7  ;;  %v1382_v27 = vmul.f32 0.044715, %v6789_v43  ;;  %v1730_v12 = vadd.f32 1.0, %v6648_v21  ;;  %v1734_v20 = vadd.f32 1.0, %v6678_v2 }
 0x357   : > { %5112 = vtanh.f32 %v1607_v51  ;;  %v6803_v3 = vmul.f32 %v1728_v23, %v6528_v49  ;;  %v6806_v24 = vmul.f32 %v1732_v52, %v6545_v9  ;;  %v6820_v2 = vadd.f32 %v6706_v0, %v6496_v39 }
 0x358   : > { %v6808_v17 = vpop.f32.mrb[24].mxu0  ;;  %v6810_v8 = vpop.f32.mrb[24].mxu1  ;;  %v6813_v56 = vmul.f32 %v1730_v12, %v6531_v60  ;;  %v6816_v21 = vmul.f32 %v1734_v20, %v6547_v6  ;;  %v6824_v49 = vadd.f32 %v6708_v33, %v6500_v41  ;;  %v6831_v7 = vmul.f32 %v1440_v11, %v6698_v18 }
 0x359   : > { %v6826_v9 = vpop.f32.mrb[25].mxu0  ;;  %v6828_v1 = vpop.f32.mrb[25].mxu1  ;;  %v1443_v60 = vmul.f32 %v1379_v30, %v6763_v61  ;;  %v6837_v51 = vadd.f32 %v1138_v57, %v6488_v37  ;;  %v1444_v33 = vmul.f32 %v1380_v14, %v6786_v5  ;;  %v1446_v52 = vmul.f32 %v1382_v27, %v6789_v43 }
 0x35a   : > { %8750 = vst [vmem:[#allocation94_spill] sm:$0xff] %v6831_v7  ;;  %v6839_v0 = vpop.f32.mrb[26].mxu0  ;;  %v6841_v23 = vpop.f32.mrb[26].mxu1  ;;  %v6848_v12 = vadd.f32 %v1251_v25, %v6492_v38  ;;  %v6855_v57 = vmul.f32 %v1442_v47, %v6704_v40  ;;  %v1285_v6 = vmul.f32 0.5, %v6515_v29  ;;  %v1381_v7 = vmul.f32 0.044715, %v6820_v2 }
 0x35b   : > { %8751 = vst [vmem:[#allocation95_spill] sm:$0xff] %v6837_v51  ;;  %v6850_v30 = vpop.f32.mrb[27].mxu0  ;;  %v6852_v20 = vpop.f32.mrb[27].mxu1  ;;  %v6860_v14 = vadd.f32 %v1140_v22, %v6496_v39  ;;  %v6863_v27 = vmul.f32 %v1441_v54, %v6730_v26  ;;  %v1283_v25 = vmul.f32 0.5, %v6508_v55  ;;  %v1287_v11 = vmul.f32 0.5, %v6518_v10 }
 0x35c   : > { %8752 = vst [vmem:[#allocation96_spill] sm:$0xff] %v6848_v12  ;;  %8753 = vst [vmem:[#allocation97_spill] sm:$0xff] %v6855_v57  ;;  %v1383_v18 = vmul.f32 0.044715, %v6824_v49  ;;  %v6869_v44 = vmul.f32 %v1443_v60, %v6763_v61  ;;  %v1384_v47 = vmul.f32 0.044715, %v6837_v51  ;;  %v6874_v29 = vadd.f32 %v6759_v35, %v6500_v41 }
 0x35d   : > { %8754 = vst [vmem:[#allocation98_spill] sm:$0xff] %v6863_v27  ;;  %v1545_v22 = vadd.f32 %v6613_v42, %v6537_v48  ;;  %v6879_v57 = vmul.f32 %v1444_v33, %v6786_v5  ;;  %v6882_v55 = vmul.f32 %v1446_v52, %v6789_v43  ;;  %v1386_v10 = vmul.f32 0.044715, %v6848_v12  ;;  %v8758_v60 = vld [vmem:[#allocation67_spill] sm:$0xff] }
 0x35e   : > { %8755 = vst [vmem:[#allocation99_spill] sm:$0xff] %v6869_v44  ;;  %v5107_v54 = vpop.eup %5106  ;;  %v1549_v40 = vadd.f32 %v8758_v60, %v6565_v63  ;;  %v1445_v35 = vmul.f32 %v1381_v7, %v6820_v2  ;;  %v1385_v27 = vmul.f32 0.044715, %v6860_v14  ;;  %v6890_v42 = vmul.f32 0.5, %v6537_v48 }
 0x35f   : > { %8756 = vst [vmem:[#allocation100_spill] sm:$0xff] %v6879_v57  ;;  %8757 = vst [vmem:[#allocation101_spill] sm:$0xff] %v6882_v55  ;;  %v5109_v44 = vpop.eup %5108  ;;  %v1729_v61 = vadd.f32 1.0, %v5107_v54  ;;  %v1447_v43 = vmul.f32 %v1383_v18, %v6824_v49  ;;  %v1609_v57 = vmul.f32 0.7978846, %v1545_v22  ;;  %v1448_v7 = vmul.f32 %v1384_v47, %v6837_v51 }
 0x360   : > { %v6892_v26 = vpop.f32.mrb[28].mxu0  ;;  %v6894_v33 = vpop.f32.mrb[28].mxu1  ;;  %v1733_v55 = vadd.f32 1.0, %v5109_v44  ;;  %v1613_v5 = vmul.f32 0.7978846, %v1549_v40  ;;  %v6902_v48 = vmul.f32 0.5, %v6565_v63  ;;  %v1450_v47 = vmul.f32 %v1386_v10, %v6848_v12 }
 0x361   : > { %8759 = vst [vmem:[#allocation67_spill] sm:$0xff] %v6892_v26  ;;  %8760 = vst [vmem:[#allocation102_spill] sm:$0xff] %v6894_v33  ;;  %v5111_v52 = vpop.eup %5110  ;;  %v6897_v60 = vpop.f32.mrb[29].mxu0  ;;  %v1387_v4 = vmul.f32 0.044715, %v6874_v29  ;;  %v1793_v44 = vmul.f32 %v1729_v61, %v6777_v46  ;;  %5114 = vtanh.f32 %v1609_v57  ;;  %v8764_v63 = vld [vmem:[#allocation52_spill] sm:$0xff] }
 0x362   : > { %8761 = vst [vmem:[#allocation103_spill] sm:$0xff] %v6897_v60  ;;  %v5113_v54 = vpop.eup %5112  ;;  %v1731_v50 = vadd.f32 1.0, %v5111_v52  ;;  %v6904_v16 = vpop.f32.mrb[29].mxu1  ;;  %v1797_v18 = vmul.f32 %v1733_v55, %v1285_v6  ;;  %v1449_v52 = vmul.f32 %v1385_v27, %v6860_v14  ;;  %5116 = vtanh.f32 %v1613_v5  ;;  %v8765_v60 = vld [vmem:[#allocation63_spill] sm:$0xff]  ;;  %v8767_v6 = vld [vmem:[#allocation68_spill] sm:$0xff] }
 0x363   : > { %8762 = vst [vmem:[#allocation104_spill] sm:$0xff] %v6904_v16  ;;  %v6906_v59 = vpop.f32.mrb[30].mxu0  ;;  %v1735_v22 = vadd.f32 1.0, %v5113_v54  ;;  %v6909_v40 = vpop.f32.mrb[30].mxu1  ;;  %v1547_v33 = vadd.f32 %v8765_v60, %v8764_v63  ;;  %v8766_v46 = vld [vmem:[#allocation55_spill] sm:$0xff]  ;;  %v6922_v55 = vmul.f32 %v1445_v35, %v6820_v2  ;;  %v6925_v54 = vmul.f32 %v1447_v43, %v6824_v49 }
 0x364   : > { %8763 = vst [vmem:[#allocation105_spill] sm:$0xff] %v6906_v59  ;;  %v6911_v58 = vpop.f32.mrb[31].mxu0  ;;  %v6917_v16 = vpop.f32.mrb[31].mxu1  ;;  %v1857_v59 = vpack.c.bf16 %v1797_v18, %v1793_v44  ;;  %v1795_v26 = vmul.f32 %v1731_v50, %v1283_v25  ;;  %v1551_v57 = vadd.f32 %v8767_v6, %v8766_v46  ;;  %v6929_v5 = vadd.f32 %v6769_v45, %v6488_v37  ;;  %v8771_v25 = vld [vmem:[#allocation59_spill] sm:$0xff] }
 0x365   : > { %v1799_v61 = vmul.f32 %v1735_v22, %v1287_v11  ;;  %v1611_v10 = vmul.f32 0.7978846, %v1547_v33  ;;  %v6933_v50 = vadd.f32 %v6771_v32, %v6492_v38  ;;  %v8770_v11 = vld [vmem:[#allocation50_spill] sm:$0xff]  ;;  %v8772_v35 = vpack.c.bf16 %v6806_v24, %v6803_v3 }
 0x366   : > { %8768 = vst [vmem:[#allocation52_spill] sm:$0xff] %v6929_v5  ;;  %2183 = vmatprep.mubr.bf16.mxu0 %v1857_v59  ;;  %v1615_v60 = vmul.f32 0.7978846, %v1551_v57  ;;  %v1544_v44 = vadd.f32 %v8771_v25, %v8770_v11  ;;  %v6941_v43 = vmul.f32 %v1448_v7, %v6837_v51  ;;  %v1451_v45 = vmul.f32 %v1387_v4, %v6874_v29  ;;  %v8774_v59 = vld [vmem:[#allocation53_spill] sm:$0xff]  ;;  %v8778_v7 = vld [vmem:[#allocation51_spill] sm:$0xff]  ;;  %v8780_v57 = vld [vmem:[#allocation54_spill] sm:$0xff] }
 0x367   : > { %v1859_v27 = vpack.c.bf16 %v1799_v61, %v1795_v26  ;;  %8769 = vst [vmem:[#allocation63_spill] sm:$0xff] %v6933_v50  ;;  %2184 = vmatmul.mubr.bf16.vlgmr.msra.gmra.mrb[32].mxu0 %v8772_v35  ;;  %5118 = vtanh.f32 %v1611_v10  ;;  %v8775_v26 = vld [vmem:[#allocation64_spill] sm:$0xff]  ;;  %v6947_v32 = vmul.f32 %v1450_v47, %v6848_v12  ;;  %v6950_v18 = vmul.f32 %v1449_v52, %v6860_v14  ;;  %v8781_v10 = vld [vmem:[#allocation65_spill] sm:$0xff] }
 0x368   : > { %8773 = vst [vmem:[#allocation55_spill] sm:$0xff] %v6941_v43  ;;  %v1548_v33 = vadd.f32 %v8775_v26, %v8774_v59  ;;  %5120 = vtanh.f32 %v1615_v60  ;;  %v1608_v22 = vmul.f32 0.7978846, %v1544_v44  ;;  %v8777_v3 = vpack.c.bf16 %v6816_v21, %v6813_v56  ;;  %v8779_v61 = vld [vmem:[#allocation60_spill] sm:$0xff] }
 0x369   : > { %2280 = vmatprep.mubr.bf16.mxu1 %v1859_v27  ;;  %8776 = vst [vmem:[#allocation68_spill] sm:$0xff] %v6947_v32  ;;  %v1388_v24 = vmul.f32 0.044715, %v6929_v5  ;;  %v1546_v6 = vadd.f32 %v8779_v61, %v8778_v7  ;;  %v1550_v27 = vadd.f32 %v8781_v10, %v8780_v57  ;;  %v1390_v47 = vmul.f32 0.044715, %v6933_v50 }
 0x36a   : > { %2281 = vmatmul.mubr.bf16.vlgmr.msra.gmra.mrb[32].mxu1 %v8777_v3  ;;  %v1612_v4 = vmul.f32 0.7978846, %v1548_v33  ;;  %5122 = vtanh.f32 %v1608_v22  ;;  %v6963_v52 = vadd.f32 %v6781_v34, %v6496_v39  ;;  %v6967_v56 = vadd.f32 %v6783_v53, %v6500_v41 }
 0x36b   : > { %v6970_v21 = vmul.f32 %v1451_v45, %v6874_v29  ;;  %v1610_v60 = vmul.f32 0.7978846, %v1546_v6  ;;  %v1614_v25 = vmul.f32 0.7978846, %v1550_v27  ;;  %v5115_v44 = vpop.eup %5114  ;;  %v1291_v35 = vmul.f32 0.5, %v8764_v63 }
 0x36c   : > { %5124 = vtanh.f32 %v1612_v4  ;;  %v1389_v26 = vmul.f32 0.044715, %v6963_v52  ;;  %v1391_v33 = vmul.f32 0.044715, %v6967_v56  ;;  %v6977_v34 = vadd.f32 %v6808_v17, %v6488_v37  ;;  %v5117_v22 = vpop.eup %5116 }
 0x36d   : > { %v1737_v53 = vadd.f32 1.0, %v5115_v44  ;;  %v1295_v3 = vmul.f32 0.5, %v8766_v46  ;;  %5126 = vtanh.f32 %v1610_v60  ;;  %v6982_v45 = vadd.f32 %v6810_v8, %v6492_v38 }
 0x36e   : > { %v1741_v4 = vadd.f32 1.0, %v5117_v22  ;;  %v1452_v63 = vmul.f32 %v1388_v24, %v6929_v5  ;;  %v1454_v61 = vmul.f32 %v1390_v47, %v6933_v50  ;;  %5128 = vtanh.f32 %v1614_v25 }
 0x36f   : > { %8782 = vst [vmem:[#allocation50_spill] sm:$0xff] %v6982_v45  ;;  %v1288_v6 = vmul.f32 0.5, %v8770_v11  ;;  %v1453_v17 = vmul.f32 %v1389_v26, %v6963_v52  ;;  %v1455_v10 = vmul.f32 %v1391_v33, %v6967_v56  ;;  %v6991_v46 = vadd.f32 %v6826_v9, %v6496_v39 }
 0x370   : > { %v1801_v27 = vmul.f32 %v1737_v53, %v6890_v42  ;;  %v1805_v8 = vmul.f32 %v1741_v4, %v6902_v48  ;;  %v1392_v60 = vmul.f32 0.044715, %v6977_v34  ;;  %v6998_v24 = vadd.f32 %v6828_v1, %v6500_v41 }
 0x371   : > { %v5119_v47 = vpop.eup %5118  ;;  %v1292_v11 = vmul.f32 0.5, %v8774_v59  ;;  %v1290_v25 = vmul.f32 0.5, %v8778_v7  ;;  %v1294_v44 = vmul.f32 0.5, %v8780_v57  ;;  %v1394_v9 = vmul.f32 0.044715, %v6982_v45 }
 0x372   : > { %v5121_v26 = vpop.eup %5120  ;;  %v1861_v33 = vpack.c.bf16 %v1805_v8, %v1801_v27  ;;  %v1739_v42 = vadd.f32 1.0, %v5119_v47  ;;  %v7005_v48 = vmul.f32 %v1452_v63, %v6929_v5  ;;  %v7008_v22 = vmul.f32 %v1454_v61, %v6933_v50  ;;  %v8786_v63 = vld [vmem:[#allocation58_spill] sm:$0xff]  ;;  %v8787_v8 = vld [vmem:[#allocation72_spill] sm:$0xff] }
 0x373   : > { %v1743_v1 = vadd.f32 1.0, %v5121_v26  ;;  %v7011_v53 = vmul.f32 %v1453_v17, %v6963_v52  ;;  %v7014_v59 = vmul.f32 %v1455_v10, %v6967_v56  ;;  %v1393_v7 = vmul.f32 0.044715, %v6991_v46  ;;  %v8789_v5 = vld [vmem:[#allocation80_spill] sm:$0xff] }
 0x374   : > { %8783 = vst [vmem:[#allocation59_spill] sm:$0xff] %v7005_v48  ;;  %8784 = vst [vmem:[#allocation53_spill] sm:$0xff] %v7008_v22  ;;  %v5123_v57 = vpop.eup %5122  ;;  %2191 = vmatprep.mubr.bf16.mxu0 %v1861_v33  ;;  %v1456_v4 = vmul.f32 %v1392_v60, %v6977_v34  ;;  %v1395_v27 = vmul.f32 0.044715, %v6998_v24  ;;  %v1553_v47 = vadd.f32 %v8787_v8, %v8786_v63  ;;  %v8788_v33 = vld [vmem:[#allocation61_spill] sm:$0xff] }
 0x375   : > { %8785 = vst [vmem:[#allocation64_spill] sm:$0xff] %v7014_v59  ;;  %v1557_v61 = vadd.f32 %v6727_v62, %v6620_v36  ;;  %v1803_v17 = vmul.f32 %v1739_v42, %v1291_v35  ;;  %v1807_v22 = vmul.f32 %v1743_v1, %v1295_v3  ;;  %v1736_v50 = vadd.f32 1.0, %v5123_v57 }
 0x376   : > { %v5125_v26 = vpop.eup %5124  ;;  %v1458_v10 = vmul.f32 %v1394_v9, %v6982_v45  ;;  %v1617_v12 = vmul.f32 0.7978846, %v1553_v47  ;;  %v1555_v60 = vadd.f32 %v8789_v5, %v8788_v33  ;;  %v1559_v8 = vadd.f32 %v6733_v13, %v6623_v31  ;;  %v8795_v47 = vld [vmem:[#allocation57_spill] sm:$0xff] }
 0x377   : > { %v1740_v32 = vadd.f32 1.0, %v5125_v26  ;;  %v1621_v48 = vmul.f32 0.7978846, %v1557_v61  ;;  %v5127_v43 = vpop.eup %5126  ;;  %v1863_v51 = vpack.c.bf16 %v1807_v22, %v1803_v17  ;;  %v1800_v59 = vmul.f32 %v1736_v50, %v1288_v6  ;;  %v8796_v61 = vld [vmem:[#allocation71_spill] sm:$0xff] }
 0x378   : > { %v7030_v62 = vadd.f32 %v6839_v0, %v6488_v37  ;;  %v5129_v35 = vpop.eup %5128  ;;  %v1738_v42 = vadd.f32 1.0, %v5127_v43  ;;  %5130 = vtanh.f32 %v1617_v12  ;;  %v1619_v9 = vmul.f32 0.7978846, %v1555_v60 }
 0x379   : > { %v1804_v3 = vmul.f32 %v1740_v32, %v1292_v11  ;;  %2288 = vmatprep.mubr.bf16.mxu1 %v1863_v51  ;;  %v1742_v1 = vadd.f32 1.0, %v5129_v35  ;;  %v1457_v57 = vmul.f32 %v1393_v7, %v6991_v46  ;;  %5132 = vtanh.f32 %v1621_v48  ;;  %v8792_v32 = vld [vmem:[#allocation56_spill] sm:$0xff]  ;;  %v8793_v11 = vld [vmem:[#allocation70_spill] sm:$0xff] }
 0x37a   : > { %8790 = vst [vmem:[#allocation51_spill] sm:$0xff] %v7030_v62  ;;  %v1623_v5 = vmul.f32 0.7978846, %v1559_v8  ;;  %v1459_v50 = vmul.f32 %v1395_v27, %v6998_v24  ;;  %v1297_v13 = vmul.f32 0.5, %v8786_v63  ;;  %5134 = vtanh.f32 %v1619_v9  ;;  %v8798_v9 = vld [vmem:[#allocation67_spill] sm:$0xff] }
 0x37b   : > { %v1860_v22 = vpack.c.bf16 %v1804_v3, %v1800_v59  ;;  %v1802_v6 = vmul.f32 %v1738_v42, %v1290_v25  ;;  %v1806_v0 = vmul.f32 %v1742_v1, %v1294_v44  ;;  %v7037_v43 = vadd.f32 %v6841_v23, %v6492_v38 }
 0x37c   : > { %5136 = vtanh.f32 %v1623_v5  ;;  %v1301_v51 = vmul.f32 0.5, %v6620_v36  ;;  %v1396_v12 = vmul.f32 0.044715, %v7030_v62  ;;  %v1552_v48 = vadd.f32 %v8793_v11, %v8792_v32 }
 0x37d   : > { %8791 = vst [vmem:[#allocation60_spill] sm:$0xff] %v7037_v43  ;;  %2192 = vmatmul.mubr.bf16.gmra.mrb[36].mxu0 %v1860_v22  ;;  %v1556_v59 = vadd.f32 %v6721_v19, %v6607_v15  ;;  %v1862_v7 = vpack.c.bf16 %v1806_v0, %v1802_v6  ;;  %v7046_v25 = vmul.f32 %v1456_v4, %v6977_v34  ;;  %v1398_v19 = vmul.f32 0.044715, %v7037_v43  ;;  %v8797_v4 = vld [vmem:[#allocation81_spill] sm:$0xff] }
 0x37e   : > { %v7049_v44 = vmul.f32 %v1458_v10, %v6982_v45  ;;  %v7052_v23 = vmul.f32 %v1457_v57, %v6991_v46  ;;  %v7055_v36 = vmul.f32 %v1459_v50, %v6998_v24  ;;  %v1616_v27 = vmul.f32 0.7978846, %v1552_v48  ;;  %v8799_v57 = vld [vmem:[#allocation102_spill] sm:$0xff] }
 0x37f   : > { %v1620_v63 = vmul.f32 0.7978846, %v1556_v59  ;;  %v1554_v26 = vadd.f32 %v8796_v61, %v8795_v47  ;;  %2289 = vmatmul.mubr.bf16.gmra.mrb[36].mxu1 %v1862_v7  ;;  %v1558_v17 = vadd.f32 %v8797_v4, %v6610_v28  ;;  %v7064_v10 = vadd.f32 %v6850_v30, %v6496_v39 }
 0x380   : > { %8794 = vst [vmem:[#allocation54_spill] sm:$0xff] %v7049_v44  ;;  %v7068_v60 = vadd.f32 %v6852_v20, %v6500_v41  ;;  %v1299_v8 = vmul.f32 0.5, %v8788_v33  ;;  %v1460_v35 = vmul.f32 %v1396_v12, %v7030_v62  ;;  %5138 = vtanh.f32 %v1616_v27 }
 0x381   : > { %v1618_v3 = vmul.f32 0.7978846, %v1554_v26  ;;  %5140 = vtanh.f32 %v1620_v63  ;;  %v1622_v42 = vmul.f32 0.7978846, %v1558_v17  ;;  %v7074_v1 = vadd.f32 %v8798_v9, %v6488_v37  ;;  %v8801_v26 = vld [vmem:[#allocation103_spill] sm:$0xff]  ;;  %v8803_v9 = vld [vmem:[#allocation104_spill] sm:$0xff] }
 0x382   : > { %v7078_v30 = vadd.f32 %v8799_v57, %v6492_v38  ;;  %v5131_v5 = vpop.eup %5130  ;;  %v1303_v20 = vmul.f32 0.5, %v6623_v31  ;;  %v1296_v22 = vmul.f32 0.5, %v8792_v32  ;;  %v1397_v33 = vmul.f32 0.044715, %v7064_v10 }
 0x383   : > { %5142 = vtanh.f32 %v1618_v3  ;;  %v5133_v50 = vpop.eup %5132  ;;  %v1745_v6 = vadd.f32 1.0, %v5131_v5  ;;  %v1462_v0 = vmul.f32 %v1398_v19, %v7037_v43  ;;  %v1399_v12 = vmul.f32 0.044715, %v7068_v60 }
 0x384   : > { %5144 = vtanh.f32 %v1622_v42  ;;  %v5135_v11 = vpop.eup %5134  ;;  %v1749_v48 = vadd.f32 1.0, %v5133_v50  ;;  %v7086_v59 = vmul.f32 %v1460_v35, %v7030_v62  ;;  %v1300_v7 = vmul.f32 0.5, %v6607_v15 }
 0x385   : > { %v1298_v31 = vmul.f32 0.5, %v8795_v47  ;;  %v1747_v27 = vadd.f32 1.0, %v5135_v11  ;;  %v1400_v63 = vmul.f32 0.044715, %v7074_v1  ;;  %v1402_v61 = vmul.f32 0.044715, %v7078_v30 }
 0x386   : > { %8800 = vst [vmem:[#allocation65_spill] sm:$0xff] %v7086_v59  ;;  %v5137_v32 = vpop.eup %5136  ;;  %v7094_v19 = vadd.f32 %v8801_v26, %v6496_v39  ;;  %v1809_v4 = vmul.f32 %v1745_v6, %v1297_v13  ;;  %v1813_v17 = vmul.f32 %v1749_v48, %v1301_v51  ;;  %v1461_v35 = vmul.f32 %v1397_v33, %v7064_v10  ;;  %v8804_v26 = vld [vmem:[#allocation69_spill] sm:$0xff]  ;;  %v8806_v48 = vld [vmem:[#allocation76_spill] sm:$0xff] }
 0x387   : > { %v1751_v3 = vadd.f32 1.0, %v5137_v32  ;;  %v7098_v42 = vmul.f32 %v1462_v0, %v7037_v43  ;;  %v1302_v15 = vmul.f32 0.5, %v6610_v28  ;;  %v1463_v47 = vmul.f32 %v1399_v12, %v7068_v60  ;;  %v8805_v13 = vld [vmem:[#allocation85_spill] sm:$0xff]  ;;  %v8807_v28 = vld [vmem:[#allocation90_spill] sm:$0xff] }
 0x388   : > { %v7104_v57 = vadd.f32 %v8803_v9, %v6500_v41  ;;  %v1865_v5 = vpack.c.bf16 %v1813_v17, %v1809_v4  ;;  %v1811_v50 = vmul.f32 %v1747_v27, %v1299_v8  ;;  %v1561_v51 = vadd.f32 %v8805_v13, %v8804_v26  ;;  %v8809_v27 = vld [vmem:[#allocation86_spill] sm:$0xff]  ;;  %v8810_v13 = vld [vmem:[#allocation77_spill] sm:$0xff] }
 0x389   : > { %8802 = vst [vmem:[#allocation58_spill] sm:$0xff] %v7098_v42  ;;  %v1815_v11 = vmul.f32 %v1751_v3, %v1303_v20  ;;  %v1464_v6 = vmul.f32 %v1400_v63, %v7074_v1  ;;  %v1466_v33 = vmul.f32 %v1402_v61, %v7078_v30  ;;  %v1401_v0 = vmul.f32 0.044715, %v7094_v19  ;;  %v8808_v20 = vld [vmem:[#allocation73_spill] sm:$0xff] }
 0x38a   : > { %v1565_v32 = vadd.f32 %v8807_v28, %v8806_v48  ;;  %v5139_v12 = vpop.eup %5138  ;;  %2199 = vmatprep.mubr.bf16.mxu0 %v1865_v5  ;;  %v7114_v9 = vmul.f32 %v1461_v35, %v7064_v10  ;;  %v1625_v8 = vmul.f32 0.7978846, %v1561_v51  ;;  %v1563_v4 = vadd.f32 %v8809_v27, %v8808_v20  ;;  %v8811_v43 = vld [vmem:[#allocation93_spill] sm:$0xff] }
 0x38b   : > { %v1867_v42 = vpack.c.bf16 %v1815_v11, %v1811_v50  ;;  %v5141_v17 = vpop.eup %5140  ;;  %v1744_v3 = vadd.f32 1.0, %v5139_v12  ;;  %v1403_v63 = vmul.f32 0.044715, %v7104_v57  ;;  %v1567_v44 = vadd.f32 %v8811_v43, %v8810_v13  ;;  %v8812_v12 = vld [vmem:[#allocation105_spill] sm:$0xff] }
 0x38c   : > { %v1629_v61 = vmul.f32 0.7978846, %v1565_v32  ;;  %v1748_v28 = vadd.f32 1.0, %v5141_v17  ;;  %v7122_v5 = vmul.f32 %v1463_v47, %v7068_v60  ;;  %5146 = vtanh.f32 %v1625_v8  ;;  %v8815_v17 = vld [vmem:[#allocation83_spill] sm:$0xff] }
 0x38d   : > { %v5143_v45 = vpop.eup %5142  ;;  %2296 = vmatprep.mubr.bf16.mxu1 %v1867_v42  ;;  %v1627_v35 = vmul.f32 0.7978846, %v1563_v4  ;;  %v1808_v11 = vmul.f32 %v1744_v3, %v1296_v22  ;;  %v7126_v27 = vadd.f32 %v8812_v12, %v6488_v37  ;;  %v1631_v62 = vmul.f32 0.7978846, %v1567_v44  ;;  %v8814_v44 = vld [vmem:[#allocation62_spill] sm:$0xff]  ;;  %v8821_v12 = vld [vmem:[#allocation88_spill] sm:$0xff] }
 0x38e   : > { %v5145_v50 = vpop.eup %5144  ;;  %v1746_v51 = vadd.f32 1.0, %v5143_v45  ;;  %5148 = vtanh.f32 %v1629_v61  ;;  %v1812_v32 = vmul.f32 %v1748_v28, %v1300_v7  ;;  %v7129_v43 = vmul.f32 %v1464_v6, %v7074_v1  ;;  %v8816_v6 = vld [vmem:[#allocation74_spill] sm:$0xff]  ;;  %v8817_v61 = vld [vmem:[#allocation87_spill] sm:$0xff] }
 0x38f   : > { %v1750_v59 = vadd.f32 1.0, %v5145_v50  ;;  %5150 = vtanh.f32 %v1627_v35  ;;  %v7132_v42 = vmul.f32 %v1466_v33, %v7078_v30  ;;  %v1465_v47 = vmul.f32 %v1401_v0, %v7094_v19 }
 0x390   : > { %v1467_v22 = vmul.f32 %v1403_v63, %v7104_v57  ;;  %v1864_v45 = vpack.c.bf16 %v1812_v32, %v1808_v11  ;;  %v1810_v8 = vmul.f32 %v1746_v51, %v1298_v31  ;;  %5152 = vtanh.f32 %v1631_v62  ;;  %v8819_v62 = vld [vmem:[#allocation84_spill] sm:$0xff]  ;;  %v8820_v51 = vld [vmem:[#allocation75_spill] sm:$0xff] }
 0x391   : > { %8813 = vst [vmem:[#allocation72_spill] sm:$0xff] %v7132_v42  ;;  %v1814_v4 = vmul.f32 %v1750_v59, %v1302_v15  ;;  %v1305_v37 = vmul.f32 0.5, %v8804_v26  ;;  %v1404_v7 = vmul.f32 0.044715, %v7126_v27  ;;  %v1560_v3 = vadd.f32 %v8815_v17, %v8814_v44  ;;  %v8818_v59 = vld [vmem:[#allocation66_spill] sm:$0xff]  ;;  %v8833_v42 = vld [vmem:[#allocation101_spill] sm:$0xff] }
 0x392   : > { %v1564_v28 = vadd.f32 %v8817_v61, %v8816_v6  ;;  %2200 = vmatmul.mubr.bf16.gmra.mrb[40].mxu0 %v1864_v45  ;;  %v1309_v0 = vmul.f32 0.5, %v8806_v48  ;;  %v7145_v63 = vadd.f32 %v6909_v40, %v6492_v38  ;;  %v1562_v31 = vadd.f32 %v8819_v62, %v8818_v59 }
 0x393   : > { %v1866_v33 = vpack.c.bf16 %v1814_v4, %v1810_v8  ;;  %v7150_v15 = vmul.f32 %v1465_v47, %v7094_v19  ;;  %v1307_v26 = vmul.f32 0.5, %v8808_v20  ;;  %v1624_v35 = vmul.f32 0.7978846, %v1560_v3  ;;  %v8823_v3 = vld [vmem:[#allocation98_spill] sm:$0xff] }
 0x394   : > { %v1628_v50 = vmul.f32 0.7978846, %v1564_v28  ;;  %v7154_v11 = vmul.f32 %v1467_v22, %v7104_v57  ;;  %v1311_v48 = vmul.f32 0.5, %v8810_v13  ;;  %v1566_v38 = vadd.f32 %v8821_v12, %v8820_v51 }
 0x395   : > { %2297 = vmatmul.mubr.bf16.gmra.mrb[40].mxu1 %v1866_v33  ;;  %v1626_v40 = vmul.f32 0.7978846, %v1562_v31  ;;  %v1468_v32 = vmul.f32 %v1404_v7, %v7126_v27  ;;  %v7161_v45 = vmul.f32 0.5, %v8814_v44  ;;  %v7164_v47 = vmul.f32 0.5, %v8816_v6  ;;  %v8822_v7 = vld [vmem:[#allocation82_spill] sm:$0xff] }
 0x396   : > { %5154 = vtanh.f32 %v1624_v35  ;;  %v5147_v20 = vpop.eup %5146  ;;  %v1406_v8 = vmul.f32 0.044715, %v7145_v63  ;;  %v1630_v22 = vmul.f32 0.7978846, %v1566_v38  ;;  %v7169_v13 = vadd.f32 %v6911_v58, %v6496_v39 }
 0x397   : > { %5156 = vtanh.f32 %v1628_v50  ;;  %v1753_v17 = vadd.f32 1.0, %v5147_v20  ;;  %v1569_v44 = vadd.f32 %v8823_v3, %v8822_v7  ;;  %v1573_v6 = vadd.f32 %v6922_v55, %v6820_v2  ;;  %v8826_v3 = vld [vmem:[#allocation78_spill] sm:$0xff] }
 0x398   : > { %v5149_v4 = vpop.eup %5148  ;;  %5158 = vtanh.f32 %v1626_v40  ;;  %v1306_v33 = vmul.f32 0.5, %v8818_v59  ;;  %v1310_v62 = vmul.f32 0.5, %v8820_v51  ;;  %v7179_v58 = vadd.f32 %v6917_v16, %v6500_v41  ;;  %v8824_v41 = vld [vmem:[#allocation89_spill] sm:$0xff]  ;;  %v8825_v16 = vld [vmem:[#allocation99_spill] sm:$0xff] }
 0x399   : > { %v5151_v61 = vpop.eup %5150  ;;  %v1757_v28 = vadd.f32 1.0, %v5149_v4  ;;  %5160 = vtanh.f32 %v1630_v22  ;;  %v1633_v39 = vmul.f32 0.7978846, %v1569_v44  ;;  %v1637_v35 = vmul.f32 0.7978846, %v1573_v6  ;;  %v8827_v44 = vld [vmem:[#allocation94_spill] sm:$0xff] }
 0x39a   : > { %v1755_v31 = vadd.f32 1.0, %v5151_v61  ;;  %v5153_v50 = vpop.eup %5152  ;;  %v1817_v12 = vmul.f32 %v1753_v17, %v1305_v37  ;;  %v7182_v40 = vmul.f32 %v1468_v32, %v7126_v27  ;;  %v1405_v55 = vmul.f32 0.044715, %v7169_v13 }
 0x39b   : > { %v1821_v38 = vmul.f32 %v1757_v28, %v1309_v0  ;;  %v1759_v20 = vadd.f32 1.0, %v5153_v50  ;;  %v7186_v59 = vmul.f32 %v1406_v8, %v7145_v63  ;;  %v1313_v51 = vmul.f32 0.5, %v8822_v7  ;;  %v8828_v28 = vld [vmem:[#allocation91_spill] sm:$0xff] }
 0x39c   : > { %5162 = vtanh.f32 %v1633_v39  ;;  %v1571_v4 = vadd.f32 %v8825_v16, %v8824_v41  ;;  %v1575_v37 = vadd.f32 %v6925_v54, %v6824_v49  ;;  %v1819_v0 = vmul.f32 %v1755_v31, %v1307_v26  ;;  %v8829_v39 = vld [vmem:[#allocation100_spill] sm:$0xff]  ;;  %v8830_v26 = vld [vmem:[#allocation79_spill] sm:$0xff] }
 0x39d   : > { %v1869_v22 = vpack.c.bf16 %v1821_v38, %v1817_v12  ;;  %5164 = vtanh.f32 %v1637_v35  ;;  %v1823_v32 = vmul.f32 %v1759_v20, %v1311_v48  ;;  %v1407_v17 = vmul.f32 0.044715, %v7179_v58  ;;  %v8831_v48 = vld [vmem:[#allocation97_spill] sm:$0xff] }
 0x39e   : > { %v1568_v6 = vadd.f32 %v8827_v44, %v8826_v3  ;;  %v1469_v8 = vmul.f32 %v1405_v55, %v7169_v13  ;;  %v1635_v7 = vmul.f32 0.7978846, %v1571_v4  ;;  %v1639_v61 = vmul.f32 0.7978846, %v1575_v37 }
 0x39f   : > { %2207 = vmatprep.mubr.bf16.mxu0 %v1869_v22  ;;  %v1572_v35 = vadd.f32 %v8829_v39, %v8828_v28  ;;  %v1871_v12 = vpack.c.bf16 %v1823_v32, %v1819_v0  ;;  %v1317_v38 = vmul.f32 0.5, %v6820_v2  ;;  %v1570_v31 = vadd.f32 %v8831_v48, %v8830_v26  ;;  %v8832_v22 = vld [vmem:[#allocation92_spill] sm:$0xff] }
 0x3a0   : > { %v5155_v50 = vpop.eup %5154  ;;  %v1632_v54 = vmul.f32 0.7978846, %v1568_v6  ;;  %5166 = vtanh.f32 %v1635_v7  ;;  %v1574_v55 = vadd.f32 %v8833_v42, %v8832_v22  ;;  %v7205_v39 = vmul.f32 %v1407_v17, %v7179_v58 }
 0x3a1   : > { %v5157_v20 = vpop.eup %5156  ;;  %v1752_v16 = vadd.f32 1.0, %v5155_v50  ;;  %v1636_v44 = vmul.f32 0.7978846, %v1572_v35  ;;  %2304 = vmatprep.mubr.bf16.mxu1 %v1871_v12  ;;  %5168 = vtanh.f32 %v1639_v61  ;;  %v1634_v0 = vmul.f32 0.7978846, %v1570_v31 }
 0x3a2   : > { %v5159_v4 = vpop.eup %5158  ;;  %v1756_v37 = vadd.f32 1.0, %v5157_v20  ;;  %v7208_v6 = vmul.f32 %v1469_v8, %v7169_v13  ;;  %5170 = vtanh.f32 %v1632_v54  ;;  %v1638_v50 = vmul.f32 0.7978846, %v1574_v55 }
 0x3a3   : > { %v5161_v2 = vpop.eup %5160  ;;  %v1754_v32 = vadd.f32 1.0, %v5159_v4  ;;  %v1816_v7 = vmul.f32 %v1752_v16, %v7161_v45  ;;  %5172 = vtanh.f32 %v1636_v44  ;;  %v1315_v12 = vmul.f32 0.5, %v8824_v41  ;;  %v8834_v4 = vld [vmem:[#allocation64_spill] sm:$0xff] }
 0x3a4   : > { %v1820_v35 = vmul.f32 %v1756_v37, %v7164_v47  ;;  %v1758_v42 = vadd.f32 1.0, %v5161_v2  ;;  %5174 = vtanh.f32 %v1634_v0  ;;  %v1577_v17 = vadd.f32 %v6950_v18, %v6860_v14 }
 0x3a5   : > { %v1581_v61 = vadd.f32 %v7011_v53, %v6963_v52  ;;  %v1818_v31 = vmul.f32 %v1754_v32, %v1306_v33  ;;  %5176 = vtanh.f32 %v1638_v50  ;;  %v1319_v47 = vmul.f32 0.5, %v6824_v49 }
 0x3a6   : > { %v5163_v48 = vpop.eup %5162  ;;  %v1868_v8 = vpack.c.bf16 %v1820_v35, %v1816_v7  ;;  %v1822_v54 = vmul.f32 %v1758_v42, %v1310_v62  ;;  %v1641_v16 = vmul.f32 0.7978846, %v1577_v17  ;;  %v1579_v18 = vadd.f32 %v6970_v21, %v6874_v29  ;;  %v8835_v21 = vld [vmem:[#allocation95_spill] sm:$0xff]  ;;  %v8837_v17 = vld [vmem:[#allocation52_spill] sm:$0xff] }
 0x3a7   : > { %v5165_v20 = vpop.eup %5164  ;;  %v1761_v45 = vadd.f32 1.0, %v5163_v48  ;;  %v1645_v44 = vmul.f32 0.7978846, %v1581_v61  ;;  %v1583_v53 = vadd.f32 %v8834_v4, %v6967_v56  ;;  %v1312_v33 = vmul.f32 0.5, %v8826_v3  ;;  %v8836_v35 = vld [vmem:[#allocation55_spill] sm:$0xff] }
 0x3a8   : > { %2208 = vmatmul.mubr.bf16.gmra.mrb[44].mxu0 %v1868_v8  ;;  %v1870_v41 = vpack.c.bf16 %v1822_v54, %v1818_v31  ;;  %v1765_v55 = vadd.f32 1.0, %v5165_v20  ;;  %v1316_v62 = vmul.f32 0.5, %v8828_v28  ;;  %5178 = vtanh.f32 %v1641_v16  ;;  %v8839_v8 = vld [vmem:[#allocation96_spill] sm:$0xff] }
 0x3a9   : > { %v1825_v37 = vmul.f32 %v1761_v45, %v1313_v51  ;;  %5180 = vtanh.f32 %v1645_v44  ;;  %v1643_v49 = vmul.f32 0.7978846, %v1579_v18  ;;  %v1647_v2 = vmul.f32 0.7978846, %v1583_v53  ;;  %v8838_v51 = vld [vmem:[#allocation59_spill] sm:$0xff] }
 0x3aa   : > { %2305 = vmatmul.mubr.bf16.gmra.mrb[44].mxu1 %v1870_v41  ;;  %v1829_v0 = vmul.f32 %v1765_v55, %v1317_v38  ;;  %v5167_v32 = vpop.eup %5166  ;;  %v1314_v50 = vmul.f32 0.5, %v8830_v26  ;;  %v1318_v7 = vmul.f32 0.5, %v8832_v22  ;;  %v1576_v42 = vadd.f32 %v8836_v35, %v8835_v21  ;;  %v8840_v38 = vld [vmem:[#allocation68_spill] sm:$0xff]  ;;  %v8841_v41 = vld [vmem:[#allocation63_spill] sm:$0xff]  ;;  %v8842_v55 = vld [vmem:[#allocation53_spill] sm:$0xff] }
 0x3ab   : > { %v1580_v61 = vadd.f32 %v8838_v51, %v8837_v17  ;;  %v5169_v3 = vpop.eup %5168  ;;  %v1763_v28 = vadd.f32 1.0, %v5167_v32  ;;  %5182 = vtanh.f32 %v1643_v49  ;;  %v1578_v31 = vadd.f32 %v8840_v38, %v8839_v8 }
 0x3ac   : > { %v1873_v48 = vpack.c.bf16 %v1829_v0, %v1825_v37  ;;  %v5171_v54 = vpop.eup %5170  ;;  %v1767_v20 = vadd.f32 1.0, %v5169_v3  ;;  %5184 = vtanh.f32 %v1647_v2  ;;  %v1640_v45 = vmul.f32 0.7978846, %v1576_v42 }
 0x3ad   : > { %v1644_v26 = vmul.f32 0.7978846, %v1580_v61  ;;  %v5173_v16 = vpop.eup %5172  ;;  %v1760_v22 = vadd.f32 1.0, %v5171_v54  ;;  %v1321_v44 = vmul.f32 0.5, %v6860_v14  ;;  %v1582_v18 = vadd.f32 %v8842_v55, %v8841_v41 }
 0x3ae   : > { %2215 = vmatprep.mubr.bf16.mxu0 %v1873_v48  ;;  %v1642_v4 = vmul.f32 0.7978846, %v1578_v31  ;;  %v5175_v53 = vpop.eup %5174  ;;  %v1827_v37 = vmul.f32 %v1763_v28, %v1315_v12  ;;  %v1831_v0 = vmul.f32 %v1767_v20, %v1319_v47  ;;  %v1764_v49 = vadd.f32 1.0, %v5173_v16 }
 0x3af   : > { %5186 = vtanh.f32 %v1640_v45  ;;  %v5177_v32 = vpop.eup %5176  ;;  %v1824_v35 = vmul.f32 %v1760_v22, %v1312_v33  ;;  %v1762_v51 = vadd.f32 1.0, %v5175_v53  ;;  %v1646_v2 = vmul.f32 0.7978846, %v1582_v18 }
 0x3b0   : > { %5188 = vtanh.f32 %v1644_v26  ;;  %v1875_v42 = vpack.c.bf16 %v1831_v0, %v1827_v37  ;;  %v1828_v61 = vmul.f32 %v1764_v49, %v1316_v62  ;;  %v1766_v3 = vadd.f32 1.0, %v5177_v32  ;;  %v8844_v49 = vld [vmem:[#allocation65_spill] sm:$0xff] }
 0x3b1   : > { %5190 = vtanh.f32 %v1642_v4  ;;  %v1325_v14 = vmul.f32 0.5, %v6963_v52  ;;  %v1323_v48 = vmul.f32 0.5, %v6874_v29  ;;  %v1585_v12 = vadd.f32 %v7052_v23, %v6991_v46 }
 0x3b2   : > { %5192 = vtanh.f32 %v1646_v2  ;;  %v5179_v47 = vpop.eup %5178  ;;  %2312 = vmatprep.mubr.bf16.mxu1 %v1875_v42  ;;  %v1872_v28 = vpack.c.bf16 %v1828_v61, %v1824_v35  ;;  %v1826_v38 = vmul.f32 %v1762_v51, %v1314_v50  ;;  %v1830_v33 = vmul.f32 %v1766_v3, %v1318_v7 }
 0x3b3   : > { %v1589_v31 = vadd.f32 %v7114_v9, %v7064_v10  ;;  %v5181_v54 = vpop.eup %5180  ;;  %v1769_v62 = vadd.f32 1.0, %v5179_v47  ;;  %v1327_v20 = vmul.f32 0.5, %v6967_v56  ;;  %v1649_v45 = vmul.f32 0.7978846, %v1585_v12  ;;  %v8846_v47 = vld [vmem:[#allocation54_spill] sm:$0xff] }
 0x3b4   : > { %v1587_v29 = vadd.f32 %v7055_v36, %v6998_v24  ;;  %2216 = vmatmul.mubr.bf16.gmra.mrb[48].mxu0 %v1872_v28  ;;  %v1874_v52 = vpack.c.bf16 %v1830_v33, %v1826_v38  ;;  %v1773_v26 = vadd.f32 1.0, %v5181_v54  ;;  %v1591_v16 = vadd.f32 %v7122_v5, %v7068_v60 }
 0x3b5   : > { %v1653_v23 = vmul.f32 0.7978846, %v1589_v31  ;;  %v5183_v50 = vpop.eup %5182  ;;  %v1833_v7 = vmul.f32 %v1769_v62, %v1321_v44  ;;  %v1320_v22 = vmul.f32 0.5, %v8835_v21  ;;  %5194 = vtanh.f32 %v1649_v45  ;;  %v8843_v21 = vld [vmem:[#allocation51_spill] sm:$0xff] }
 0x3b6   : > { %v1651_v9 = vmul.f32 0.7978846, %v1587_v29  ;;  %v5185_v55 = vpop.eup %5184  ;;  %2313 = vmatmul.mubr.bf16.gmra.mrb[48].mxu1 %v1874_v52  ;;  %v1837_v56 = vmul.f32 %v1773_v26, %v1325_v14  ;;  %v1771_v18 = vadd.f32 1.0, %v5183_v50  ;;  %v1655_v4 = vmul.f32 0.7978846, %v1591_v16 }
 0x3b7   : > { %5196 = vtanh.f32 %v1653_v23  ;;  %v1775_v36 = vadd.f32 1.0, %v5185_v55  ;;  %v1324_v53 = vmul.f32 0.5, %v8837_v17  ;;  %v1584_v37 = vadd.f32 %v7046_v25, %v6977_v34  ;;  %v8845_v25 = vld [vmem:[#allocation50_spill] sm:$0xff] }
 0x3b8   : > { %5198 = vtanh.f32 %v1651_v9  ;;  %v1877_v0 = vpack.c.bf16 %v1837_v56, %v1833_v7  ;;  %v1322_v44 = vmul.f32 0.5, %v8839_v8  ;;  %v1588_v32 = vadd.f32 %v8844_v49, %v8843_v21 }
 0x3b9   : > { %v5187_v5 = vpop.eup %5186  ;;  %5200 = vtanh.f32 %v1655_v4  ;;  %v1835_v51 = vmul.f32 %v1771_v18, %v1323_v48  ;;  %v1839_v2 = vmul.f32 %v1775_v36, %v1327_v20  ;;  %v1648_v61 = vmul.f32 0.7978846, %v1584_v37  ;;  %v8847_v48 = vld [vmem:[#allocation60_spill] sm:$0xff]  ;;  %v8848_v20 = vld [vmem:[#allocation58_spill] sm:$0xff] }
 0x3ba   : > { %v5189_v35 = vpop.eup %5188  ;;  %v1768_v42 = vadd.f32 1.0, %v5187_v5  ;;  %2223 = vmatprep.mubr.bf16.mxu0 %v1877_v0  ;;  %v1326_v14 = vmul.f32 0.5, %v8841_v41  ;;  %v1652_v12 = vmul.f32 0.7978846, %v1588_v32  ;;  %v1586_v28 = vadd.f32 %v8846_v47, %v8845_v25 }
 0x3bb   : > { %v5191_v3 = vpop.eup %5190  ;;  %v1772_v17 = vadd.f32 1.0, %v5189_v35  ;;  %v1879_v8 = vpack.c.bf16 %v1839_v2, %v1835_v51  ;;  %5202 = vtanh.f32 %v1648_v61  ;;  %v1590_v45 = vadd.f32 %v8848_v20, %v8847_v48 }
 0x3bc   : > { %v5193_v38 = vpop.eup %5192  ;;  %v1832_v33 = vmul.f32 %v1768_v42, %v1320_v22  ;;  %v1770_v31 = vadd.f32 1.0, %v5191_v3  ;;  %5204 = vtanh.f32 %v1652_v12  ;;  %v1535_v29 = vmul.f32 %v7205_v39, %v7179_v58 }
 0x3bd   : > { %v1836_v54 = vmul.f32 %v1772_v17, %v1324_v53  ;;  %v1774_v62 = vadd.f32 1.0, %v5193_v38  ;;  %2320 = vmatprep.mubr.bf16.mxu1 %v1879_v8  ;;  %v1329_v52 = vmul.f32 0.5, %v6991_v46  ;;  %v1650_v26 = vmul.f32 0.7978846, %v1586_v28 }
 0x3be   : > { %v1834_v41 = vmul.f32 %v1770_v31, %v1322_v44  ;;  %v1654_v50 = vmul.f32 0.7978846, %v1590_v45  ;;  %v1593_v7 = vadd.f32 %v7150_v15, %v7094_v19  ;;  %v1333_v9 = vmul.f32 0.5, %v7064_v10 }
 0x3bf   : > { %v1876_v23 = vpack.c.bf16 %v1836_v54, %v1832_v33  ;;  %v1838_v16 = vmul.f32 %v1774_v62, %v1326_v14  ;;  %v5195_v22 = vpop.eup %5194  ;;  %v1331_v55 = vmul.f32 0.5, %v6998_v24  ;;  %5206 = vtanh.f32 %v1650_v26 }
 0x3c0   : > { %v1597_v39 = vadd.f32 %v7208_v6, %v7169_v13  ;;  %v1777_v46 = vadd.f32 1.0, %v5195_v22  ;;  %5208 = vtanh.f32 %v1654_v50  ;;  %v1657_v4 = vmul.f32 0.7978846, %v1593_v7 }
 0x3c1   : > { %v5197_v56 = vpop.eup %5196  ;;  %2224 = vmatmul.mubr.bf16.gmra.mrb[52].mxu0 %v1876_v23  ;;  %v1878_v18 = vpack.c.bf16 %v1838_v16, %v1834_v41  ;;  %v1595_v15 = vadd.f32 %v7154_v11, %v7104_v57  ;;  %v1599_v10 = vadd.f32 %v1535_v29, %v7179_v58  ;;  %v1335_v0 = vmul.f32 0.5, %v7068_v60 }
 0x3c2   : > { %v5199_v36 = vpop.eup %5198  ;;  %v1781_v53 = vadd.f32 1.0, %v5197_v56  ;;  %v1661_v37 = vmul.f32 0.7978846, %v1597_v39  ;;  %v1841_v24 = vmul.f32 %v1777_v46, %v1329_v52  ;;  %5210 = vtanh.f32 %v1657_v4 }
 0x3c3   : > { %v5201_v5 = vpop.eup %5200  ;;  %2321 = vmatmul.mubr.bf16.gmra.mrb[52].mxu1 %v1878_v18  ;;  %v1779_v6 = vadd.f32 1.0, %v5199_v36  ;;  %v1659_v32 = vmul.f32 0.7978846, %v1595_v15  ;;  %v1534_v35 = vmul.f32 %v7186_v59, %v7145_v63  ;;  %v1663_v2 = vmul.f32 0.7978846, %v1599_v10 }
 0x3c4   : > { %v1845_v44 = vmul.f32 %v1781_v53, %v1333_v9  ;;  %v1783_v49 = vadd.f32 1.0, %v5201_v5  ;;  %5212 = vtanh.f32 %v1661_v37  ;;  %v1592_v11 = vadd.f32 %v7129_v43, %v7074_v1  ;;  %v8849_v43 = vld [vmem:[#allocation72_spill] sm:$0xff] }
 0x3c5   : > { %v1843_v51 = vmul.f32 %v1779_v6, %v1331_v55  ;;  %v5203_v42 = vpop.eup %5202  ;;  %5214 = vtanh.f32 %v1659_v32  ;;  %v1596_v60 = vadd.f32 %v7182_v40, %v7126_v27  ;;  %v1328_v14 = vmul.f32 0.5, %v6977_v34 }
 0x3c6   : > { %v1881_v61 = vpack.c.bf16 %v1845_v44, %v1841_v24  ;;  %v1847_v3 = vmul.f32 %v1783_v49, %v1335_v0  ;;  %v5205_v17 = vpop.eup %5204  ;;  %v1776_v12 = vadd.f32 1.0, %v5203_v42  ;;  %5216 = vtanh.f32 %v1663_v2 }
 0x3c7   : > { %v1656_v47 = vmul.f32 0.7978846, %v1592_v11  ;;  %v1332_v28 = vmul.f32 0.5, %v8843_v21  ;;  %v1780_v38 = vadd.f32 1.0, %v5205_v17  ;;  %v1660_v8 = vmul.f32 0.7978846, %v1596_v60 }
 0x3c8   : > { %2231 = vmatprep.mubr.bf16.mxu0 %v1881_v61  ;;  %v1883_v59 = vpack.c.bf16 %v1847_v3, %v1843_v51  ;;  %v1594_v33 = vadd.f32 %v8849_v43, %v7078_v30  ;;  %v1598_v31 = vadd.f32 %v1534_v35, %v7145_v63  ;;  %v1840_v40 = vmul.f32 %v1776_v12, %v1328_v14  ;;  %v7299_v14 = vld [vmem:[%s593_s10] ss:$0 sm:$0xff] }
 0x3c9   : > { %5218 = vtanh.f32 %v1656_v47  ;;  %v5207_v54 = vpop.eup %5206  ;;  %v1844_v62 = vmul.f32 %v1780_v38, %v1332_v28  ;;  %v1330_v21 = vmul.f32 0.5, %v8845_v25  ;;  %v1334_v52 = vmul.f32 0.5, %v8847_v48 }
 0x3ca   : > { %2328 = vmatprep.mubr.bf16.mxu1 %v1883_v59  ;;  %5220 = vtanh.f32 %v1660_v8  ;;  %v5209_v34 = vpop.eup %5208  ;;  %v1778_v20 = vadd.f32 1.0, %v5207_v54  ;;  %v1658_v45 = vmul.f32 0.7978846, %v1594_v33  ;;  %v1662_v29 = vmul.f32 0.7978846, %v1598_v31 }
 0x3cb   : > { %v1880_v41 = vpack.c.bf16 %v1844_v62, %v1840_v40  ;;  %v1782_v26 = vadd.f32 1.0, %v5209_v34  ;;  %v1337_v9 = vmul.f32 0.5, %v7094_v19  ;;  %v1341_v55 = vmul.f32 0.5, %v7169_v13 }
 0x3cc   : > { %v5211_v23 = vpop.eup %5210  ;;  %5222 = vtanh.f32 %v1658_v45  ;;  %v1842_v50 = vmul.f32 %v1778_v20, %v1330_v21  ;;  %v1339_v36 = vmul.f32 0.5, %v7104_v57  ;;  %v1343_v53 = vmul.f32 0.5, %v7179_v58  ;;  %v8852_v20 = vld [vmem:[#allocation33_spill] sm:$0xff] }
 0x3cd   : > { %2232 = vmatmul.mubr.bf16.gmra.mrb[56].mxu0 %v1880_v41  ;;  %v1846_v7 = vmul.f32 %v1782_v26, %v1334_v52  ;;  %v1785_v22 = vadd.f32 1.0, %v5211_v23  ;;  %5224 = vtanh.f32 %v1662_v29  ;;  %v1336_v13 = vmul.f32 0.5, %v7074_v1  ;;  %v8853_v29 = vld [vmem:[#allocation34_spill] sm:$0xff] }
 0x3ce   : > { %v5213_v16 = vpop.eup %5212  ;;  %v1340_v6 = vmul.f32 0.5, %v7126_v27  ;;  %v1338_v11 = vmul.f32 0.5, %v7078_v30  ;;  %v1342_v42 = vmul.f32 0.5, %v7145_v63  ;;  %v8850_v60 = vmov 0  }
 0x3cf   : > { %v1789_v39 = vadd.f32 1.0, %v5213_v16  ;;  %v5215_v56 = vpop.eup %5214  ;;  %v1882_v18 = vpack.c.bf16 %v1846_v7, %v1842_v50  ;;  %v1849_v25 = vmul.f32 %v1785_v22, %v1337_v9 }
 0x3d0   : > { %v5217_v46 = vpop.eup %5216  ;;  %v1787_v48 = vadd.f32 1.0, %v5215_v56 }
 0x3d1   : > { %v1853_v4 = vmul.f32 %v1789_v39, %v1341_v55  ;;  %2329 = vmatmul.mubr.bf16.gmra.mrb[56].mxu1 %v1882_v18  ;;  %v1791_v37 = vadd.f32 1.0, %v5217_v46 }
 0x3d2   : > { %v1851_v24 = vmul.f32 %v1787_v48, %v1339_v36  ;;  %v8854_v48 = vld [vmem:[#allocation36_spill] sm:$0xff] }
 0x3d3   : > { %v5219_v15 = vpop.eup %5218  ;;  %v1885_v10 = vpack.c.bf16 %v1853_v4, %v1849_v25  ;;  %v1855_v19 = vmul.f32 %v1791_v37, %v1343_v53  ;;  %v8855_v53 = vld [vmem:[#allocation35_spill] sm:$0xff] }
 0x3d4   : > { %v5221_v5 = vpop.eup %5220  ;;  %v1784_v0 = vadd.f32 1.0, %v5219_v15 }
 0x3d5   : > { %2239 = vmatprep.mubr.bf16.mxu0 %v1885_v10  ;;  %v1788_v44 = vadd.f32 1.0, %v5221_v5  ;;  %v1887_v49 = vpack.c.bf16 %v1855_v19, %v1851_v24 }
 0x3d6   : > { %v5223_v32 = vpop.eup %5222  ;;  %v1848_v35 = vmul.f32 %v1784_v0, %v1336_v13 }
 0x3d7   : > { %v1852_v51 = vmul.f32 %v1788_v44, %v1340_v6  ;;  %v5225_v57 = vpop.eup %5224  ;;  %2336 = vmatprep.mubr.bf16.mxu1 %v1887_v49  ;;  %v1786_v58 = vadd.f32 1.0, %v5223_v32 }
 0x3d8   : > { %v1790_v61 = vadd.f32 1.0, %v5225_v57 }
 0x3d9   : > { %v1884_v2 = vpack.c.bf16 %v1852_v51, %v1848_v35  ;;  %v1850_v3 = vmul.f32 %v1786_v58, %v1338_v11  ;;  %v8856_v11 = vld [vmem:[#allocation38_spill] sm:$0xff] }
 0x3da   : > { %v1854_v1 = vmul.f32 %v1790_v61, %v1342_v42  ;;  %v8857_v61 = vld [vmem:[#allocation37_spill] sm:$0xff] }
 0x3db   : > { %2240 = vmatmul.mubr.bf16.gmra.mrb[60].mxu0 %v1884_v2 }
 0x3dc   : > { %2791 = vmatprep.mubr.bf16.mxu0 %v8850_v60  ;;  %v1886_v27 = vpack.c.bf16 %v1854_v1, %v1850_v3 }
 0x3de   : > { %2337 = vmatmul.mubr.bf16.gmra.mrb[60].mxu1 %v1886_v27 }
 0x3df   : > { %2904 = vmatprep.mubr.bf16.mxu1 %v8850_v60 }
 0x43a   : > { %v4530_v17 = vpop.f32.mrb[32].mxu0 }
 0x43b   : > { %v4531_v30 = vpop.f32.mrb[33].mxu0 }
 0x43c   : > { %v4532_v63 = vadd.f32 %v4531_v30, %v4530_v17  ;;  %v4533_v47 = vpop.f32.mrb[34].mxu0 }
 0x43d   : > { %v4594_v12 = vpop.f32.mrb[32].mxu1  ;;  %v4534_v28 = vpop.f32.mrb[35].mxu0 }
 0x43e   : > { %v4595_v59 = vpop.f32.mrb[33].mxu1  ;;  %v2186_v38 = vadd.f32 %v4532_v63, %v7299_v14  ;;  %v4535_v33 = vadd.f32 %v4534_v28, %v4533_v47 }
 0x43f   : > { %v4596_v8 = vadd.f32 %v4595_v59, %v4594_v12  ;;  %v4597_v43 = vpop.f32.mrb[34].mxu1 }
 0x440   : > { %v4598_v31 = vpop.f32.mrb[35].mxu1  ;;  %v2189_v40 = vadd.f32 %v4535_v33, %v7299_v14 }
 0x441   : > { %v2283_v54 = vadd.f32 %v4596_v8, %v2186_v38  ;;  %v4599_v62 = vadd.f32 %v4598_v31, %v4597_v43 }
 0x443   : > { %v2286_v34 = vadd.f32 %v4599_v62, %v2189_v40  ;;  %v7304_v45 = vadd.f32 %v2283_v54, %v8852_v20  ;;  %v8858_v62 = vld [vmem:[#allocation40_spill] sm:$0xff]  ;;  %v8859_v20 = vld [vmem:[#allocation39_spill] sm:$0xff] }
 0x445   : > { %2361 = vadd.xlane.f32.xlu0 %v7304_v45  ;;  %v7308_v41 = vadd.f32 %v2286_v34, %v8853_v29 }
 0x447   : > { %2363 = vadd.xlane.f32.xlu1 %v7308_v41 }
 0x450   : > { %v4536_v21 = vpop.f32.mrb[36].mxu0 }
 0x451   : > { %v4537_v52 = vpop.f32.mrb[37].mxu0 }
 0x452   : > { %v4538_v26 = vadd.f32 %v4537_v52, %v4536_v21  ;;  %v4539_v23 = vpop.f32.mrb[38].mxu0  ;;  %v4600_v16 = vpop.f32.mrb[36].mxu1 }
 0x453   : > { %v4540_v50 = vpop.f32.mrb[39].mxu0  ;;  %v4601_v22 = vpop.f32.mrb[37].mxu1 }
 0x454   : > { %v2194_v7 = vadd.f32 %v4538_v26, %v7299_v14  ;;  %v4541_v9 = vadd.f32 %v4540_v50, %v4539_v23  ;;  %v4602_v55 = vadd.f32 %v4601_v22, %v4600_v16  ;;  %v4603_v39 = vpop.f32.mrb[38].mxu1 }
 0x455   : > { %v4604_v18 = vpop.f32.mrb[39].mxu1 }
 0x456   : > { %v2197_v56 = vadd.f32 %v4541_v9, %v7299_v14  ;;  %v2291_v46 = vadd.f32 %v4602_v55, %v2194_v7  ;;  %v4605_v25 = vadd.f32 %v4604_v18, %v4603_v39 }
 0x458   : > { %v2294_v4 = vadd.f32 %v4605_v25, %v2197_v56  ;;  %v7314_v36 = vadd.f32 %v2291_v46, %v8854_v48  ;;  %v8860_v48 = vld [vmem:[#allocation42_spill] sm:$0xff] }
 0x45a   : > { %2365 = vadd.xlane.f32.xlu0 %v7314_v36  ;;  %v7318_v37 = vadd.f32 %v2294_v4, %v8855_v53 }
 0x45c   : > { %2367 = vadd.xlane.f32.xlu1 %v7318_v37 }
 0x465   : > { %v4542_v15 = vpop.f32.mrb[40].mxu0 }
 0x466   : > { %v4543_v10 = vpop.f32.mrb[41].mxu0 }
 0x467   : > { %v4544_v24 = vadd.f32 %v4543_v10, %v4542_v15  ;;  %v4545_v19 = vpop.f32.mrb[42].mxu0  ;;  %v8861_v15 = vld [vmem:[#allocation41_spill] sm:$0xff] }
 0x468   : > { %v4606_v5 = vpop.f32.mrb[40].mxu1  ;;  %v4546_v13 = vpop.f32.mrb[43].mxu0 }
 0x469   : > { %v4607_v0 = vpop.f32.mrb[41].mxu1  ;;  %v2202_v6 = vadd.f32 %v4544_v24, %v7299_v14  ;;  %v4547_v32 = vadd.f32 %v4546_v13, %v4545_v19 }
 0x46a   : > { %v4608_v44 = vadd.f32 %v4607_v0, %v4606_v5  ;;  %v4609_v49 = vpop.f32.mrb[42].mxu1 }
 0x46b   : > { %v4610_v35 = vpop.f32.mrb[43].mxu1  ;;  %v2205_v57 = vadd.f32 %v4547_v32, %v7299_v14 }
 0x46c   : > { %v2299_v51 = vadd.f32 %v4608_v44, %v2202_v6  ;;  %v4611_v58 = vadd.f32 %v4610_v35, %v4609_v49 }
 0x46e   : > { %v2302_v2 = vadd.f32 %v4611_v58, %v2205_v57  ;;  %v7324_v42 = vadd.f32 %v2299_v51, %v8856_v11 }
 0x470   : > { %2369 = vadd.xlane.f32.xlu0 %v7324_v42  ;;  %v7328_v3 = vadd.f32 %v2302_v2, %v8857_v61 }
 0x472   : > { %2371 = vadd.xlane.f32.xlu1 %v7328_v3 }
 0x47b   : > { %v4548_v1 = vpop.f32.mrb[44].mxu0 }
 0x47c   : > { %v4549_v27 = vpop.f32.mrb[45].mxu0 }
 0x47d   : > { %v4612_v17 = vpop.f32.mrb[44].mxu1  ;;  %v4550_v30 = vadd.f32 %v4549_v27, %v4548_v1  ;;  %v4551_v12 = vpop.f32.mrb[46].mxu0  ;;  %v8862_v1 = vld [vmem:[#allocation44_spill] sm:$0xff] }
 0x47e   : > { %v4613_v63 = vpop.f32.mrb[45].mxu1  ;;  %v4552_v47 = vpop.f32.mrb[47].mxu0 }
 0x47f   : > { %v2210_v59 = vadd.f32 %v4550_v30, %v7299_v14  ;;  %v4614_v28 = vadd.f32 %v4613_v63, %v4612_v17  ;;  %v4615_v38 = vpop.f32.mrb[46].mxu1  ;;  %v4553_v8 = vadd.f32 %v4552_v47, %v4551_v12  ;;  %v8863_v17 = vld [vmem:[#allocation43_spill] sm:$0xff] }
 0x480   : > { %v4616_v43 = vpop.f32.mrb[47].mxu1 }
 0x481   : > { %v2307_v33 = vadd.f32 %v4614_v28, %v2210_v59  ;;  %v2213_v31 = vadd.f32 %v4553_v8, %v7299_v14  ;;  %v4617_v54 = vadd.f32 %v4616_v43, %v4615_v38 }
 0x483   : > { %v2310_v40 = vadd.f32 %v4617_v54, %v2213_v31  ;;  %v7334_v34 = vadd.f32 %v2307_v33, %v8858_v62 }
 0x485   : > { %2373 = vadd.xlane.f32.xlu0 %v7334_v34  ;;  %v7338_v29 = vadd.f32 %v2310_v40, %v8859_v20 }
 0x487   : > { %2375 = vadd.xlane.f32.xlu1 %v7338_v29  ;;  %v4554_v21 = vpop.f32.mrb[48].mxu0 }
 0x488   : > { %v4555_v52 = vpop.f32.mrb[49].mxu0 }
 0x489   : > { %v4618_v26 = vpop.f32.mrb[48].mxu1  ;;  %v4556_v23 = vadd.f32 %v4555_v52, %v4554_v21  ;;  %v4557_v16 = vpop.f32.mrb[50].mxu0 }
 0x48a   : > { %v4619_v50 = vpop.f32.mrb[49].mxu1  ;;  %v4558_v7 = vpop.f32.mrb[51].mxu0 }
 0x48b   : > { %v2218_v22 = vadd.f32 %v4556_v23, %v7299_v14  ;;  %v4620_v9 = vadd.f32 %v4619_v50, %v4618_v26  ;;  %v4621_v55 = vpop.f32.mrb[50].mxu1  ;;  %v4559_v39 = vadd.f32 %v4558_v7, %v4557_v16  ;;  %v8864_v26 = vld [vmem:[#allocation46_spill] sm:$0xff]  ;;  %v8865_v16 = vld [vmem:[#allocation45_spill] sm:$0xff] }
 0x48c   : > { %v4622_v56 = vpop.f32.mrb[51].mxu1 }
 0x48d   : > { %v2315_v18 = vadd.f32 %v4620_v9, %v2218_v22  ;;  %v2221_v46 = vadd.f32 %v4559_v39, %v7299_v14  ;;  %v4623_v25 = vadd.f32 %v4622_v56, %v4621_v55 }
 0x48f   : > { %v2318_v4 = vadd.f32 %v4623_v25, %v2221_v46  ;;  %v7344_v53 = vadd.f32 %v2315_v18, %v8860_v48 }
 0x491   : > { %2377 = vadd.xlane.f32.xlu0 %v7344_v53  ;;  %v7348_v10 = vadd.f32 %v2318_v4, %v8861_v15 }
 0x493   : > { %2379 = vadd.xlane.f32.xlu1 %v7348_v10 }
 0x494   : > { %v4560_v5 = vpop.f32.mrb[52].mxu0 }
 0x495   : > { %v4561_v24 = vpop.f32.mrb[53].mxu0 }
 0x496   : > { %v4624_v19 = vpop.f32.mrb[52].mxu1  ;;  %v4562_v0 = vadd.f32 %v4561_v24, %v4560_v5  ;;  %v4563_v13 = vpop.f32.mrb[54].mxu0 }
 0x497   : > { %v4625_v6 = vpop.f32.mrb[53].mxu1  ;;  %v4564_v44 = vpop.f32.mrb[55].mxu0 }
 0x498   : > { %v2226_v49 = vadd.f32 %v4562_v0, %v7299_v14  ;;  %v4626_v32 = vadd.f32 %v4625_v6, %v4624_v19  ;;  %v4627_v35 = vpop.f32.mrb[54].mxu1  ;;  %v4565_v51 = vadd.f32 %v4564_v44, %v4563_v13  ;;  %v8866_v13 = vld [vmem:[#allocation48_spill] sm:$0xff]  ;;  %v8867_v44 = vld [vmem:[#allocation47_spill] sm:$0xff] }
 0x499   : > { %v4628_v57 = vpop.f32.mrb[55].mxu1 }
 0x49a   : > { %v2323_v58 = vadd.f32 %v4626_v32, %v2226_v49  ;;  %v2229_v2 = vadd.f32 %v4565_v51, %v7299_v14  ;;  %v4629_v11 = vadd.f32 %v4628_v57, %v4627_v35  ;;  %v4986_v32 = vld [vmem:[%s6176_s21] ss:$16 sps:$4 sm:$0xff]   ;;  %v4989_v35 = vld [vmem:[%s6176_s21 + $0x8] ss:$16 sps:$4 sm:$0xff]   ;;  %v4991_v51 = vld [vmem:[%s6176_s21 + $0xc] ss:$16 sps:$4 sm:$0xff]  }
 0x49b   : > { %v4994_v57 = vld [vmem:[%s6176_s21 + $0x24] ss:$16 sps:$4 sm:$0xff]   ;;  %2872 = vmatprep.subr.bf16.mxu1 %v4991_v51  ;;  %v5031_v51 = vld [vmem:[%s6176_s21 + $0xe8] ss:$16 sps:$4 sm:$0xff]  }
 0x49c   : > { %v2326_v61 = vadd.f32 %v4629_v11, %v2229_v2  ;;  %v7354_v27 = vadd.f32 %v2323_v58, %v8862_v1  ;;  %v4997_v2 = vld [vmem:[%s6176_s21 + $0x2c] ss:$16 sps:$4 sm:$0xff]   ;;  %2873 = vmatpush1.bf16.msra.mxu1 %v4989_v35 }
 0x49d   : > { %2874 = vmatprep.subr.bf16.mxu1 %v4997_v2 }
 0x49e   : > { %2381 = vadd.xlane.f32.xlu0 %v7354_v27  ;;  %v7358_v30 = vadd.f32 %v2326_v61, %v8863_v17  ;;  %v4992_v61 = vld [vmem:[%s6176_s21 + $0x20] ss:$16 sps:$4 sm:$0xff]   ;;  %v4995_v17 = vld [vmem:[%s6176_s21 + $0x28] ss:$16 sps:$4 sm:$0xff]  }
 0x4a0   : > { %2383 = vadd.xlane.f32.xlu1 %v7358_v30  ;;  %v4566_v12 = vpop.f32.mrb[56].mxu0  ;;  %2875 = vmatpush1.bf16.msra.mxu1 %v4995_v17 }
 0x4a1   : > { %v4567_v63 = vpop.f32.mrb[57].mxu0 }
 0x4a2   : > { %v4568_v47 = vadd.f32 %v4567_v63, %v4566_v12  ;;  %v4569_v59 = vpop.f32.mrb[58].mxu0  ;;  %v5000_v12 = vld [vmem:[%s6176_s21 + $0x44] ss:$16 sps:$4 sm:$0xff]  }
 0x4a3   : > { %v4570_v28 = vpop.f32.mrb[59].mxu0 }
 0x4a4   : > { %v4630_v38 = vpop.f32.mrb[56].mxu1  ;;  %v2234_v8 = vadd.f32 %v4568_v47, %v7299_v14  ;;  %v4571_v43 = vadd.f32 %v4570_v28, %v4569_v59  ;;  %v5003_v59 = vld [vmem:[%s6176_s21 + $0x4c] ss:$16 sps:$4 sm:$0xff]  }
 0x4a5   : > { %v4631_v33 = vpop.f32.mrb[57].mxu1  ;;  %2876 = vmatprep.subr.bf16.mxu1 %v5003_v59 }
 0x4a6   : > { %v4632_v31 = vadd.f32 %v4631_v33, %v4630_v38  ;;  %v4633_v54 = vpop.f32.mrb[58].mxu1  ;;  %v2237_v40 = vadd.f32 %v4571_v43, %v7299_v14  ;;  %v5001_v43 = vld [vmem:[%s6176_s21 + $0x48] ss:$16 sps:$4 sm:$0xff]  }
 0x4a7   : > { %v4634_v62 = vpop.f32.mrb[59].mxu1  ;;  %2877 = vmatpush1.bf16.msra.mxu1 %v5001_v43 }
 0x4a8   : > { %v2331_v20 = vadd.f32 %v4632_v31, %v2234_v8  ;;  %v4635_v21 = vadd.f32 %v4634_v62, %v4633_v54  ;;  %v4998_v8 = vld [vmem:[%s6176_s21 + $0x40] ss:$16 sps:$4 sm:$0xff]   ;;  %v5007_v54 = vld [vmem:[%s6176_s21 + $0x68] ss:$16 sps:$4 sm:$0xff]   ;;  %v5015_v62 = vld [vmem:[%s6176_s21 + $0x8c] ss:$16 sps:$4 sm:$0xff]  }
 0x4a9   : > { %v5004_v31 = vld [vmem:[%s6176_s21 + $0x60] ss:$16 sps:$4 sm:$0xff]  }
 0x4aa   : > { %v2334_v52 = vadd.f32 %v4635_v21, %v2237_v40  ;;  %v7364_v23 = vadd.f32 %v2331_v20, %v8864_v26  ;;  %v5012_v40 = vld [vmem:[%s6176_s21 + $0x84] ss:$16 sps:$4 sm:$0xff]   ;;  %v5010_v20 = vld [vmem:[%s6176_s21 + $0x80] ss:$16 sps:$4 sm:$0xff]   ;;  %v5013_v21 = vld [vmem:[%s6176_s21 + $0x88] ss:$16 sps:$4 sm:$0xff]  }
 0x4ab   : > { %v5021_v26 = vld [vmem:[%s6176_s21 + $0xac] ss:$16 sps:$4 sm:$0xff]  }
 0x4ac   : > { %2385 = vadd.xlane.f32.xlu0 %v7364_v23  ;;  %v7368_v50 = vadd.f32 %v2334_v52, %v8865_v16  ;;  %v5018_v52 = vld [vmem:[%s6176_s21 + $0xa4] ss:$16 sps:$4 sm:$0xff]   ;;  %v5016_v16 = vld [vmem:[%s6176_s21 + $0xa0] ss:$16 sps:$4 sm:$0xff]  }
 0x4ae   : > { %v4572_v7 = vpop.f32.mrb[60].mxu0  ;;  %2387 = vadd.xlane.f32.xlu1 %v7368_v50 }
 0x4af   : > { %v4573_v22 = vpop.f32.mrb[61].mxu0 }
 0x4b0   : > { %v4574_v9 = vadd.f32 %v4573_v22, %v4572_v7  ;;  %v4575_v55 = vpop.f32.mrb[62].mxu0  ;;  %v5019_v7 = vld [vmem:[%s6176_s21 + $0xa8] ss:$16 sps:$4 sm:$0xff]  }
 0x4b1   : > { %v4576_v39 = vpop.f32.mrb[63].mxu0  ;;  %v4636_v56 = vpop.f32.mrb[60].mxu1 }
 0x4b2   : > { %v2242_v18 = vadd.f32 %v4574_v9, %v7299_v14  ;;  %v4577_v46 = vadd.f32 %v4576_v39, %v4575_v55  ;;  %v4637_v25 = vpop.f32.mrb[61].mxu1 }
 0x4b3   : > { %v4638_v4 = vadd.f32 %v4637_v25, %v4636_v56  ;;  %v4639_v48 = vpop.f32.mrb[62].mxu1 }
 0x4b4   : > { %v2245_v15 = vadd.f32 %v4577_v46, %v7299_v14  ;;  %v4640_v5 = vpop.f32.mrb[63].mxu1  ;;  %v4988_v14 = vld [vmem:[%s6176_s21 + $0x4] ss:$16 sps:$4 sm:$0xff]  }
 0x4b5   : > { %v2339_v24 = vadd.f32 %v4638_v4, %v2242_v18  ;;  %v4641_v19 = vadd.f32 %v4640_v5, %v4639_v48  ;;  %2759 = vmatprep.subr.bf16.mxu0 %v4988_v14  ;;  %v5022_v4 = vld [vmem:[%s6176_s21 + $0xc0] ss:$16 sps:$4 sm:$0xff]   ;;  %v5024_v48 = vld [vmem:[%s6176_s21 + $0xc4] ss:$16 sps:$4 sm:$0xff]   ;;  %v5027_v5 = vld [vmem:[%s6176_s21 + $0xcc] ss:$16 sps:$4 sm:$0xff]  }
 0x4b6   : > { %2760 = vmatpush1.bf16.msra.mxu0 %v4986_v32  ;;  %v5028_v32 = vld [vmem:[%s6176_s21 + $0xe0] ss:$16 sps:$4 sm:$0xff]   ;;  %v5030_v14 = vld [vmem:[%s6176_s21 + $0xe4] ss:$16 sps:$4 sm:$0xff]  }
 0x4b7   : > { %v2342_v0 = vadd.f32 %v4641_v19, %v2245_v15  ;;  %v7374_v6 = vadd.f32 %v2339_v24, %v8866_v13  ;;  %2761 = vmatprep.subr.bf16.mxu0 %v4994_v57  ;;  %v5025_v15 = vld [vmem:[%s6176_s21 + $0xc8] ss:$16 sps:$4 sm:$0xff]   ;;  %v5033_v57 = vld [vmem:[%s6176_s21 + $0xec] ss:$16 sps:$4 sm:$0xff]  }
 0x4b9   : > { %2389 = vadd.xlane.f32.xlu0 %v7374_v6  ;;  %v7378_v49 = vadd.f32 %v2342_v0, %v8867_v44 }
 0x4ba   : > { %2762 = vmatpush1.bf16.msra.mxu0 %v4992_v61 }
 0x4bb   : > { %2391 = vadd.xlane.f32.xlu1 %v7378_v49  ;;  %2763 = vmatprep.subr.bf16.mxu0 %v5000_v12 }
 0x4be   : > { %2764 = vmatpush1.bf16.msra.mxu0 %v4998_v8 }
 0x4d2   : > { %v2362_v58 = vpop.xlane.xlu0 %2361 }
 0x4d3   : > { %v2393_v11 = vmul.f32 0.0078125, %v2362_v58 }
 0x4d4   : > { %v2364_v1 = vpop.xlane.xlu1 %2363 }
 0x4d5   : > { %v7391_v63 = vsub.f32 %v7304_v45, %v2393_v11  ;;  %v2394_v47 = vmul.f32 0.0078125, %v2364_v1  ;;  %v5006_v45 = vld [vmem:[%s6176_s21 + $0x64] ss:$16 sps:$4 sm:$0xff]  }
 0x4d6   : > { %2765 = vmatprep.subr.bf16.mxu0 %v5006_v45 }
 0x4d7   : > { %v7395_v28 = vsub.f32 %v7308_v41, %v2394_v47  ;;  %v2425_v38 = vmul.f32 %v7391_v63, %v7391_v63  ;;  %v5009_v41 = vld [vmem:[%s6176_s21 + $0x6c] ss:$16 sps:$4 sm:$0xff]   ;;  %2766 = vmatpush1.bf16.msra.mxu0 %v5004_v31 }
 0x4d8   : > { %2878 = vmatprep.subr.bf16.mxu1 %v5009_v41  ;;  %2767 = vmatprep.subr.bf16.mxu0 %v5012_v40 }
 0x4d9   : > { %2441 = vadd.xlane.f32.xlu0 %v2425_v38  ;;  %v2426_v33 = vmul.f32 %v7395_v28, %v7395_v28  ;;  %2879 = vmatpush1.bf16.msra.mxu1 %v5007_v54 }
 0x4da   : > { %2880 = vmatprep.subr.bf16.mxu1 %v5015_v62 }
 0x4db   : > { %2443 = vadd.xlane.f32.xlu1 %v2426_v33  ;;  %2768 = vmatpush1.bf16.msra.mxu0 %v5010_v20 }
 0x4dc   : > { %2769 = vmatprep.subr.bf16.mxu0 %v5018_v52 }
 0x4dd   : > { %2881 = vmatpush1.bf16.msra.mxu1 %v5013_v21 }
 0x4de   : > { %2882 = vmatprep.subr.bf16.mxu1 %v5021_v26 }
 0x4df   : > { %2770 = vmatpush1.bf16.msra.mxu0 %v5016_v16 }
 0x4e0   : > { %2771 = vmatprep.subr.bf16.mxu0 %v5024_v48 }
 0x4e1   : > { %2883 = vmatpush1.bf16.msra.mxu1 %v5019_v7 }
 0x4e2   : > { %2884 = vmatprep.subr.bf16.mxu1 %v5027_v5  ;;  %v5034_v5 = vld [vmem:[%s6178_s0 + $0x40] sm:$0xff]  }
 0x4e3   : > { %2772 = vmatpush1.bf16.msra.mxu0 %v5022_v4 }
 0x4e4   : > { %2773 = vmatprep.subr.bf16.mxu0 %v5030_v14  ;;  %v5035_v14 = vld [vmem:[%s6178_s0] sm:$0xff]  }
 0x4e5   : > { %2885 = vmatpush1.bf16.msra.mxu1 %v5025_v15 }
 0x4e6   : > { %2886 = vmatprep.subr.bf16.mxu1 %v5033_v57  ;;  %v5040_v57 = vld [vmem:[%s6178_s0 + $0xc8] sm:$0xff]  }
 0x4e7   : > { %v2366_v22 = vpop.xlane.xlu0 %2365  ;;  %2774 = vmatpush1.bf16.msra.mxu0 %v5028_v32 }
 0x4e8   : > { %v2395_v9 = vmul.f32 0.0078125, %v2366_v22  ;;  %4642 = vmatprep.subr.bf16.mxu0 %v5034_v5 }
 0x4e9   : > { %v2368_v55 = vpop.xlane.xlu1 %2367  ;;  %2887 = vmatpush1.bf16.msra.mxu1 %v5031_v51  ;;  %v5038_v51 = vld [vmem:[%s6178_s0 + $0x48] sm:$0xff]  }
 0x4ea   : > { %v7416_v39 = vsub.f32 %v7314_v36, %v2395_v9  ;;  %v2396_v56 = vmul.f32 0.0078125, %v2368_v55 }
 0x4ec   : > { %v7419_v18 = vsub.f32 %v7318_v37, %v2396_v56  ;;  %v2427_v46 = vmul.f32 %v7416_v39, %v7416_v39 }
 0x4ee   : > { %2445 = vadd.xlane.f32.xlu0 %v2427_v46  ;;  %v2428_v25 = vmul.f32 %v7419_v18, %v7419_v18 }
 0x4f0   : > { %2447 = vadd.xlane.f32.xlu1 %v2428_v25 }
 0x4fd   : > { %v2370_v36 = vpop.xlane.xlu0 %2369 }
 0x4fe   : > { %v2397_v37 = vmul.f32 0.0078125, %v2370_v36  ;;  %v5036_v36 = vld [vmem:[%s6178_s0 + $0xc0] sm:$0xff]  }
 0x4ff   : > { %v2372_v24 = vpop.xlane.xlu1 %2371  ;;  %4706 = vmatprep.subr.bf16.mxu1 %v5036_v36 }
 0x500   : > { %v7430_v19 = vsub.f32 %v7324_v42, %v2397_v37  ;;  %v2398_v0 = vmul.f32 0.0078125, %v2372_v24 }
 0x502   : > { %v7433_v13 = vsub.f32 %v7328_v3, %v2398_v0  ;;  %v2429_v44 = vmul.f32 %v7430_v19, %v7430_v19 }
 0x504   : > { %2449 = vadd.xlane.f32.xlu0 %v2429_v44  ;;  %v2430_v35 = vmul.f32 %v7433_v13, %v7433_v13 }
 0x506   : > { %2451 = vadd.xlane.f32.xlu1 %v2430_v35  ;;  %v5037_v35 = vld [vmem:[%s6178_s0 + $0x80] sm:$0xff]  }
 0x512   : > { %v2374_v42 = vpop.xlane.xlu0 %2373 }
 0x513   : > { %v2399_v58 = vmul.f32 0.0078125, %v2374_v42 }
 0x514   : > { %v2376_v3 = vpop.xlane.xlu1 %2375 }
 0x515   : > { %v7444_v2 = vsub.f32 %v7334_v34, %v2399_v58  ;;  %v2400_v11 = vmul.f32 0.0078125, %v2376_v3  ;;  %v5041_v3 = vld [vmem:[%s6178_s0 + $0x88] sm:$0xff]  }
 0x517   : > { %v7447_v61 = vsub.f32 %v7338_v29, %v2400_v11  ;;  %v2431_v1 = vmul.f32 %v7444_v2, %v7444_v2 }
 0x519   : > { %2453 = vadd.xlane.f32.xlu0 %v2431_v1  ;;  %v2432_v17 = vmul.f32 %v7447_v61, %v7447_v61 }
 0x51b   : > { %2455 = vadd.xlane.f32.xlu1 %v2432_v17  ;;  %v5042_v17 = vld [vmem:[%s6178_s0 + $0x50] sm:$0xff]  }
 0x51e   : > { %v2378_v12 = vpop.xlane.xlu0 %2377 }
 0x51f   : > { %v2401_v47 = vmul.f32 0.0078125, %v2378_v12  ;;  %v5044_v12 = vld [vmem:[%s6178_s0 + $0xd0] sm:$0xff]  }
 0x520   : > { %v2380_v59 = vpop.xlane.xlu1 %2379 }
 0x521   : > { %v7454_v38 = vsub.f32 %v7344_v53, %v2401_v47  ;;  %v2402_v34 = vmul.f32 0.0078125, %v2380_v59  ;;  %v5043_v59 = vld [vmem:[%s6178_s0 + $0x10] sm:$0xff]  }
 0x523   : > { %v7457_v8 = vsub.f32 %v7348_v10, %v2402_v34  ;;  %v2433_v29 = vmul.f32 %v7454_v38, %v7454_v38  ;;  %v5045_v34 = vld [vmem:[%s6178_s0 + $0x90] sm:$0xff]  }
 0x525   : > { %2457 = vadd.xlane.f32.xlu0 %v2433_v29  ;;  %v2434_v43 = vmul.f32 %v7457_v8, %v7457_v8  ;;  %v5046_v29 = vld [vmem:[%s6178_s0 + $0x58] sm:$0xff]  }
 0x527   : > { %2459 = vadd.xlane.f32.xlu1 %v2434_v43  ;;  %v5048_v43 = vld [vmem:[%s6178_s0 + $0xd8] sm:$0xff]  }
 0x52b   : > { %v2382_v45 = vpop.xlane.xlu0 %2381 }
 0x52c   : > { %v2403_v33 = vmul.f32 0.0078125, %v2382_v45  ;;  %v5047_v45 = vld [vmem:[%s6178_s0 + $0x18] sm:$0xff]  }
 0x52d   : > { %v2384_v41 = vpop.xlane.xlu1 %2383 }
 0x52e   : > { %v7464_v31 = vsub.f32 %v7354_v27, %v2403_v33  ;;  %v2404_v53 = vmul.f32 0.0078125, %v2384_v41  ;;  %v5049_v33 = vld [vmem:[%s6178_s0 + $0x98] sm:$0xff]  }
 0x530   : > { %v7467_v54 = vsub.f32 %v7358_v30, %v2404_v53  ;;  %v2435_v10 = vmul.f32 %v7464_v31, %v7464_v31 }
 0x532   : > { %2461 = vadd.xlane.f32.xlu0 %v2435_v10  ;;  %v2436_v40 = vmul.f32 %v7467_v54, %v7467_v54 }
 0x534   : > { %2463 = vadd.xlane.f32.xlu1 %v2436_v40 }
 0x539   : > { %v2386_v62 = vpop.xlane.xlu0 %2385 }
 0x53a   : > { %v2405_v20 = vmul.f32 0.0078125, %v2386_v62 }
 0x53b   : > { %v2388_v21 = vpop.xlane.xlu1 %2387 }
 0x53c   : > { %v7474_v52 = vsub.f32 %v7364_v23, %v2405_v20  ;;  %v2406_v27 = vmul.f32 0.0078125, %v2388_v21 }
 0x53e   : > { %v7477_v26 = vsub.f32 %v7368_v50, %v2406_v27  ;;  %v2437_v30 = vmul.f32 %v7474_v52, %v7474_v52 }
 0x540   : > { %2465 = vadd.xlane.f32.xlu0 %v2437_v30  ;;  %v2438_v16 = vmul.f32 %v7477_v26, %v7477_v26 }
 0x542   : > { %2467 = vadd.xlane.f32.xlu1 %v2438_v16 }
 0x546   : > { %v2390_v7 = vpop.xlane.xlu0 %2389 }
 0x547   : > { %v2407_v22 = vmul.f32 0.0078125, %v2390_v7 }
 0x548   : > { %v2392_v9 = vpop.xlane.xlu1 %2391 }
 0x549   : > { %v7484_v55 = vsub.f32 %v7374_v6, %v2407_v22  ;;  %v2408_v23 = vmul.f32 0.0078125, %v2392_v9 }
 0x54b   : > { %v7487_v50 = vsub.f32 %v7378_v49, %v2408_v23  ;;  %v2439_v56 = vmul.f32 %v7484_v55, %v7484_v55 }
 0x54d   : > { %2469 = vadd.xlane.f32.xlu0 %v2439_v56  ;;  %v2440_v46 = vmul.f32 %v7487_v50, %v7487_v50 }
 0x54f   : > { %2471 = vadd.xlane.f32.xlu1 %v2440_v46 }
 0x566   : > { %v2442_v25 = vpop.xlane.xlu0 %2441 }
 0x567   : > { %v2473_v4 = vmul.f32 0.0078125, %v2442_v25 }
 0x568   : > { %v2444_v48 = vpop.xlane.xlu1 %2443 }
 0x569   : > { %v2489_v6 = vadd.f32 1e-06, %v2473_v4  ;;  %v2474_v15 = vmul.f32 0.0078125, %v2444_v48 }
 0x56b   : > { %5226 = vrsqrt.f32 %v2489_v6  ;;  %v2490_v49 = vadd.f32 1e-06, %v2474_v15 }
 0x56d   : > { %5228 = vrsqrt.f32 %v2490_v49 }
 0x575   : > { %v5227_v37 = vpop.eup %5226 }
 0x576   : > { %v7496_v0 = vmul.f32 %v5227_v37, %v7391_v63 }
 0x577   : > { %v5229_v24 = vpop.eup %5228 }
 0x578   : > { %8868 = vst [vmem:[#allocation61_spill] sm:$0xff] %v7496_v0  ;;  %v7499_v44 = vmul.f32 %v5229_v24, %v7395_v28  ;;  %v5039_v28 = vld [vmem:[%s6178_s0 + $0x8] sm:$0xff]  }
 0x57a   : > { %8869 = vst [vmem:[#allocation80_spill] sm:$0xff] %v7499_v44  ;;  %v2537_v32 = vpack.c.bf16 %v7499_v44, %v7496_v0 }
 0x57b   : > { %v2446_v42 = vpop.xlane.xlu0 %2445 }
 0x57c   : > { %2792 = vmatmul.mubr.bf16.vlgmr.msra.gmra.mrb[64].mxu0 %v2537_v32  ;;  %2905 = vmatmul.mubr.bf16.vlgmr.msra.gmra.mrb[64].mxu1 %v2537_v32  ;;  %v2475_v58 = vmul.f32 0.0078125, %v2446_v42 }
 0x57d   : > { %2801 = vmatprep.mubr.bf16.mxu0 %v8850_v60  ;;  %2914 = vmatprep.mubr.bf16.mxu1 %v8850_v60  ;;  %v2448_v63 = vpop.xlane.xlu1 %2447 }
 0x57e   : > { %4643 = vmatpush3.bf16.msra.mxu0 %v5035_v14  ;;  %4707 = vmatpush3.bf16.msra.mxu1 %v5037_v35  ;;  %v2491_v11 = vadd.f32 1e-06, %v2475_v58  ;;  %v2476_v1 = vmul.f32 0.0078125, %v2448_v63 }
 0x57f   : > { %4644 = vmatprep.subr.bf16.mxu0 %v5038_v51  ;;  %4708 = vmatprep.subr.bf16.mxu1 %v5040_v57 }
 0x580   : > { %5230 = vrsqrt.f32 %v2491_v11  ;;  %v2492_v47 = vadd.f32 1e-06, %v2476_v1 }
 0x582   : > { %4645 = vmatpush3.bf16.msra.mxu0 %v5039_v28  ;;  %4709 = vmatpush3.bf16.msra.mxu1 %v5041_v3  ;;  %5232 = vrsqrt.f32 %v2492_v47 }
 0x583   : > { %4646 = vmatprep.subr.bf16.mxu0 %v5042_v17  ;;  %4710 = vmatprep.subr.bf16.mxu1 %v5044_v12 }
 0x586   : > { %4647 = vmatpush3.bf16.msra.mxu0 %v5043_v59  ;;  %4711 = vmatpush3.bf16.msra.mxu1 %v5045_v34 }
 0x587   : > { %4648 = vmatprep.subr.bf16.mxu0 %v5046_v29  ;;  %4712 = vmatprep.subr.bf16.mxu1 %v5048_v43 }
 0x58a   : > { %4649 = vmatpush3.bf16.msra.mxu0 %v5047_v45  ;;  %4713 = vmatpush3.bf16.msra.mxu1 %v5049_v33  ;;  %v5231_v41 = vpop.eup %5230 }
 0x58b   : > { %v7520_v10 = vmul.f32 %v5231_v41, %v7416_v39 }
 0x58c   : > { %v5233_v53 = vpop.eup %5232 }
 0x58d   : > { %8870 = vst [vmem:[#allocation56_spill] sm:$0xff] %v7520_v10  ;;  %v7523_v40 = vmul.f32 %v5233_v53, %v7419_v18 }
 0x58f   : > { %8871 = vst [vmem:[#allocation70_spill] sm:$0xff] %v7523_v40  ;;  %v2538_v62 = vpack.c.bf16 %v7523_v40, %v7520_v10 }
 0x591   : > { %v2450_v20 = vpop.xlane.xlu0 %2449  ;;  %2802 = vmatmul.mubr.bf16.gmra.mrb[68].mxu0 %v2538_v62  ;;  %2915 = vmatmul.mubr.bf16.gmra.mrb[68].mxu1 %v2538_v62  ;;  %v5050_v62 = vld [vmem:[%s6178_s0 + $0x60] sm:$0xff]  }
 0x592   : > { %v2477_v21 = vmul.f32 0.0078125, %v2450_v20  ;;  %2811 = vmatprep.mubr.bf16.mxu0 %v8850_v60  ;;  %2924 = vmatprep.mubr.bf16.mxu1 %v8850_v60 }
 0x593   : > { %v2452_v27 = vpop.xlane.xlu1 %2451  ;;  %4650 = vmatprep.subr.bf16.mxu0 %v5050_v62 }
 0x594   : > { %v2493_v30 = vadd.f32 1e-06, %v2477_v21  ;;  %v2478_v16 = vmul.f32 0.0078125, %v2452_v27 }
 0x596   : > { %5234 = vrsqrt.f32 %v2493_v30  ;;  %v2494_v39 = vadd.f32 1e-06, %v2478_v16 }
 0x598   : > { %5236 = vrsqrt.f32 %v2494_v39 }
 0x5a0   : > { %v5235_v7 = vpop.eup %5234 }
 0x5a1   : > { %v7530_v22 = vmul.f32 %v5235_v7, %v7430_v19  ;;  %v5051_v7 = vld [vmem:[%s6178_s0 + $0x20] sm:$0xff]  }
 0x5a2   : > { %v5237_v18 = vpop.eup %5236  ;;  %4651 = vmatpush3.bf16.msra.mxu0 %v5051_v7 }
 0x5a3   : > { %8872 = vst [vmem:[#allocation57_spill] sm:$0xff] %v7530_v22  ;;  %v7533_v9 = vmul.f32 %v5237_v18, %v7433_v13  ;;  %v5052_v18 = vld [vmem:[%s6178_s0 + $0xe0] sm:$0xff]  }
 0x5a4   : > { %4714 = vmatprep.subr.bf16.mxu1 %v5052_v18 }
 0x5a5   : > { %8873 = vst [vmem:[#allocation71_spill] sm:$0xff] %v7533_v9  ;;  %v2539_v23 = vpack.c.bf16 %v7533_v9, %v7530_v22 }
 0x5a6   : > { %v2454_v56 = vpop.xlane.xlu0 %2453 }
 0x5a7   : > { %v2479_v46 = vmul.f32 0.0078125, %v2454_v56  ;;  %2812 = vmatmul.mubr.bf16.gmra.mrb[72].mxu0 %v2539_v23  ;;  %2925 = vmatmul.mubr.bf16.gmra.mrb[72].mxu1 %v2539_v23  ;;  %v5053_v23 = vld [vmem:[%s6178_s0 + $0xa0] sm:$0xff]  }
 0x5a8   : > { %v2456_v25 = vpop.xlane.xlu1 %2455  ;;  %2821 = vmatprep.mubr.bf16.mxu0 %v8850_v60  ;;  %2934 = vmatprep.mubr.bf16.mxu1 %v8850_v60 }
 0x5a9   : > { %v2495_v4 = vadd.f32 1e-06, %v2479_v46  ;;  %v2480_v48 = vmul.f32 0.0078125, %v2456_v25  ;;  %4715 = vmatpush3.bf16.msra.mxu1 %v5053_v23 }
 0x5ab   : > { %5238 = vrsqrt.f32 %v2495_v4  ;;  %v2496_v19 = vadd.f32 1e-06, %v2480_v48  ;;  %v5054_v4 = vld [vmem:[%s6178_s0 + $0x68] sm:$0xff]  }
 0x5ac   : > { %v5055_v48 = vld [vmem:[%s6178_s0 + $0x28] sm:$0xff]   ;;  %4652 = vmatprep.subr.bf16.mxu0 %v5054_v4 }
 0x5ad   : > { %5240 = vrsqrt.f32 %v2496_v19  ;;  %4653 = vmatpush3.bf16.msra.mxu0 %v5055_v48 }
 0x5b2   : > { %v2458_v6 = vpop.xlane.xlu0 %2457 }
 0x5b3   : > { %v2481_v13 = vmul.f32 0.0078125, %v2458_v6  ;;  %v5057_v6 = vld [vmem:[%s6178_s0 + $0xa8] sm:$0xff]  }
 0x5b4   : > { %v2460_v49 = vpop.xlane.xlu1 %2459 }
 0x5b5   : > { %v5239_v15 = vpop.eup %5238  ;;  %v2497_v5 = vadd.f32 1e-06, %v2481_v13  ;;  %v2482_v36 = vmul.f32 0.0078125, %v2460_v49  ;;  %v5060_v13 = vld [vmem:[%s6178_s0 + $0xf0] sm:$0xff]   ;;  %v5062_v49 = vld [vmem:[%s6178_s0 + $0x78] sm:$0xff]  }
 0x5b6   : > { %v7540_v32 = vmul.f32 %v5239_v15, %v7444_v2  ;;  %v5061_v15 = vld [vmem:[%s6178_s0 + $0xb0] sm:$0xff]  }
 0x5b7   : > { %v5241_v37 = vpop.eup %5240  ;;  %5242 = vrsqrt.f32 %v2497_v5  ;;  %v2498_v24 = vadd.f32 1e-06, %v2482_v36  ;;  %v5063_v5 = vld [vmem:[%s6178_s0 + $0x38] sm:$0xff]  }
 0x5b8   : > { %8874 = vst [vmem:[#allocation81_spill] sm:$0xff] %v7540_v32  ;;  %v7543_v14 = vmul.f32 %v5241_v37, %v7447_v61  ;;  %v5064_v36 = vld [vmem:[%s6178_s0 + $0xf8] sm:$0xff]  }
 0x5b9   : > { %5244 = vrsqrt.f32 %v2498_v24  ;;  %v5065_v37 = vld [vmem:[%s6178_s0 + $0xb8] sm:$0xff]  }
 0x5ba   : > { %8875 = vst [vmem:[#allocation67_spill] sm:$0xff] %v7543_v14  ;;  %v2540_v35 = vpack.c.bf16 %v7543_v14, %v7540_v32  ;;  %v2577_v24 = vld [vmem:[%s6196_s28] sm:$0xf] }
 0x5bc   : > { %2822 = vmatmul.mubr.bf16.gmra.mrb[76].mxu0 %v2540_v35  ;;  %2935 = vmatmul.mubr.bf16.gmra.mrb[76].mxu1 %v2540_v35  ;;  %v8884_v35 = vld [vmem:[#allocation49_spill] sm:$0xff] }
 0x5bd   : > { %2831 = vmatprep.mubr.bf16.mxu0 %v8850_v60  ;;  %2944 = vmatprep.mubr.bf16.mxu1 %v8850_v60 }
 0x5bf   : > { %v2462_v51 = vpop.xlane.xlu0 %2461 }
 0x5c0   : > { %v2483_v57 = vmul.f32 0.0078125, %v2462_v51  ;;  %v8885_v51 = vsub.s32 0, %v8884_v35 }
 0x5c1   : > { %v2464_v42 = vpop.xlane.xlu1 %2463  ;;  %v5243_v58 = vpop.eup %5242 }
 0x5c2   : > { %v2499_v63 = vadd.f32 1e-06, %v2483_v57  ;;  %v2484_v2 = vmul.f32 0.0078125, %v2464_v42  ;;  %v7550_v3 = vmul.f32 %v5243_v58, %v7454_v38  ;;  %v7606_v57 = vrot.slane %v2577_v24, %v8885_v51 }
 0x5c3   : > { %v5245_v28 = vpop.eup %5244  ;;  %v8886_v42 = vsub.s32 2, %v8884_v35 }
 0x5c4   : > { %5246 = vrsqrt.f32 %v2499_v63  ;;  %v2500_v61 = vadd.f32 1e-06, %v2484_v2  ;;  %8876 = vst [vmem:[#allocation102_spill] sm:$0xff] %v7550_v3  ;;  %v7553_v11 = vmul.f32 %v5245_v28, %v7457_v8  ;;  %v8887_v63 = vsub.s32 1, %v8884_v35 }
 0x5c5   : > { %v7610_v58 = vrot.slane %v2577_v24, %v8886_v42  ;;  %v8888_v28 = vsub.s32 3, %v8884_v35 }
 0x5c6   : > { %8877 = vst [vmem:[#allocation103_spill] sm:$0xff] %v7553_v11  ;;  %5248 = vrsqrt.f32 %v2500_v61  ;;  %v2541_v1 = vpack.c.bf16 %v7553_v11, %v7550_v3  ;;  %v7614_v2 = vrot.slane %v2577_v24, %v8887_v63 }
 0x5c7   : > { %v7618_v61 = vrot.slane %v2577_v24, %v8888_v28 }
 0x5c8   : > { %2832 = vmatmul.mubr.bf16.gmra.mrb[80].mxu0 %v2541_v1  ;;  %2945 = vmatmul.mubr.bf16.gmra.mrb[80].mxu1 %v2541_v1 }
 0x5c9   : > { %2841 = vmatprep.mubr.bf16.mxu0 %v8850_v60  ;;  %2954 = vmatprep.mubr.bf16.mxu1 %v8850_v60 }
 0x5cd   : > { %v2466_v12 = vpop.xlane.xlu0 %2465 }
 0x5ce   : > { %v5247_v17 = vpop.eup %5246  ;;  %v2485_v47 = vmul.f32 0.0078125, %v2466_v12 }
 0x5cf   : > { %v2468_v34 = vpop.xlane.xlu1 %2467  ;;  %v7560_v8 = vmul.f32 %v5247_v17, %v7464_v31 }
 0x5d0   : > { %v5249_v59 = vpop.eup %5248  ;;  %v2501_v38 = vadd.f32 1e-06, %v2485_v47  ;;  %v2486_v29 = vmul.f32 0.0078125, %v2468_v34 }
 0x5d1   : > { %8878 = vst [vmem:[#allocation104_spill] sm:$0xff] %v7560_v8  ;;  %v7563_v43 = vmul.f32 %v5249_v59, %v7467_v54 }
 0x5d2   : > { %5250 = vrsqrt.f32 %v2501_v38  ;;  %v2502_v45 = vadd.f32 1e-06, %v2486_v29 }
 0x5d3   : > { %8879 = vst [vmem:[#allocation69_spill] sm:$0xff] %v7563_v43  ;;  %v2542_v33 = vpack.c.bf16 %v7563_v43, %v7560_v8 }
 0x5d4   : > { %5252 = vrsqrt.f32 %v2502_v45 }
 0x5d5   : > { %2842 = vmatmul.mubr.bf16.gmra.mrb[84].mxu0 %v2542_v33  ;;  %2955 = vmatmul.mubr.bf16.gmra.mrb[84].mxu1 %v2542_v33 }
 0x5d6   : > { %2851 = vmatprep.mubr.bf16.mxu0 %v8850_v60  ;;  %2964 = vmatprep.mubr.bf16.mxu1 %v8850_v60 }
 0x5da   : > { %v2470_v31 = vpop.xlane.xlu0 %2469 }
 0x5db   : > { %v2487_v41 = vmul.f32 0.0078125, %v2470_v31 }
 0x5dc   : > { %v5251_v53 = vpop.eup %5250  ;;  %v2472_v54 = vpop.xlane.xlu1 %2471 }
 0x5dd   : > { %v2503_v20 = vadd.f32 1e-06, %v2487_v41  ;;  %v2488_v21 = vmul.f32 0.0078125, %v2472_v54  ;;  %v7571_v16 = vmul.f32 %v5251_v53, %v7474_v52 }
 0x5de   : > { %v5253_v27 = vpop.eup %5252 }
 0x5df   : > { %5254 = vrsqrt.f32 %v2503_v20  ;;  %v2504_v30 = vadd.f32 1e-06, %v2488_v21  ;;  %8880 = vst [vmem:[#allocation85_spill] sm:$0xff] %v7571_v16  ;;  %v7574_v39 = vmul.f32 %v5253_v27, %v7477_v26 }
 0x5e1   : > { %8881 = vst [vmem:[#allocation76_spill] sm:$0xff] %v7574_v39  ;;  %5256 = vrsqrt.f32 %v2504_v30  ;;  %v2543_v56 = vpack.c.bf16 %v7574_v39, %v7571_v16 }
 0x5e3   : > { %2852 = vmatmul.mubr.bf16.gmra.mrb[88].mxu0 %v2543_v56  ;;  %2965 = vmatmul.mubr.bf16.gmra.mrb[88].mxu1 %v2543_v56 }
 0x5e4   : > { %2861 = vmatprep.mubr.bf16.mxu0 %v8850_v60  ;;  %2974 = vmatprep.mubr.bf16.mxu1 %v8850_v60  ;;  %v5056_v60 = vld [vmem:[%s6178_s0 + $0xe8] sm:$0xff]  }
 0x5e5   : > { %4716 = vmatprep.subr.bf16.mxu1 %v5056_v60 }
 0x5e6   : > { %4717 = vmatpush3.bf16.msra.mxu1 %v5057_v6 }
 0x5e7   : > { %4718 = vmatprep.subr.bf16.mxu1 %v5060_v13 }
 0x5e9   : > { %v5255_v52 = vpop.eup %5254 }
 0x5ea   : > { %v7584_v46 = vmul.f32 %v5255_v52, %v7484_v55  ;;  %v5058_v55 = vld [vmem:[%s6178_s0 + $0x70] sm:$0xff]   ;;  %4719 = vmatpush3.bf16.msra.mxu1 %v5061_v15 }
 0x5eb   : > { %v5257_v26 = vpop.eup %5256  ;;  %4654 = vmatprep.subr.bf16.mxu0 %v5058_v55  ;;  %4720 = vmatprep.subr.bf16.mxu1 %v5064_v36 }
 0x5ec   : > { %8882 = vst [vmem:[#allocation90_spill] sm:$0xff] %v7584_v46  ;;  %v7587_v25 = vmul.f32 %v5257_v26, %v7487_v50  ;;  %v5059_v50 = vld [vmem:[%s6178_s0 + $0x30] sm:$0xff]  }
 0x5ed   : > { %4655 = vmatpush3.bf16.msra.mxu0 %v5059_v50 }
 0x5ee   : > { %8883 = vst [vmem:[#allocation73_spill] sm:$0xff] %v7587_v25  ;;  %v2544_v19 = vpack.c.bf16 %v7587_v25, %v7584_v46  ;;  %4656 = vmatprep.subr.bf16.mxu0 %v5062_v49  ;;  %4721 = vmatpush3.bf16.msra.mxu1 %v5065_v37 }
 0x5f0   : > { %2862 = vmatmul.mubr.bf16.gmra.mrb[92].mxu0 %v2544_v19  ;;  %2975 = vmatmul.mubr.bf16.gmra.mrb[92].mxu1 %v2544_v19 }
 0x5f1   : > { %4657 = vmatpush3.bf16.msra.mxu0 %v5063_v5 }
 0x64f   : > { %v2793_v1 = vpop.f32.mrb[64].mxu0  ;;  %v2906_v17 = vpop.f32.mrb[64].mxu1 }
 0x650   : > { %v7621_v12 = vadd.f32 %v2793_v1, %v7606_v57  ;;  %v7624_v47 = vadd.f32 %v2906_v17, %v7610_v58  ;;  %v2795_v59 = vpop.f32.mrb[65].mxu0  ;;  %v2908_v34 = vpop.f32.mrb[65].mxu1 }
 0x651   : > { %v7627_v38 = vadd.f32 %v2795_v59, %v7614_v2  ;;  %v7630_v29 = vadd.f32 %v2908_v34, %v7618_v61  ;;  %v2797_v45 = vpop.f32.mrb[66].mxu0  ;;  %v2910_v33 = vpop.f32.mrb[66].mxu1 }
 0x652   : > { %v3049_v31 = vmul.f32 0.044715, %v7621_v12  ;;  %v3051_v41 = vmul.f32 0.044715, %v7624_v47  ;;  %v2798_v62 = vadd.f32 %v2797_v45, %v7606_v57  ;;  %v2911_v20 = vadd.f32 %v2910_v33, %v7610_v58  ;;  %v2799_v21 = vpop.f32.mrb[67].mxu0  ;;  %v2912_v27 = vpop.f32.mrb[67].mxu1 }
 0x653   : > { %v3050_v53 = vmul.f32 0.044715, %v7627_v38  ;;  %v3052_v54 = vmul.f32 0.044715, %v7630_v29  ;;  %v7641_v18 = vadd.f32 %v2799_v21, %v7614_v2  ;;  %v7644_v23 = vadd.f32 %v2912_v27, %v7618_v61 }
 0x654   : > { %v3113_v30 = vmul.f32 %v3049_v31, %v7621_v12  ;;  %v3115_v7 = vmul.f32 %v3051_v41, %v7624_v47  ;;  %v3053_v26 = vmul.f32 0.044715, %v2798_v62  ;;  %v3055_v19 = vmul.f32 0.044715, %v2911_v20 }
 0x655   : > { %v3114_v56 = vmul.f32 %v3050_v53, %v7627_v38  ;;  %v3116_v52 = vmul.f32 %v3052_v54, %v7630_v29  ;;  %v3054_v55 = vmul.f32 0.044715, %v7641_v18  ;;  %v3056_v49 = vmul.f32 0.044715, %v7644_v23 }
 0x656   : > { %v3177_v4 = vmul.f32 %v3113_v30, %v7621_v12  ;;  %v3179_v48 = vmul.f32 %v3115_v7, %v7624_v47  ;;  %v3117_v6 = vmul.f32 %v3053_v26, %v2798_v62  ;;  %v3119_v15 = vmul.f32 %v3055_v19, %v2911_v20 }
 0x657   : > { %v3178_v60 = vmul.f32 %v3114_v56, %v7627_v38  ;;  %v3180_v5 = vmul.f32 %v3116_v52, %v7630_v29  ;;  %v3118_v37 = vmul.f32 %v3054_v55, %v7641_v18  ;;  %v3120_v42 = vmul.f32 %v3056_v49, %v7644_v23 }
 0x658   : > { %v3241_v50 = vadd.f32 %v3177_v4, %v7621_v12  ;;  %v3243_v13 = vadd.f32 %v3179_v48, %v7624_v47  ;;  %v3181_v36 = vmul.f32 %v3117_v6, %v2798_v62  ;;  %v3183_v51 = vmul.f32 %v3119_v15, %v2911_v20 }
 0x659   : > { %v3182_v28 = vmul.f32 %v3118_v37, %v7641_v18  ;;  %v3242_v1 = vadd.f32 %v3178_v60, %v7627_v38  ;;  %v3184_v59 = vmul.f32 %v3120_v42, %v7644_v23  ;;  %v3244_v41 = vadd.f32 %v3180_v5, %v7630_v29 }
 0x65a   : > { %v3305_v24 = vmul.f32 0.7978846, %v3241_v50  ;;  %v3307_v35 = vmul.f32 0.7978846, %v3243_v13  ;;  %v3245_v63 = vadd.f32 %v3181_v36, %v2798_v62  ;;  %v3247_v17 = vadd.f32 %v3183_v51, %v2911_v20 }
 0x65b   : > { %v3246_v45 = vadd.f32 %v3182_v28, %v7641_v18  ;;  %v3306_v33 = vmul.f32 0.7978846, %v3242_v1  ;;  %v3248_v53 = vadd.f32 %v3184_v59, %v7644_v23  ;;  %v3308_v21 = vmul.f32 0.7978846, %v3244_v41 }
 0x65c   : > { %5258 = vtanh.f32 %v3305_v24  ;;  %v3309_v34 = vmul.f32 0.7978846, %v3245_v63  ;;  %v3311_v31 = vmul.f32 0.7978846, %v3247_v17  ;;  %v7665_v56 = vmul.f32 0.5, %v7621_v12 }
 0x65d   : > { %5260 = vtanh.f32 %v3307_v35  ;;  %v3310_v54 = vmul.f32 0.7978846, %v3246_v45  ;;  %v3312_v27 = vmul.f32 0.7978846, %v3248_v53  ;;  %v7668_v52 = vmul.f32 0.5, %v7624_v47 }
 0x65e   : > { %5262 = vtanh.f32 %v3309_v34  ;;  %v2989_v6 = vmul.f32 0.5, %v2798_v62  ;;  %v2991_v55 = vmul.f32 0.5, %v2911_v20  ;;  %v2986_v59 = vmul.f32 0.5, %v7627_v38 }
 0x65f   : > { %5264 = vtanh.f32 %v3311_v31  ;;  %v2990_v34 = vmul.f32 0.5, %v7641_v18 }
 0x660   : > { %5266 = vtanh.f32 %v3306_v33 }
 0x661   : > { %5268 = vtanh.f32 %v3310_v54 }
 0x662   : > { %5270 = vtanh.f32 %v3308_v21 }
 0x663   : > { %5272 = vtanh.f32 %v3312_v27  ;;  %v2988_v27 = vmul.f32 0.5, %v7630_v29 }
 0x664   : > { %v2803_v30 = vpop.f32.mrb[68].mxu0  ;;  %v2916_v7 = vpop.f32.mrb[68].mxu1 }
 0x665   : > { %v7671_v26 = vadd.f32 %v2803_v30, %v7606_v57  ;;  %v7674_v4 = vadd.f32 %v2916_v7, %v7610_v58  ;;  %v2805_v48 = vpop.f32.mrb[69].mxu0  ;;  %v2918_v19 = vpop.f32.mrb[69].mxu1  ;;  %v2992_v30 = vmul.f32 0.5, %v7644_v23 }
 0x666   : > { %v5259_v60 = vpop.eup %5258  ;;  %v7677_v50 = vadd.f32 %v2805_v48, %v7614_v2  ;;  %v7680_v12 = vadd.f32 %v2918_v19, %v7618_v61  ;;  %v2807_v13 = vpop.f32.mrb[70].mxu0 }
 0x667   : > { %v2920_v47 = vpop.f32.mrb[70].mxu1  ;;  %v5261_v15 = vpop.eup %5260  ;;  %v3057_v49 = vmul.f32 0.044715, %v7671_v26  ;;  %v3059_v5 = vmul.f32 0.044715, %v7674_v4  ;;  %v7685_v36 = vadd.f32 %v2807_v13, %v7606_v57  ;;  %v3433_v7 = vadd.f32 1.0, %v5259_v60 }
 0x668   : > { %v7688_v37 = vadd.f32 %v2920_v47, %v7610_v58  ;;  %v2809_v62 = vpop.f32.mrb[71].mxu0  ;;  %v2922_v20 = vpop.f32.mrb[71].mxu1  ;;  %v3058_v35 = vmul.f32 0.044715, %v7677_v50  ;;  %v3060_v51 = vmul.f32 0.044715, %v7680_v12 }
 0x669   : > { %v5263_v24 = vpop.eup %5262  ;;  %v7693_v42 = vadd.f32 %v2809_v62, %v7614_v2  ;;  %v7696_v63 = vadd.f32 %v2922_v20, %v7618_v61  ;;  %v3121_v1 = vmul.f32 %v3057_v49, %v7671_v26  ;;  %v3061_v17 = vmul.f32 0.044715, %v7685_v36 }
 0x66a   : > { %v5265_v28 = vpop.eup %5264  ;;  %v3122_v33 = vmul.f32 %v3058_v35, %v7677_v50  ;;  %v3124_v31 = vmul.f32 %v3060_v51, %v7680_v12  ;;  %v3123_v21 = vmul.f32 %v3059_v5, %v7674_v4  ;;  %v3063_v48 = vmul.f32 0.044715, %v7688_v37 }
 0x66b   : > { %v5267_v45 = vpop.eup %5266  ;;  %v3062_v41 = vmul.f32 0.044715, %v7693_v42  ;;  %v3064_v53 = vmul.f32 0.044715, %v7696_v63  ;;  %v3185_v18 = vmul.f32 %v3121_v1, %v7671_v26  ;;  %v3125_v62 = vmul.f32 %v3061_v17, %v7685_v36 }
 0x66c   : > { %v5269_v54 = vpop.eup %5268  ;;  %v3186_v49 = vmul.f32 %v3122_v33, %v7677_v50  ;;  %v3434_v5 = vadd.f32 1.0, %v5267_v45  ;;  %v3188_v29 = vmul.f32 %v3124_v31, %v7680_v12  ;;  %v3435_v39 = vadd.f32 1.0, %v5261_v15 }
 0x66d   : > { %v5271_v38 = vpop.eup %5270  ;;  %v3126_v19 = vmul.f32 %v3062_v41, %v7693_v42  ;;  %v3128_v13 = vmul.f32 %v3064_v53, %v7696_v63  ;;  %v3438_v20 = vadd.f32 1.0, %v5269_v54  ;;  %v3437_v41 = vadd.f32 1.0, %v5263_v24 }
 0x66e   : > { %v5273_v47 = vpop.eup %5272  ;;  %v3436_v60 = vadd.f32 1.0, %v5271_v38  ;;  %v3498_v1 = vmul.f32 %v3434_v5, %v2986_v59  ;;  %v3439_v16 = vadd.f32 1.0, %v5265_v28  ;;  %v3189_v33 = vmul.f32 %v3125_v62, %v7685_v36 }
 0x66f   : > { %v3190_v23 = vmul.f32 %v3126_v19, %v7693_v42  ;;  %v3440_v35 = vadd.f32 1.0, %v5273_v47  ;;  %v3192_v51 = vmul.f32 %v3128_v13, %v7696_v63  ;;  %v3502_v25 = vmul.f32 %v3438_v20, %v2990_v34 }
 0x670   : > { %v3500_v46 = vmul.f32 %v3436_v60, %v2988_v27  ;;  %v3497_v45 = vmul.f32 %v3433_v7, %v7665_v56  ;;  %v3501_v54 = vmul.f32 %v3437_v41, %v2989_v6  ;;  %v3499_v19 = vmul.f32 %v3435_v39, %v7668_v52 }
 0x671   : > { %v3504_v53 = vmul.f32 %v3440_v35, %v2992_v30  ;;  %v3562_v17 = vpack.c.bf16 %v3502_v25, %v3498_v1  ;;  %v3503_v38 = vmul.f32 %v3439_v16, %v2991_v55  ;;  %v3250_v47 = vadd.f32 %v3186_v49, %v7677_v50 }
 0x672   : > { %v3127_v59 = vmul.f32 %v3063_v48, %v7688_v37  ;;  %v3561_v24 = vpack.c.bf16 %v3501_v54, %v3497_v45  ;;  %v3254_v34 = vadd.f32 %v3190_v23, %v7693_v42  ;;  %v3252_v25 = vadd.f32 %v3188_v29, %v7680_v12 }
 0x673   : > { %v3564_v31 = vpack.c.bf16 %v3504_v53, %v3500_v46  ;;  %3888 = vmatprep.mubr.bf16.mxu0 %v3562_v17  ;;  %v3563_v15 = vpack.c.bf16 %v3503_v38, %v3499_v19  ;;  %v3314_v28 = vmul.f32 0.7978846, %v3250_v47  ;;  %v3256_v56 = vadd.f32 %v3192_v51, %v7696_v63 }
 0x674   : > { %v3187_v46 = vmul.f32 %v3123_v21, %v7674_v4  ;;  %3889 = vmatmul.mubr.bf16.vlgmr.msra.gmra.mrb[96].mxu0 %v3561_v24  ;;  %v3318_v39 = vmul.f32 0.7978846, %v3254_v34  ;;  %v3249_v16 = vadd.f32 %v3185_v18, %v7671_v26  ;;  %v3316_v52 = vmul.f32 0.7978846, %v3252_v25 }
 0x675   : > { %3985 = vmatprep.mubr.bf16.mxu1 %v3564_v31  ;;  %5274 = vtanh.f32 %v3314_v28  ;;  %v3320_v6 = vmul.f32 0.7978846, %v3256_v56  ;;  %v3253_v55 = vadd.f32 %v3189_v33, %v7685_v36  ;;  %v3191_v27 = vmul.f32 %v3127_v59, %v7688_v37 }
 0x676   : > { %3986 = vmatmul.mubr.bf16.vlgmr.msra.gmra.mrb[96].mxu1 %v3563_v15  ;;  %5276 = vtanh.f32 %v3318_v39  ;;  %v3313_v30 = vmul.f32 0.7978846, %v3249_v16  ;;  %v2994_v21 = vmul.f32 0.5, %v7677_v50  ;;  %v2998_v49 = vmul.f32 0.5, %v7693_v42 }
 0x677   : > { %5278 = vtanh.f32 %v3316_v52  ;;  %v3317_v7 = vmul.f32 0.7978846, %v3253_v55  ;;  %v3251_v29 = vadd.f32 %v3187_v46, %v7674_v4  ;;  %v3255_v35 = vadd.f32 %v3191_v27, %v7688_v37 }
 0x678   : > { %5280 = vtanh.f32 %v3320_v6  ;;  %v2996_v59 = vmul.f32 0.5, %v7680_v12  ;;  %v3000_v24 = vmul.f32 0.5, %v7696_v63  ;;  %v2993_v46 = vmul.f32 0.5, %v7671_v26 }
 0x679   : > { %5282 = vtanh.f32 %v3313_v30  ;;  %v2997_v39 = vmul.f32 0.5, %v7685_v36  ;;  %v3315_v16 = vmul.f32 0.7978846, %v3251_v29  ;;  %v3319_v52 = vmul.f32 0.7978846, %v3255_v35 }
 0x67a   : > { %v2813_v48 = vpop.f32.mrb[72].mxu0  ;;  %v2926_v13 = vpop.f32.mrb[72].mxu1  ;;  %5284 = vtanh.f32 %v3317_v7 }
 0x67b   : > { %v7733_v18 = vadd.f32 %v2813_v48, %v7606_v57  ;;  %v7736_v62 = vadd.f32 %v2926_v13, %v7610_v58  ;;  %v2815_v5 = vpop.f32.mrb[73].mxu0  ;;  %v2928_v20 = vpop.f32.mrb[73].mxu1  ;;  %5286 = vtanh.f32 %v3315_v16 }
 0x67c   : > { %v7740_v23 = vadd.f32 %v2815_v5, %v7614_v2  ;;  %v7743_v60 = vadd.f32 %v2928_v20, %v7618_v61  ;;  %v2817_v50 = vpop.f32.mrb[74].mxu0  ;;  %v2930_v42 = vpop.f32.mrb[74].mxu1  ;;  %5288 = vtanh.f32 %v3319_v52 }
 0x67d   : > { %v3065_v51 = vmul.f32 0.044715, %v7733_v18  ;;  %v3067_v1 = vmul.f32 0.044715, %v7736_v62  ;;  %v7749_v41 = vadd.f32 %v2817_v50, %v7606_v57  ;;  %v7752_v53 = vadd.f32 %v2930_v42, %v7610_v58  ;;  %v2819_v33 = vpop.f32.mrb[75].mxu0  ;;  %v2932_v17 = vpop.f32.mrb[75].mxu1 }
 0x67e   : > { %v3066_v45 = vmul.f32 0.044715, %v7740_v23  ;;  %v3068_v54 = vmul.f32 0.044715, %v7743_v60  ;;  %v7757_v31 = vadd.f32 %v2819_v33, %v7614_v2  ;;  %v7760_v19 = vadd.f32 %v2932_v17, %v7618_v61 }
 0x67f   : > { %v3129_v38 = vmul.f32 %v3065_v51, %v7733_v18  ;;  %v3069_v47 = vmul.f32 0.044715, %v7749_v41  ;;  %v5275_v56 = vpop.eup %5274  ;;  %v3131_v12 = vmul.f32 %v3067_v1, %v7736_v62  ;;  %v3071_v63 = vmul.f32 0.044715, %v7752_v53 }
 0x680   : > { %v3130_v34 = vmul.f32 %v3066_v45, %v7740_v23  ;;  %v3132_v15 = vmul.f32 %v3068_v54, %v7743_v60  ;;  %v3070_v28 = vmul.f32 0.044715, %v7757_v31  ;;  %v3072_v25 = vmul.f32 0.044715, %v7760_v19  ;;  %v5277_v6 = vpop.eup %5276 }
 0x681   : > { %v5279_v30 = vpop.eup %5278  ;;  %v3193_v7 = vmul.f32 %v3129_v38, %v7733_v18  ;;  %v3442_v13 = vadd.f32 1.0, %v5275_v56  ;;  %v3446_v26 = vadd.f32 1.0, %v5277_v6  ;;  %v3133_v20 = vmul.f32 %v3069_v47, %v7749_v41 }
 0x682   : > { %v3134_v55 = vmul.f32 %v3070_v28, %v7757_v31  ;;  %v3136_v27 = vmul.f32 %v3072_v25, %v7760_v19  ;;  %v3194_v48 = vmul.f32 %v3130_v34, %v7740_v23  ;;  %v5281_v5 = vpop.eup %5280  ;;  %v3196_v36 = vmul.f32 %v3132_v15, %v7743_v60 }
 0x683   : > { %v3444_v50 = vadd.f32 1.0, %v5279_v30  ;;  %v5283_v42 = vpop.eup %5282  ;;  %v3506_v35 = vmul.f32 %v3442_v13, %v2994_v21  ;;  %v3510_v51 = vmul.f32 %v3446_v26, %v2998_v49  ;;  %v3448_v1 = vadd.f32 1.0, %v5281_v5 }
 0x684   : > { %v3198_v29 = vmul.f32 %v3134_v55, %v7757_v31  ;;  %v5285_v33 = vpop.eup %5284  ;;  %v3200_v17 = vmul.f32 %v3136_v27, %v7760_v19  ;;  %v3441_v54 = vadd.f32 1.0, %v5283_v42  ;;  %v3258_v15 = vadd.f32 %v3194_v48, %v7740_v23 }
 0x685   : > { %v3508_v45 = vmul.f32 %v3444_v50, %v2996_v59  ;;  %v3566_v38 = vpack.c.bf16 %v3510_v51, %v3506_v35  ;;  %v3512_v34 = vmul.f32 %v3448_v1, %v3000_v24  ;;  %v3445_v28 = vadd.f32 1.0, %v5285_v33 }
 0x686   : > { %v3197_v47 = vmul.f32 %v3133_v20, %v7749_v41  ;;  %v3135_v25 = vmul.f32 %v3071_v63, %v7752_v53  ;;  %v3505_v56 = vmul.f32 %v3441_v54, %v2993_v46  ;;  %v3262_v21 = vadd.f32 %v3198_v29, %v7757_v31  ;;  %v5287_v20 = vpop.eup %5286 }
 0x687   : > { %3896 = vmatprep.mubr.bf16.mxu0 %v3566_v38  ;;  %v3568_v49 = vpack.c.bf16 %v3512_v34, %v3508_v45  ;;  %v3509_v16 = vmul.f32 %v3445_v28, %v2997_v39  ;;  %v3322_v6 = vmul.f32 0.7978846, %v3258_v15  ;;  %v3260_v59 = vadd.f32 %v3196_v36, %v7743_v60 }
 0x688   : > { %v3326_v55 = vmul.f32 0.7978846, %v3262_v21  ;;  %v3264_v52 = vadd.f32 %v3200_v17, %v7760_v19  ;;  %v3257_v30 = vadd.f32 %v3193_v7, %v7733_v18  ;;  %v3195_v63 = vmul.f32 %v3131_v12, %v7736_v62 }
 0x689   : > { %3993 = vmatprep.mubr.bf16.mxu1 %v3568_v49  ;;  %v3565_v24 = vpack.c.bf16 %v3509_v16, %v3505_v56  ;;  %5290 = vtanh.f32 %v3322_v6  ;;  %v3324_v27 = vmul.f32 0.7978846, %v3260_v59  ;;  %v3261_v48 = vadd.f32 %v3197_v47, %v7749_v41 }
 0x68a   : > { %5292 = vtanh.f32 %v3326_v55  ;;  %v3328_v46 = vmul.f32 0.7978846, %v3264_v52  ;;  %v3199_v39 = vmul.f32 %v3135_v25, %v7752_v53  ;;  %v3321_v13 = vmul.f32 0.7978846, %v3257_v30 }
 0x68b   : > { %3897 = vmatmul.mubr.bf16.gmra.mrb[100].mxu0 %v3565_v24  ;;  %5294 = vtanh.f32 %v3324_v27  ;;  %v2995_v26 = vmul.f32 0.5, %v7674_v4  ;;  %v2999_v5 = vmul.f32 0.5, %v7688_v37  ;;  %v3325_v36 = vmul.f32 0.7978846, %v3261_v48  ;;  %v5289_v4 = vpop.eup %5288 }
 0x68c   : > { %5296 = vtanh.f32 %v3328_v46  ;;  %v7795_v12 = vmul.f32 0.5, %v7740_v23  ;;  %v7798_v50 = vmul.f32 0.5, %v7757_v31  ;;  %v7801_v42 = vmul.f32 0.5, %v7743_v60 }
 0x68d   : > { %v7804_v35 = vmul.f32 0.5, %v7760_v19  ;;  %5298 = vtanh.f32 %v3325_v36  ;;  %v3259_v23 = vadd.f32 %v3195_v63, %v7736_v62  ;;  %v3263_v45 = vadd.f32 %v3199_v39, %v7752_v53 }
 0x68e   : > { %5300 = vtanh.f32 %v3321_v13  ;;  %v3443_v49 = vadd.f32 1.0, %v5287_v20  ;;  %v3447_v59 = vadd.f32 1.0, %v5289_v4  ;;  %v7838_v55 = vmul.f32 0.5, %v7733_v18 }
 0x68f   : > { %v2823_v29 = vpop.f32.mrb[76].mxu0  ;;  %v2936_v7 = vpop.f32.mrb[76].mxu1  ;;  %v7843_v30 = vmul.f32 0.5, %v7749_v41  ;;  %v7846_v63 = vmul.f32 0.5, %v7736_v62  ;;  %v7851_v13 = vmul.f32 0.5, %v7752_v53 }
 0x690   : > { %v7807_v37 = vadd.f32 %v2823_v29, %v7606_v57  ;;  %v7810_v51 = vadd.f32 %v2936_v7, %v7610_v58  ;;  %v2825_v1 = vpop.f32.mrb[77].mxu0  ;;  %v2938_v33 = vpop.f32.mrb[77].mxu1  ;;  %v3323_v18 = vmul.f32 0.7978846, %v3259_v23  ;;  %v3507_v7 = vmul.f32 %v3443_v49, %v2995_v26 }
 0x691   : > { %v7814_v31 = vadd.f32 %v2825_v1, %v7614_v2  ;;  %v7817_v60 = vadd.f32 %v2938_v33, %v7618_v61  ;;  %v2827_v19 = vpop.f32.mrb[78].mxu0  ;;  %v2940_v17 = vpop.f32.mrb[78].mxu1  ;;  %v3327_v41 = vmul.f32 0.7978846, %v3263_v45  ;;  %v3511_v33 = vmul.f32 %v3447_v59, %v2999_v5 }
 0x692   : > { %v3073_v54 = vmul.f32 0.044715, %v7807_v37  ;;  %v3075_v38 = vmul.f32 0.044715, %v7810_v51  ;;  %v7823_v34 = vadd.f32 %v2827_v19, %v7606_v57  ;;  %v7826_v28 = vadd.f32 %v2940_v17, %v7610_v58  ;;  %v2829_v15 = vpop.f32.mrb[79].mxu0  ;;  %v2942_v47 = vpop.f32.mrb[79].mxu1 }
 0x693   : > { %v3074_v25 = vmul.f32 0.044715, %v7814_v31  ;;  %v7830_v56 = vadd.f32 %v2829_v15, %v7614_v2  ;;  %v7833_v21 = vadd.f32 %v2942_v47, %v7618_v61  ;;  %v3076_v6 = vmul.f32 0.044715, %v7817_v60  ;;  %v5291_v52 = vpop.eup %5290 }
 0x694   : > { %v3137_v16 = vmul.f32 %v3073_v54, %v7807_v37  ;;  %v3139_v24 = vmul.f32 %v3075_v38, %v7810_v51  ;;  %v3077_v27 = vmul.f32 0.044715, %v7823_v34  ;;  %v5293_v46 = vpop.eup %5292  ;;  %v3079_v39 = vmul.f32 0.044715, %v7826_v28 }
 0x695   : > { %v3138_v48 = vmul.f32 %v3074_v25, %v7814_v31  ;;  %v5295_v36 = vpop.eup %5294  ;;  %v3078_v20 = vmul.f32 0.044715, %v7830_v56  ;;  %v3080_v29 = vmul.f32 0.044715, %v7833_v21  ;;  %v3140_v1 = vmul.f32 %v3076_v6, %v7817_v60 }
 0x696   : > { %v5297_v4 = vpop.eup %5296  ;;  %v7856_v62 = vmul.f32 %v3137_v16, %v7807_v37  ;;  %v3450_v19 = vadd.f32 1.0, %v5291_v52  ;;  %v7860_v17 = vmul.f32 %v3139_v24, %v7810_v51  ;;  %v3141_v53 = vmul.f32 %v3077_v27, %v7823_v34 }
 0x697   : > { %v3454_v23 = vadd.f32 1.0, %v5293_v46  ;;  %v3452_v54 = vadd.f32 1.0, %v5295_v36  ;;  %v5299_v38 = vpop.eup %5298  ;;  %v3202_v15 = vmul.f32 %v3138_v48, %v7814_v31  ;;  %v3143_v26 = vmul.f32 %v3079_v39, %v7826_v28 }
 0x698   : > { %v3567_v45 = vpack.c.bf16 %v3511_v33, %v3507_v7  ;;  %v3456_v47 = vadd.f32 1.0, %v5297_v4  ;;  %v5301_v25 = vpop.eup %5300  ;;  %v3142_v49 = vmul.f32 %v3078_v20, %v7830_v56  ;;  %v3144_v5 = vmul.f32 %v3080_v29, %v7833_v21 }
 0x699   : > { %v3514_v16 = vmul.f32 %v3450_v19, %v7795_v12  ;;  %v3518_v6 = vmul.f32 %v3454_v23, %v7798_v50  ;;  %v3516_v24 = vmul.f32 %v3452_v54, %v7801_v42  ;;  %v3453_v46 = vadd.f32 1.0, %v5299_v38 }
 0x69a   : > { %3994 = vmatmul.mubr.bf16.gmra.mrb[100].mxu1 %v3567_v45  ;;  %v3520_v27 = vmul.f32 %v3456_v47, %v7804_v35  ;;  %5302 = vtanh.f32 %v3327_v41  ;;  %v3449_v41 = vadd.f32 1.0, %v5301_v25  ;;  %v7997_v22 = vmul.f32 0.5, %v7833_v21 }
 0x69b   : > { %v2833_v59 = vpop.f32.mrb[80].mxu0  ;;  %v2946_v52 = vpop.f32.mrb[80].mxu1  ;;  %v3570_v12 = vpack.c.bf16 %v3518_v6, %v3514_v16  ;;  %5304 = vtanh.f32 %v3323_v18  ;;  %v3204_v16 = vmul.f32 %v3140_v1, %v7817_v60  ;;  %v7901_v6 = vmul.f32 %v3141_v53, %v7823_v34 }
 0x69c   : > { %v7872_v48 = vadd.f32 %v2833_v59, %v7606_v57  ;;  %v7875_v39 = vadd.f32 %v2946_v52, %v7610_v58  ;;  %v2835_v36 = vpop.f32.mrb[81].mxu0  ;;  %v2948_v20 = vpop.f32.mrb[81].mxu1  ;;  %v3572_v7 = vpack.c.bf16 %v3520_v27, %v3516_v24  ;;  %v3517_v52 = vmul.f32 %v3453_v46, %v7843_v30 }
 0x69d   : > { %v7878_v50 = vadd.f32 %v2835_v36, %v7614_v2  ;;  %v7881_v29 = vadd.f32 %v2948_v20, %v7618_v61  ;;  %v2837_v42 = vpop.f32.mrb[82].mxu0  ;;  %v2950_v35 = vpop.f32.mrb[82].mxu1  ;;  %3904 = vmatprep.mubr.bf16.mxu0 %v3570_v12  ;;  %v3206_v24 = vmul.f32 %v3142_v49, %v7830_v56  ;;  %v3513_v53 = vmul.f32 %v3449_v41, %v7838_v55 }
 0x69e   : > { %v3081_v4 = vmul.f32 0.044715, %v7872_v48  ;;  %v3083_v33 = vmul.f32 0.044715, %v7875_v39  ;;  %v7886_v19 = vadd.f32 %v2837_v42, %v7606_v57  ;;  %v7889_v23 = vadd.f32 %v2950_v35, %v7610_v58  ;;  %v2839_v18 = vpop.f32.mrb[83].mxu0  ;;  %v2952_v54 = vpop.f32.mrb[83].mxu1  ;;  %4001 = vmatprep.mubr.bf16.mxu1 %v3572_v7 }
 0x69f   : > { %v3082_v38 = vmul.f32 0.044715, %v7878_v50  ;;  %v3084_v45 = vmul.f32 0.044715, %v7881_v29  ;;  %v7894_v47 = vadd.f32 %v2839_v18, %v7614_v2  ;;  %v7897_v25 = vadd.f32 %v2952_v54, %v7618_v61 }
 0x6a0   : > { %v3085_v59 = vmul.f32 0.044715, %v7886_v19  ;;  %v3145_v27 = vmul.f32 %v3081_v4, %v7872_v48  ;;  %v3147_v36 = vmul.f32 %v3083_v33, %v7875_v39  ;;  %v3087_v20 = vmul.f32 0.044715, %v7889_v23 }
 0x6a1   : > { %v3146_v12 = vmul.f32 %v3082_v38, %v7878_v50  ;;  %v3148_v42 = vmul.f32 %v3084_v45, %v7881_v29  ;;  %v3086_v1 = vmul.f32 0.044715, %v7894_v47  ;;  %v7914_v35 = vmul.f32 %v3143_v26, %v7826_v28 }
 0x6a2   : > { %v3208_v30 = vmul.f32 %v3144_v5, %v7833_v21  ;;  %v3149_v49 = vmul.f32 %v3085_v59, %v7886_v19  ;;  %v3088_v46 = vmul.f32 0.044715, %v7897_v25  ;;  %v3569_v7 = vpack.c.bf16 %v3517_v52, %v3513_v53 }
 0x6a3   : > { %v7920_v4 = vmul.f32 0.5, %v7814_v31  ;;  %v7923_v33 = vmul.f32 0.5, %v7830_v56  ;;  %v3266_v18 = vadd.f32 %v3202_v15, %v7814_v31  ;;  %v7927_v55 = vmul.f32 %v3145_v27, %v7872_v48 }
 0x6a4   : > { %v5303_v54 = vpop.eup %5302  ;;  %v7930_v26 = vmul.f32 %v3147_v36, %v7875_v39  ;;  %v3151_v5 = vmul.f32 %v3087_v20, %v7889_v23  ;;  %v3270_v41 = vadd.f32 %v3206_v24, %v7830_v56  ;;  %v7935_v45 = vmul.f32 %v3146_v12, %v7878_v50  ;;  %3905 = vmatmul.mubr.bf16.gmra.mrb[104].mxu0 %v3569_v7 }
 0x6a5   : > { %v5305_v38 = vpop.eup %5304  ;;  %v7938_v59 = vmul.f32 %v3148_v42, %v7881_v29  ;;  %v3150_v31 = vmul.f32 %v3086_v1, %v7894_v47  ;;  %v3330_v15 = vmul.f32 0.7978846, %v3266_v18  ;;  %v7942_v52 = vmul.f32 %v3149_v49, %v7886_v19 }
 0x6a6   : > { %v3152_v27 = vmul.f32 %v3088_v46, %v7897_v25  ;;  %v3455_v53 = vadd.f32 1.0, %v5303_v54  ;;  %v3334_v56 = vmul.f32 0.7978846, %v3270_v41  ;;  %v3268_v1 = vadd.f32 %v3204_v16, %v7817_v60 }
 0x6a7   : > { %5306 = vtanh.f32 %v3330_v15  ;;  %v3451_v54 = vadd.f32 1.0, %v5305_v38  ;;  %v7978_v14 = vmul.f32 %v3151_v5, %v7889_v23  ;;  %v7984_v9 = vmul.f32 %v3150_v31, %v7894_v47 }
 0x6a8   : > { %v2843_v36 = vpop.f32.mrb[84].mxu0  ;;  %v2956_v20 = vpop.f32.mrb[84].mxu1  ;;  %5308 = vtanh.f32 %v3334_v56  ;;  %v3332_v3 = vmul.f32 0.7978846, %v3268_v1  ;;  %v7994_v1 = vmul.f32 0.5, %v7817_v60 }
 0x6a9   : > { %v7946_v24 = vadd.f32 %v2843_v36, %v7606_v57  ;;  %v7949_v12 = vadd.f32 %v2956_v20, %v7610_v58  ;;  %v2845_v42 = vpop.f32.mrb[85].mxu0  ;;  %v2958_v43 = vpop.f32.mrb[85].mxu1 }
 0x6aa   : > { %v7953_v49 = vadd.f32 %v2845_v42, %v7614_v2  ;;  %v7956_v46 = vadd.f32 %v2958_v43, %v7618_v61  ;;  %v2847_v7 = vpop.f32.mrb[86].mxu0  ;;  %v2960_v18 = vpop.f32.mrb[86].mxu1  ;;  %v3272_v42 = vadd.f32 %v3208_v30, %v7833_v21  ;;  %5310 = vtanh.f32 %v3332_v3 }
 0x6ab   : > { %8889 = vst [vmem:[#allocation86_spill] sm:$0xff] %v7946_v24  ;;  %8890 = vst [vmem:[#allocation77_spill] sm:$0xff] %v7949_v12  ;;  %v3089_v41 = vmul.f32 0.044715, %v7946_v24  ;;  %v7960_v36 = vadd.f32 %v2847_v7, %v7606_v57  ;;  %v7963_v20 = vadd.f32 %v2960_v18, %v7610_v58  ;;  %v2849_v15 = vpop.f32.mrb[87].mxu0  ;;  %v2962_v16 = vpop.f32.mrb[87].mxu1  ;;  %v3519_v18 = vmul.f32 %v3455_v53, %v7851_v13 }
 0x6ac   : > { %v3091_v8 = vmul.f32 0.044715, %v7949_v12  ;;  %v3090_v43 = vmul.f32 0.044715, %v7953_v49  ;;  %v7969_v11 = vadd.f32 %v2849_v15, %v7614_v2  ;;  %v7972_v38 = vadd.f32 %v2962_v16, %v7618_v61 }
 0x6ad   : > { %8891 = vst [vmem:[#allocation93_spill] sm:$0xff] %v7960_v36  ;;  %8892 = vst [vmem:[#allocation105_spill] sm:$0xff] %v7963_v20  ;;  %v3153_v56 = vmul.f32 %v3089_v41, %v7946_v24  ;;  %v3092_v7 = vmul.f32 0.044715, %v7956_v46  ;;  %v3093_v30 = vmul.f32 0.044715, %v7960_v36  ;;  %v7987_v16 = vmul.f32 %v3152_v27, %v7897_v25 }
 0x6ae   : > { %v3095_v32 = vmul.f32 0.044715, %v7963_v20  ;;  %v3094_v15 = vmul.f32 0.044715, %v7969_v11  ;;  %v3096_v41 = vmul.f32 0.044715, %v7972_v38  ;;  %v3515_v13 = vmul.f32 %v3451_v54, %v7846_v63 }
 0x6af   : > { %v3155_v53 = vmul.f32 %v3091_v8, %v7949_v12  ;;  %v3154_v5 = vmul.f32 %v3090_v43, %v7953_v49  ;;  %v8000_v31 = vmul.f32 %v3153_v56, %v7946_v24  ;;  %v3156_v27 = vmul.f32 %v3092_v7, %v7956_v46 }
 0x6b0   : > { %v3571_v40 = vpack.c.bf16 %v3519_v18, %v3515_v13  ;;  %v3336_v10 = vmul.f32 0.7978846, %v3272_v42  ;;  %v3157_v44 = vmul.f32 %v3093_v30, %v7960_v36  ;;  %v3159_v63 = vmul.f32 %v3095_v32, %v7963_v20 }
 0x6b1   : > { %8893 = vst [vmem:[#allocation62_spill] sm:$0xff] %v8000_v31  ;;  %v3158_v8 = vmul.f32 %v3094_v15, %v7969_v11  ;;  %v5307_v54 = vpop.eup %5306  ;;  %v3160_v60 = vmul.f32 %v3096_v41, %v7972_v38  ;;  %v3265_v21 = vadd.f32 %v7856_v62, %v7807_v37  ;;  %v3269_v43 = vadd.f32 %v7901_v6, %v7823_v34 }
 0x6b2   : > { %4002 = vmatmul.mubr.bf16.gmra.mrb[104].mxu1 %v3571_v40  ;;  %5312 = vtanh.f32 %v3336_v10  ;;  %v5309_v56 = vpop.eup %5308  ;;  %v8012_v42 = vmul.f32 %v3155_v53, %v7949_v12  ;;  %v8015_v32 = vmul.f32 %v3154_v5, %v7953_v49  ;;  %v3458_v7 = vadd.f32 1.0, %v5307_v54 }
 0x6b3   : > { %v3267_v3 = vadd.f32 %v7860_v17, %v7810_v51  ;;  %v8020_v40 = vmul.f32 %v3156_v27, %v7956_v46  ;;  %v3462_v10 = vadd.f32 1.0, %v5309_v56  ;;  %v3329_v18 = vmul.f32 0.7978846, %v3265_v21 }
 0x6b4   : > { %8894 = vst [vmem:[#allocation83_spill] sm:$0xff] %v8012_v42  ;;  %v3333_v62 = vmul.f32 0.7978846, %v3269_v43  ;;  %v8023_v30 = vmul.f32 %v3157_v44, %v7960_v36  ;;  %v8026_v6 = vmul.f32 %v3159_v63, %v7963_v20  ;;  %v8029_v15 = vmul.f32 %v3158_v8, %v7969_v11 }
 0x6b5   : > { %v3331_v41 = vmul.f32 0.7978846, %v3267_v3  ;;  %v8032_v13 = vmul.f32 %v3160_v60, %v7972_v38  ;;  %v3522_v5 = vmul.f32 %v3458_v7, %v7920_v4  ;;  %v3526_v27 = vmul.f32 %v3462_v10, %v7923_v33 }
 0x6b6   : > { %8895 = vst [vmem:[#allocation74_spill] sm:$0xff] %v8023_v30  ;;  %8896 = vst [vmem:[#allocation87_spill] sm:$0xff] %v8026_v6  ;;  %v2853_v17 = vpop.f32.mrb[88].mxu0  ;;  %v2966_v53 = vpop.f32.mrb[88].mxu1  ;;  %5314 = vtanh.f32 %v3329_v18  ;;  %v8043_v21 = vmul.f32 0.5, %v7807_v37  ;;  %v3271_v7 = vadd.f32 %v7914_v35, %v7826_v28 }
 0x6b7   : > { %v8037_v44 = vadd.f32 %v2853_v17, %v7606_v57  ;;  %v8040_v63 = vadd.f32 %v2966_v53, %v7610_v58  ;;  %v2855_v54 = vpop.f32.mrb[89].mxu0  ;;  %v2968_v8 = vpop.f32.mrb[89].mxu1  ;;  %5316 = vtanh.f32 %v3333_v62  ;;  %v3574_v56 = vpack.c.bf16 %v3526_v27, %v3522_v5 }
 0x6b8   : > { %v8046_v60 = vadd.f32 %v2855_v54, %v7614_v2  ;;  %v8049_v4 = vadd.f32 %v2968_v8, %v7618_v61  ;;  %v2857_v33 = vpop.f32.mrb[90].mxu0  ;;  %v2970_v43 = vpop.f32.mrb[90].mxu1  ;;  %5318 = vtanh.f32 %v3331_v41  ;;  %v8072_v41 = vmul.f32 0.5, %v7810_v51 }
 0x6b9   : > { %v3097_v3 = vmul.f32 0.044715, %v8037_v44  ;;  %v3099_v10 = vmul.f32 0.044715, %v8040_v63  ;;  %v8056_v37 = vadd.f32 %v2857_v33, %v7606_v57  ;;  %v2859_v18 = vpop.f32.mrb[91].mxu0  ;;  %v2972_v62 = vpop.f32.mrb[91].mxu1  ;;  %v8061_v54 = vadd.f32 %v2970_v43, %v7610_v58  ;;  %3912 = vmatprep.mubr.bf16.mxu0 %v3574_v56 }
 0x6ba   : > { %v3098_v17 = vmul.f32 0.044715, %v8046_v60  ;;  %v3100_v53 = vmul.f32 0.044715, %v8049_v4  ;;  %v8064_v5 = vadd.f32 %v2859_v18, %v7614_v2  ;;  %v5311_v35 = vpop.eup %5310  ;;  %v8068_v8 = vadd.f32 %v2972_v62, %v7618_v61 }
 0x6bb   : > { %v3161_v27 = vmul.f32 %v3097_v3, %v8037_v44  ;;  %v3013_v33 = vmul.f32 0.5, %v7823_v34  ;;  %v3163_v6 = vmul.f32 %v3099_v10, %v8040_v63  ;;  %v3101_v43 = vmul.f32 0.044715, %v8056_v37 }
 0x6bc   : > { %v5313_v0 = vpop.eup %5312  ;;  %v3335_v20 = vmul.f32 0.7978846, %v3271_v7  ;;  %v3274_v56 = vadd.f32 %v7935_v45, %v7878_v50  ;;  %v8079_v18 = vmul.f32 0.5, %v7826_v28  ;;  %v8082_v3 = vmul.f32 0.5, %v7878_v50 }
 0x6bd   : > { %v8085_v34 = vmul.f32 0.5, %v7894_v47  ;;  %v3278_v51 = vadd.f32 %v7984_v9, %v7894_v47  ;;  %v3162_v10 = vmul.f32 %v3098_v17, %v8046_v60  ;;  %v3164_v62 = vmul.f32 %v3100_v53, %v8049_v4 }
 0x6be   : > { %v3103_v7 = vmul.f32 0.044715, %v8061_v54  ;;  %v3102_v45 = vmul.f32 0.044715, %v8064_v5  ;;  %v8094_v28 = vmul.f32 %v3161_v27, %v8037_v44  ;;  %v3104_v50 = vmul.f32 0.044715, %v8068_v8 }
 0x6bf   : > { %v3460_v42 = vadd.f32 1.0, %v5311_v35  ;;  %v3464_v12 = vadd.f32 1.0, %v5313_v0  ;;  %v8098_v36 = vmul.f32 %v3163_v6, %v8040_v63  ;;  %v3165_v9 = vmul.f32 %v3101_v43, %v8056_v37 }
 0x6c0   : > { %8897 = vst [vmem:[#allocation66_spill] sm:$0xff] %v8094_v28  ;;  %v5315_v30 = vpop.eup %5314  ;;  %5320 = vtanh.f32 %v3335_v20  ;;  %v3338_v47 = vmul.f32 0.7978846, %v3274_v56  ;;  %v3342_v27 = vmul.f32 0.7978846, %v3278_v51  ;;  %v8104_v28 = vmul.f32 %v3162_v10, %v8046_v60 }
 0x6c1   : > { %8898 = vst [vmem:[#allocation84_spill] sm:$0xff] %v8098_v36  ;;  %v5317_v17 = vpop.eup %5316  ;;  %v3524_v53 = vmul.f32 %v3460_v42, %v7994_v1  ;;  %v3528_v31 = vmul.f32 %v3464_v12, %v7997_v22  ;;  %v3457_v24 = vadd.f32 1.0, %v5315_v30  ;;  %v3167_v0 = vmul.f32 %v3103_v7, %v8061_v54 }
 0x6c2   : > { %v3461_v35 = vadd.f32 1.0, %v5317_v17  ;;  %5322 = vtanh.f32 %v3338_v47  ;;  %v5319_v6 = vpop.eup %5318  ;;  %v8108_v36 = vmul.f32 %v3164_v62, %v8049_v4  ;;  %v3166_v20 = vmul.f32 %v3102_v45, %v8064_v5 }
 0x6c3   : > { %v2863_v43 = vpop.f32.mrb[92].mxu0  ;;  %v2976_v56 = vpop.f32.mrb[92].mxu1  ;;  %v3576_v1 = vpack.c.bf16 %v3528_v31, %v3524_v53  ;;  %5324 = vtanh.f32 %v3342_v27  ;;  %v3168_v22 = vmul.f32 %v3104_v50, %v8068_v8  ;;  %v8119_v62 = vmul.f32 %v3165_v9, %v8056_v37 }
 0x6c4   : > { %v8113_v12 = vadd.f32 %v2863_v43, %v7606_v57  ;;  %v8116_v42 = vadd.f32 %v2976_v56, %v7610_v58  ;;  %v2865_v30 = vpop.f32.mrb[93].mxu0  ;;  %v2978_v51 = vpop.f32.mrb[93].mxu1  ;;  %v3525_v10 = vmul.f32 %v3461_v35, %v3013_v33  ;;  %v3521_v47 = vmul.f32 %v3457_v24, %v8043_v21 }
 0x6c5   : > { %v8122_v7 = vadd.f32 %v2865_v30, %v7614_v2  ;;  %v8125_v31 = vadd.f32 %v2978_v51, %v7618_v61  ;;  %4009 = vmatprep.mubr.bf16.mxu1 %v3576_v1  ;;  %v2867_v45 = vpop.f32.mrb[94].mxu0  ;;  %v2980_v50 = vpop.f32.mrb[94].mxu1  ;;  %v8129_v17 = vmul.f32 %v3167_v0, %v8061_v54  ;;  %v3459_v9 = vadd.f32 1.0, %v5319_v6 }
 0x6c6   : > { %8899 = vst [vmem:[#allocation75_spill] sm:$0xff] %v8116_v42  ;;  %v3105_v53 = vmul.f32 0.044715, %v8113_v12  ;;  %v8133_v33 = vadd.f32 %v2867_v45, %v7606_v57  ;;  %v2869_v27 = vpop.f32.mrb[95].mxu0  ;;  %v2982_v35 = vpop.f32.mrb[95].mxu1  ;;  %v8137_v56 = vadd.f32 %v2980_v50, %v7610_v58  ;;  %v3573_v1 = vpack.c.bf16 %v3525_v10, %v3521_v47 }
 0x6c7   : > { %8900 = vst [vmem:[#allocation88_spill] sm:$0xff] %v8129_v17  ;;  %v3107_v43 = vmul.f32 0.044715, %v8116_v42  ;;  %v8140_v30 = vadd.f32 %v2869_v27, %v7614_v2  ;;  %v8143_v24 = vmul.f32 %v3166_v20, %v8064_v5  ;;  %v3106_v21 = vmul.f32 0.044715, %v8122_v7 }
 0x6c8   : > { %v3108_v57 = vmul.f32 0.044715, %v8125_v31  ;;  %v3276_v0 = vadd.f32 %v7938_v59, %v7881_v29  ;;  %v8150_v6 = vmul.f32 %v3168_v22, %v8068_v8  ;;  %v3169_v58 = vmul.f32 %v3105_v53, %v8113_v12  ;;  %3913 = vmatmul.mubr.bf16.gmra.mrb[108].mxu0 %v3573_v1 }
 0x6c9   : > { %v8154_v51 = vadd.f32 %v2982_v35, %v7618_v61  ;;  %v3280_v2 = vadd.f32 %v7987_v16, %v7897_v25  ;;  %v3109_v10 = vmul.f32 0.044715, %v8133_v33  ;;  %v3110_v45 = vmul.f32 0.044715, %v8140_v30 }
 0x6ca   : > { %v5321_v20 = vpop.eup %5320  ;;  %v8161_v50 = vmul.f32 0.5, %v7881_v29  ;;  %v8164_v59 = vmul.f32 0.5, %v7897_v25  ;;  %v8167_v22 = vmul.f32 %v3107_v43, %v8116_v42  ;;  %v3111_v61 = vmul.f32 0.044715, %v8137_v56 }
 0x6cb   : > { %v3463_v47 = vadd.f32 1.0, %v5321_v20  ;;  %v3523_v53 = vmul.f32 %v3459_v9, %v8072_v41  ;;  %v3170_v27 = vmul.f32 %v3106_v21, %v8122_v7  ;;  %v3172_v35 = vmul.f32 %v3108_v57, %v8125_v31 }
 0x6cc   : > { %8901 = vst [vmem:[#allocation82_spill] sm:$0xff] %v8167_v22  ;;  %v5323_v16 = vpop.eup %5322  ;;  %v3112_v1 = vmul.f32 0.044715, %v8154_v51  ;;  %v3340_v29 = vmul.f32 0.7978846, %v3276_v0  ;;  %v8175_v25 = vmul.f32 %v3169_v58, %v8113_v12  ;;  %v8179_v20 = vmul.f32 %v3109_v10, %v8133_v33 }
 0x6cd   : > { %v5325_v17 = vpop.eup %5324  ;;  %v3527_v43 = vmul.f32 %v3463_v47, %v8079_v18  ;;  %v3466_v22 = vadd.f32 1.0, %v5323_v16  ;;  %v3344_v42 = vmul.f32 0.7978846, %v3280_v2  ;;  %v3174_v41 = vmul.f32 %v3110_v45, %v8140_v30 }
 0x6ce   : > { %v3470_v9 = vadd.f32 1.0, %v5325_v17  ;;  %5326 = vtanh.f32 %v3340_v29  ;;  %v8183_v21 = vmul.f32 %v3111_v61, %v8137_v56  ;;  %v3176_v0 = vmul.f32 %v3112_v1, %v8154_v51 }
 0x6cf   : > { %v3575_v57 = vpack.c.bf16 %v3527_v43, %v3523_v53  ;;  %5328 = vtanh.f32 %v3344_v42  ;;  %v3530_v58 = vmul.f32 %v3466_v22, %v8082_v3  ;;  %v3273_v2 = vadd.f32 %v7927_v55, %v7872_v48 }
 0x6d0   : > { %v3534_v18 = vmul.f32 %v3470_v9, %v8085_v34  ;;  %v3277_v10 = vadd.f32 %v7942_v52, %v7886_v19  ;;  %v8193_v17 = vmul.f32 %v3170_v27, %v8122_v7  ;;  %v8196_v45 = vmul.f32 %v3172_v35, %v8125_v31  ;;  %v8902_v9 = vld [vmem:[#allocation86_spill] sm:$0xff] }
 0x6d1   : > { %4010 = vmatmul.mubr.bf16.gmra.mrb[108].mxu1 %v3575_v57  ;;  %v3275_v42 = vadd.f32 %v7930_v26, %v7875_v39  ;;  %v3279_v3 = vadd.f32 %v7978_v14, %v7889_v23  ;;  %v8203_v34 = vmul.f32 %v3174_v41, %v8140_v30  ;;  %v3337_v22 = vmul.f32 0.7978846, %v3273_v2 }
 0x6d2   : > { %v3578_v55 = vpack.c.bf16 %v3534_v18, %v3530_v58  ;;  %v3341_v61 = vmul.f32 0.7978846, %v3277_v10  ;;  %v8206_v52 = vmul.f32 0.5, %v7872_v48  ;;  %v3282_v16 = vadd.f32 %v8015_v32, %v7953_v49 }
 0x6d3   : > { %v3339_v47 = vmul.f32 0.7978846, %v3275_v42  ;;  %v3343_v53 = vmul.f32 0.7978846, %v3279_v3  ;;  %v8211_v27 = vmul.f32 %v3176_v0, %v8154_v51  ;;  %v8214_v14 = vmul.f32 0.5, %v7886_v19  ;;  %v8906_v42 = vld [vmem:[#allocation77_spill] sm:$0xff] }
 0x6d4   : > { %3920 = vmatprep.mubr.bf16.mxu0 %v3578_v55  ;;  %5330 = vtanh.f32 %v3337_v22  ;;  %v3286_v26 = vadd.f32 %v8029_v15, %v7969_v11  ;;  %v3346_v35 = vmul.f32 0.7978846, %v3282_v16  ;;  %v3284_v48 = vadd.f32 %v8020_v40, %v7956_v46  ;;  %v8903_v15 = vld [vmem:[#allocation62_spill] sm:$0xff]  ;;  %v8907_v3 = vld [vmem:[#allocation83_spill] sm:$0xff] }
 0x6d5   : > { %5332 = vtanh.f32 %v3341_v61  ;;  %v3288_v1 = vadd.f32 %v8032_v13, %v7972_v38  ;;  %v3019_v32 = vmul.f32 0.5, %v7875_v39  ;;  %v8224_v29 = vmul.f32 0.5, %v7889_v23  ;;  %v8904_v39 = vld [vmem:[#allocation93_spill] sm:$0xff]  ;;  %v8905_v13 = vld [vmem:[#allocation74_spill] sm:$0xff] }
 0x6d6   : > { %5334 = vtanh.f32 %v3339_v47  ;;  %v3350_v19 = vmul.f32 0.7978846, %v3286_v26  ;;  %v3348_v43 = vmul.f32 0.7978846, %v3284_v48  ;;  %v3281_v57 = vadd.f32 %v8903_v15, %v8902_v9  ;;  %v8908_v47 = vld [vmem:[#allocation105_spill] sm:$0xff] }
 0x6d7   : > { %5336 = vtanh.f32 %v3343_v53  ;;  %v3352_v41 = vmul.f32 0.7978846, %v3288_v1  ;;  %v8229_v58 = vmul.f32 0.5, %v7953_v49  ;;  %v8232_v40 = vmul.f32 0.5, %v7969_v11  ;;  %v8909_v49 = vld [vmem:[#allocation87_spill] sm:$0xff] }
 0x6d8   : > { %v5327_v0 = vpop.eup %5326  ;;  %5338 = vtanh.f32 %v3346_v35  ;;  %v3285_v23 = vadd.f32 %v8905_v13, %v8904_v39  ;;  %v3345_v10 = vmul.f32 0.7978846, %v3281_v57  ;;  %v3283_v55 = vadd.f32 %v8907_v3, %v8906_v42 }
 0x6d9   : > { %v5329_v18 = vpop.eup %5328  ;;  %v3468_v2 = vadd.f32 1.0, %v5327_v0  ;;  %5340 = vtanh.f32 %v3350_v19  ;;  %v3287_v53 = vadd.f32 %v8909_v49, %v8908_v47  ;;  %v8241_v11 = vmul.f32 0.5, %v7956_v46 }
 0x6da   : > { %v3472_v22 = vadd.f32 1.0, %v5329_v18  ;;  %5342 = vtanh.f32 %v3348_v43  ;;  %v3349_v61 = vmul.f32 0.7978846, %v3285_v23  ;;  %v8244_v16 = vmul.f32 0.5, %v7972_v38 }
 0x6db   : > { %5344 = vtanh.f32 %v3352_v41  ;;  %v3347_v26 = vmul.f32 0.7978846, %v3283_v55  ;;  %v3532_v35 = vmul.f32 %v3468_v2, %v8161_v50  ;;  %v3351_v1 = vmul.f32 0.7978846, %v3287_v53 }
 0x6dc   : > { %v3536_v48 = vmul.f32 %v3472_v22, %v8164_v59  ;;  %5346 = vtanh.f32 %v3345_v10  ;;  %v8249_v19 = vmul.f32 0.5, %v8902_v9  ;;  %v3290_v43 = vadd.f32 %v8104_v28, %v8046_v60 }
 0x6dd   : > { %5348 = vtanh.f32 %v3349_v61  ;;  %v3294_v46 = vadd.f32 %v8143_v24, %v8064_v5  ;;  %v8256_v41 = vmul.f32 0.5, %v8904_v39  ;;  %v3292_v50 = vadd.f32 %v8108_v36, %v8049_v4 }
 0x6de   : > { %v5331_v38 = vpop.eup %5330  ;;  %v3580_v15 = vpack.c.bf16 %v3536_v48, %v3532_v35  ;;  %5350 = vtanh.f32 %v3347_v26  ;;  %v3354_v9 = vmul.f32 0.7978846, %v3290_v43  ;;  %v3027_v23 = vmul.f32 0.5, %v8906_v42 }
 0x6df   : > { %v5333_v59 = vpop.eup %5332  ;;  %v3465_v57 = vadd.f32 1.0, %v5331_v38  ;;  %5352 = vtanh.f32 %v3351_v1  ;;  %v3358_v0 = vmul.f32 0.7978846, %v3294_v46  ;;  %v3296_v24 = vadd.f32 %v8150_v6, %v8068_v8  ;;  %v8910_v6 = vld [vmem:[#allocation66_spill] sm:$0xff] }
 0x6e0   : > { %v5335_v13 = vpop.eup %5334  ;;  %4017 = vmatprep.mubr.bf16.mxu1 %v3580_v15  ;;  %v3469_v28 = vadd.f32 1.0, %v5333_v59  ;;  %v3356_v18 = vmul.f32 0.7978846, %v3292_v50  ;;  %v3031_v36 = vmul.f32 0.5, %v8908_v47  ;;  %5354 = vtanh.f32 %v3354_v9 }
 0x6e1   : > { %v5337_v39 = vpop.eup %5336  ;;  %v3529_v2 = vmul.f32 %v3465_v57, %v8206_v52  ;;  %v3467_v10 = vadd.f32 1.0, %v5335_v13  ;;  %5356 = vtanh.f32 %v3358_v0  ;;  %v3360_v61 = vmul.f32 0.7978846, %v3296_v24 }
 0x6e2   : > { %v5339_v3 = vpop.eup %5338  ;;  %v3533_v55 = vmul.f32 %v3469_v28, %v8214_v14  ;;  %v3471_v22 = vadd.f32 1.0, %v5337_v39  ;;  %5358 = vtanh.f32 %v3356_v18  ;;  %v3289_v26 = vadd.f32 %v8910_v6, %v8037_v44 }
 0x6e3   : > { %v5341_v49 = vpop.eup %5340  ;;  %v3531_v53 = vmul.f32 %v3467_v10, %v3019_v32  ;;  %v3474_v42 = vadd.f32 1.0, %v5339_v3  ;;  %5360 = vtanh.f32 %v3360_v61  ;;  %v3034_v14 = vmul.f32 0.5, %v8046_v60 }
 0x6e4   : > { %v5343_v35 = vpop.eup %5342  ;;  %v3577_v48 = vpack.c.bf16 %v3533_v55, %v3529_v2  ;;  %v3535_v52 = vmul.f32 %v3471_v22, %v8224_v29  ;;  %v3478_v1 = vadd.f32 1.0, %v5341_v49  ;;  %v3293_v46 = vadd.f32 %v8119_v62, %v8056_v37  ;;  %v8912_v22 = vld [vmem:[#allocation88_spill] sm:$0xff] }
 0x6e5   : > { %v5345_v47 = vpop.eup %5344  ;;  %v3476_v43 = vadd.f32 1.0, %v5343_v35  ;;  %v3353_v38 = vmul.f32 0.7978846, %v3289_v26  ;;  %v3538_v50 = vmul.f32 %v3474_v42, %v8229_v58  ;;  %v3038_v0 = vmul.f32 0.5, %v8064_v5 }
 0x6e6   : > { %v5347_v32 = vpop.eup %5346  ;;  %3921 = vmatmul.mubr.bf16.gmra.mrb[112].mxu0 %v3577_v48  ;;  %v3579_v15 = vpack.c.bf16 %v3535_v52, %v3531_v53  ;;  %v3542_v59 = vmul.f32 %v3478_v1, %v8232_v40  ;;  %v3480_v57 = vadd.f32 1.0, %v5345_v47  ;;  %v3357_v13 = vmul.f32 0.7978846, %v3293_v46  ;;  %v8911_v40 = vld [vmem:[#allocation84_spill] sm:$0xff] }
 0x6e7   : > { %v5349_v9 = vpop.eup %5348  ;;  %v3473_v29 = vadd.f32 1.0, %v5347_v32  ;;  %5362 = vtanh.f32 %v3353_v38  ;;  %v3540_v62 = vmul.f32 %v3476_v43, %v8241_v11  ;;  %v3291_v10 = vadd.f32 %v8911_v40, %v8040_v63 }
 0x6e8   : > { %v5351_v28 = vpop.eup %5350  ;;  %4018 = vmatmul.mubr.bf16.gmra.mrb[112].mxu1 %v3579_v15  ;;  %v3582_v60 = vpack.c.bf16 %v3542_v59, %v3538_v50  ;;  %v3544_v24 = vmul.f32 %v3480_v57, %v8244_v16  ;;  %v3477_v18 = vadd.f32 1.0, %v5349_v9  ;;  %5364 = vtanh.f32 %v3357_v13  ;;  %v8913_v15 = vld [vmem:[#allocation75_spill] sm:$0xff]  ;;  %v8914_v50 = vld [vmem:[#allocation82_spill] sm:$0xff] }
 0x6e9   : > { %v5353_v39 = vpop.eup %5352  ;;  %v3537_v58 = vmul.f32 %v3473_v29, %v8249_v19  ;;  %v3475_v2 = vadd.f32 1.0, %v5351_v28  ;;  %v3295_v61 = vadd.f32 %v8912_v22, %v8061_v54  ;;  %v3036_v16 = vmul.f32 0.5, %v8049_v4 }
 0x6ea   : > { %3928 = vmatprep.mubr.bf16.mxu0 %v3582_v60  ;;  %v3584_v5 = vpack.c.bf16 %v3544_v24, %v3540_v62  ;;  %v3541_v3 = vmul.f32 %v3477_v18, %v8256_v41  ;;  %v3479_v55 = vadd.f32 1.0, %v5353_v39  ;;  %v5355_v11 = vpop.eup %5354  ;;  %v3040_v53 = vmul.f32 0.5, %v8068_v8 }
 0x6eb   : > { %v3539_v49 = vmul.f32 %v3475_v2, %v3027_v23  ;;  %v3355_v19 = vmul.f32 0.7978846, %v3291_v10  ;;  %v5357_v42 = vpop.eup %5356  ;;  %v3482_v35 = vadd.f32 1.0, %v5355_v11  ;;  %v3359_v48 = vmul.f32 0.7978846, %v3295_v61 }
 0x6ec   : > { %4025 = vmatprep.mubr.bf16.mxu1 %v3584_v5  ;;  %v3581_v6 = vpack.c.bf16 %v3541_v3, %v3537_v58  ;;  %v3543_v26 = vmul.f32 %v3479_v55, %v3031_v36  ;;  %v5359_v52 = vpop.eup %5358  ;;  %v3486_v1 = vadd.f32 1.0, %v5357_v42  ;;  %v3298_v41 = vadd.f32 %v8193_v17, %v8122_v7 }
 0x6ed   : > { %5366 = vtanh.f32 %v3355_v19  ;;  %v3302_v23 = vadd.f32 %v8203_v34, %v8140_v30  ;;  %v5361_v47 = vpop.eup %5360  ;;  %v3546_v8 = vmul.f32 %v3482_v35, %v3034_v14  ;;  %v3484_v43 = vadd.f32 1.0, %v5359_v52 }
 0x6ee   : > { %3929 = vmatmul.mubr.bf16.gmra.mrb[116].mxu0 %v3581_v6  ;;  %v3583_v4 = vpack.c.bf16 %v3543_v26, %v3539_v49  ;;  %5368 = vtanh.f32 %v3359_v48  ;;  %v3550_v46 = vmul.f32 %v3486_v1, %v3038_v0  ;;  %v3488_v38 = vadd.f32 1.0, %v5361_v47 }
 0x6ef   : > { %v3362_v36 = vmul.f32 0.7978846, %v3298_v41  ;;  %v3366_v32 = vmul.f32 0.7978846, %v3302_v23  ;;  %v3235_v59 = vmul.f32 %v8914_v50, %v8913_v15  ;;  %v3237_v57 = vmul.f32 %v8179_v20, %v8133_v33 }
 0x6f0   : > { %4026 = vmatmul.mubr.bf16.gmra.mrb[116].mxu1 %v3583_v4  ;;  %v3548_v17 = vmul.f32 %v3484_v43, %v3036_v16  ;;  %v3300_v34 = vadd.f32 %v8196_v45, %v8125_v31  ;;  %v3586_v29 = vpack.c.bf16 %v3550_v46, %v3546_v8  ;;  %v3552_v14 = vmul.f32 %v3488_v38, %v3040_v53 }
 0x6f1   : > { %v5363_v9 = vpop.eup %5362  ;;  %5370 = vtanh.f32 %v3362_v36  ;;  %v3304_v0 = vadd.f32 %v8211_v27, %v8154_v51  ;;  %v3239_v13 = vmul.f32 %v8183_v21, %v8137_v56  ;;  %v3033_v24 = vmul.f32 0.5, %v8037_v44 }
 0x6f2   : > { %v3481_v28 = vadd.f32 1.0, %v5363_v9  ;;  %5372 = vtanh.f32 %v3366_v32  ;;  %v3364_v60 = vmul.f32 0.7978846, %v3300_v34  ;;  %v5365_v62 = vpop.eup %5364  ;;  %3936 = vmatprep.mubr.bf16.mxu0 %v3586_v29  ;;  %v3588_v20 = vpack.c.bf16 %v3552_v14, %v3548_v17 }
 0x6f3   : > { %v3368_v18 = vmul.f32 0.7978846, %v3304_v0  ;;  %v3297_v45 = vadd.f32 %v8175_v25, %v8113_v12  ;;  %v3037_v39 = vmul.f32 0.5, %v8056_v37  ;;  %v3485_v58 = vadd.f32 1.0, %v5365_v62 }
 0x6f4   : > { %5374 = vtanh.f32 %v3364_v60  ;;  %v3301_v27 = vadd.f32 %v3237_v57, %v8133_v33  ;;  %4033 = vmatprep.mubr.bf16.mxu1 %v3588_v20  ;;  %v3545_v21 = vmul.f32 %v3481_v28, %v3033_v24  ;;  %v3299_v5 = vadd.f32 %v3235_v59, %v8913_v15  ;;  %v8321_v24 = vld [vmem:[%s600_s26] ss:$0 sm:$0xff]  ;;  %s8932_s26 = sld [smem:[#allocation23_spill]] }
 0x6f5   : > { %5376 = vtanh.f32 %v3368_v18  ;;  %v3361_v2 = vmul.f32 0.7978846, %v3297_v45  ;;  %v3549_v40 = vmul.f32 %v3485_v58, %v3037_v39  ;;  %v3303_v44 = vadd.f32 %v3239_v13, %v8137_v56 }
 0x6f6   : > { %v3365_v10 = vmul.f32 0.7978846, %v3301_v27  ;;  %v3363_v37 = vmul.f32 0.7978846, %v3299_v5  ;;  %v3035_v61 = vmul.f32 0.5, %v8040_v63  ;;  %v3039_v11 = vmul.f32 0.5, %v8061_v54 }
 0x6f7   : > { %v5367_v3 = vpop.eup %5366  ;;  %5378 = vtanh.f32 %v3361_v2  ;;  %v3585_v25 = vpack.c.bf16 %v3549_v40, %v3545_v21  ;;  %v3367_v16 = vmul.f32 0.7978846, %v3303_v44  ;;  %v3042_v48 = vmul.f32 0.5, %v8122_v7 }
 0x6f8   : > { %v5369_v55 = vpop.eup %5368  ;;  %v3483_v22 = vadd.f32 1.0, %v5367_v3  ;;  %5380 = vtanh.f32 %v3365_v10  ;;  %v3046_v52 = vmul.f32 0.5, %v8140_v30  ;;  %v3044_v4 = vmul.f32 0.5, %v8125_v31  ;;  %v8916_v3 = vld [vmem:[#allocation61_spill] sm:$0xff] }
 0x6f9   : > { %v3487_v49 = vadd.f32 1.0, %v5369_v55  ;;  %3937 = vmatmul.mubr.bf16.gmra.mrb[120].mxu0 %v3585_v25  ;;  %5382 = vtanh.f32 %v3363_v37  ;;  %v3048_v8 = vmul.f32 0.5, %v8154_v51  ;;  %v3041_v30 = vmul.f32 0.5, %v8113_v12 }
 0x6fa   : > { %v3547_v19 = vmul.f32 %v3483_v22, %v3035_v61  ;;  %5384 = vtanh.f32 %v3367_v16  ;;  %v3045_v59 = vmul.f32 0.5, %v8133_v33  ;;  %v3043_v14 = vmul.f32 0.5, %v8913_v15  ;;  %v8917_v22 = vld [vmem:[#allocation80_spill] sm:$0xff]  ;;  %p4501_p6 = scmp.ne.s32.totalorder %s8932_s26, 1 }
 0x6fb   : > { %v5371_v53 = vpop.eup %5370  ;;  %v3551_v42 = vmul.f32 %v3487_v49, %v3039_v11  ;;  %v3047_v0 = vmul.f32 0.5, %v8137_v56 }
 0x6fc   : > { %v5373_v6 = vpop.eup %5372  ;;  %v3490_v26 = vadd.f32 1.0, %v5371_v53 }
 0x6fd   : > { %v3587_v35 = vpack.c.bf16 %v3551_v42, %v3547_v19  ;;  %v3494_v1 = vadd.f32 1.0, %v5373_v6 }
 0x6fe   : > { %v5375_v41 = vpop.eup %5374  ;;  %v3554_v54 = vmul.f32 %v3490_v26, %v3042_v48 }
 0x6ff   : > { %v5377_v63 = vpop.eup %5376  ;;  %4034 = vmatmul.mubr.bf16.gmra.mrb[120].mxu1 %v3587_v35  ;;  %v3558_v23 = vmul.f32 %v3494_v1, %v3046_v52  ;;  %v3492_v47 = vadd.f32 1.0, %v5375_v41 }
 0x700   : > { %v3496_v43 = vadd.f32 1.0, %v5377_v63 }
 0x701   : > { %v5379_v46 = vpop.eup %5378  ;;  %v3590_v38 = vpack.c.bf16 %v3558_v23, %v3554_v54  ;;  %v3556_v32 = vmul.f32 %v3492_v47, %v3044_v4  ;;  %v8918_v54 = vld [vmem:[#allocation56_spill] sm:$0xff]  ;;  %v8919_v4 = vld [vmem:[#allocation70_spill] sm:$0xff] }
 0x702   : > { %v5381_v36 = vpop.eup %5380  ;;  %v3560_v50 = vmul.f32 %v3496_v43, %v3048_v8  ;;  %v3489_v7 = vadd.f32 1.0, %v5379_v46 }
 0x703   : > { %3944 = vmatprep.mubr.bf16.mxu0 %v3590_v38  ;;  %v3493_v57 = vadd.f32 1.0, %v5381_v36  ;;  %v5383_v17 = vpop.eup %5382 }
 0x704   : > { %v3592_v34 = vpack.c.bf16 %v3560_v50, %v3556_v32  ;;  %v5385_v9 = vpop.eup %5384  ;;  %v3553_v31 = vmul.f32 %v3489_v7, %v3041_v30  ;;  %v3491_v51 = vadd.f32 1.0, %v5383_v17 }
 0x705   : > { %v3557_v29 = vmul.f32 %v3493_v57, %v3045_v59  ;;  %v3495_v13 = vadd.f32 1.0, %v5385_v9 }
 0x706   : > { %4041 = vmatprep.mubr.bf16.mxu1 %v3592_v34  ;;  %v3555_v60 = vmul.f32 %v3491_v51, %v3043_v14  ;;  %v8920_v51 = vld [vmem:[#allocation57_spill] sm:$0xff] }
 0x707   : > { %v3589_v28 = vpack.c.bf16 %v3557_v29, %v3553_v31  ;;  %v3559_v62 = vmul.f32 %v3495_v13, %v3047_v0  ;;  %v8921_v13 = vld [vmem:[#allocation71_spill] sm:$0xff] }
 0x709   : > { %3945 = vmatmul.mubr.bf16.gmra.mrb[124].mxu0 %v3589_v28  ;;  %v3591_v12 = vpack.c.bf16 %v3559_v62, %v3555_v60 }
 0x70b   : > { %4042 = vmatmul.mubr.bf16.gmra.mrb[124].mxu1 %v3591_v12 }
 0x747   : > { %v4658_v33 = vpop.f32.mrb[96].mxu0 }
 0x748   : > { %v4659_v18 = vpop.f32.mrb[97].mxu0 }
 0x749   : > { %v4722_v20 = vpop.f32.mrb[96].mxu1  ;;  %v4660_v45 = vadd.f32 %v4659_v18, %v4658_v33  ;;  %v4661_v39 = vpop.f32.mrb[98].mxu0 }
 0x74a   : > { %v4723_v15 = vpop.f32.mrb[97].mxu1  ;;  %v4662_v27 = vpop.f32.mrb[99].mxu0 }
 0x74b   : > { %v4724_v56 = vadd.f32 %v4723_v15, %v4722_v20  ;;  %v4725_v58 = vpop.f32.mrb[98].mxu1  ;;  %v3891_v21 = vadd.f32 %v4660_v45, %v8321_v24  ;;  %v4663_v2 = vadd.f32 %v4662_v27, %v4661_v39 }
 0x74c   : > { %v4726_v40 = vpop.f32.mrb[99].mxu1 }
 0x74d   : > { %v4727_v10 = vadd.f32 %v4726_v40, %v4725_v58  ;;  %v3988_v5 = vadd.f32 %v4724_v56, %v3891_v21  ;;  %v3894_v44 = vadd.f32 %v4663_v2, %v8321_v24 }
 0x74f   : > { %v8326_v55 = vadd.f32 %v3988_v5, %v8916_v3  ;;  %v3991_v25 = vadd.f32 %v4727_v10, %v3894_v44  ;;  %v8922_v10 = vld [vmem:[#allocation81_spill] sm:$0xff]  ;;  %v8923_v3 = vld [vmem:[#allocation67_spill] sm:$0xff] }
 0x751   : > { %4066 = vst [vmem:[#allocation2] sm:$0xff] %v8326_v55  ;;  %v8330_v37 = vadd.f32 %v3991_v25, %v8917_v22  ;;  %4086 = vst [vmem:[%s6204_s5] sm:$0xff] (!%p4501_p6), %v8326_v55 }
 0x753   : > { %4067 = vst [vmem:[#allocation2 + $0x8] sm:$0xff] %v8330_v37  ;;  %4087 = vst [vmem:[%s6204_s5 + $0x8] sm:$0xff] (!%p4501_p6), %v8330_v37 }
 0x75e   : > { %v4664_v61 = vpop.f32.mrb[100].mxu0 }
 0x75f   : > { %v4665_v11 = vpop.f32.mrb[101].mxu0 }
 0x760   : > { %v4666_v49 = vadd.f32 %v4665_v11, %v4664_v61  ;;  %v4667_v16 = vpop.f32.mrb[102].mxu0 }
 0x761   : > { %v4668_v53 = vpop.f32.mrb[103].mxu0 }
 0x762   : > { %v4669_v19 = vadd.f32 %v4668_v53, %v4667_v16  ;;  %v3899_v6 = vadd.f32 %v4666_v49, %v8321_v24 }
 0x764   : > { %v3902_v52 = vadd.f32 %v4669_v19, %v8321_v24 }
 0x76d   : > { %v4728_v42 = vpop.f32.mrb[100].mxu1 }
 0x76e   : > { %v4729_v26 = vpop.f32.mrb[101].mxu1 }
 0x76f   : > { %v4730_v35 = vadd.f32 %v4729_v26, %v4728_v42  ;;  %v4731_v48 = vpop.f32.mrb[102].mxu1 }
 0x770   : > { %v4732_v1 = vpop.f32.mrb[103].mxu1 }
 0x771   : > { %v3996_v41 = vadd.f32 %v4730_v35, %v3899_v6  ;;  %v4733_v63 = vadd.f32 %v4732_v1, %v4731_v48 }
 0x773   : > { %v8336_v23 = vadd.f32 %v3996_v41, %v8918_v54  ;;  %v3999_v47 = vadd.f32 %v4733_v63, %v3902_v52  ;;  %v8924_v63 = vld [vmem:[#allocation102_spill] sm:$0xff] }
 0x775   : > { %4068 = vst [vmem:[#allocation2 + $0x10] sm:$0xff] %v8336_v23  ;;  %v8340_v8 = vadd.f32 %v3999_v47, %v8919_v4  ;;  %4088 = vst [vmem:[%s6204_s5 + $0x10] sm:$0xff] (!%p4501_p6), %v8336_v23 }
 0x777   : > { %4069 = vst [vmem:[#allocation2 + $0x18] sm:$0xff] %v8340_v8  ;;  %v4670_v43 = vpop.f32.mrb[104].mxu0  ;;  %4089 = vst [vmem:[%s6204_s5 + $0x18] sm:$0xff] (!%p4501_p6), %v8340_v8 }
 0x778   : > { %v4671_v46 = vpop.f32.mrb[105].mxu0 }
 0x779   : > { %v4672_v38 = vadd.f32 %v4671_v46, %v4670_v43  ;;  %v4673_v36 = vpop.f32.mrb[106].mxu0  ;;  %v8925_v46 = vld [vmem:[#allocation103_spill] sm:$0xff] }
 0x77a   : > { %v4674_v32 = vpop.f32.mrb[107].mxu0 }
 0x77b   : > { %v4675_v50 = vadd.f32 %v4674_v32, %v4673_v36  ;;  %v3907_v30 = vadd.f32 %v4672_v38, %v8321_v24 }
 0x77d   : > { %v3910_v34 = vadd.f32 %v4675_v50, %v8321_v24 }
 0x785   : > { %v4734_v7 = vpop.f32.mrb[104].mxu1 }
 0x786   : > { %v4735_v59 = vpop.f32.mrb[105].mxu1 }
 0x787   : > { %v4736_v57 = vadd.f32 %v4735_v59, %v4734_v7  ;;  %v4737_v17 = vpop.f32.mrb[106].mxu1 }
 0x788   : > { %v4738_v9 = vpop.f32.mrb[107].mxu1 }
 0x789   : > { %v4004_v31 = vadd.f32 %v4736_v57, %v3907_v30  ;;  %v4739_v29 = vadd.f32 %v4738_v9, %v4737_v17 }
 0x78b   : > { %v8346_v14 = vadd.f32 %v4004_v31, %v8920_v51  ;;  %v4007_v0 = vadd.f32 %v4739_v29, %v3910_v34 }
 0x78d   : > { %4070 = vst [vmem:[#allocation2 + $0x20] sm:$0xff] %v8346_v14  ;;  %v8350_v28 = vadd.f32 %v4007_v0, %v8921_v13  ;;  %v8926_v0 = vld [vmem:[#allocation104_spill] sm:$0xff]  ;;  %4090 = vst [vmem:[%s6204_s5 + $0x20] sm:$0xff] (!%p4501_p6), %v8346_v14 }
 0x78f   : > { %4071 = vst [vmem:[#allocation2 + $0x28] sm:$0xff] %v8350_v28  ;;  %4091 = vst [vmem:[%s6204_s5 + $0x28] sm:$0xff] (!%p4501_p6), %v8350_v28 }
 0x79b   : > { %v4676_v60 = vpop.f32.mrb[108].mxu0 }
 0x79c   : > { %v4677_v62 = vpop.f32.mrb[109].mxu0 }
 0x79d   : > { %v4678_v12 = vadd.f32 %v4677_v62, %v4676_v60  ;;  %v4679_v33 = vpop.f32.mrb[110].mxu0  ;;  %v8927_v62 = vld [vmem:[#allocation69_spill] sm:$0xff] }
 0x79e   : > { %v4680_v20 = vpop.f32.mrb[111].mxu0 }
 0x79f   : > { %v4681_v18 = vadd.f32 %v4680_v20, %v4679_v33  ;;  %v3915_v15 = vadd.f32 %v4678_v12, %v8321_v24 }
 0x7a1   : > { %v3918_v27 = vadd.f32 %v4681_v18, %v8321_v24 }
 0x7a4   : > { %v4740_v45 = vpop.f32.mrb[108].mxu1 }
 0x7a5   : > { %v4741_v39 = vpop.f32.mrb[109].mxu1 }
 0x7a6   : > { %v4742_v56 = vadd.f32 %v4741_v39, %v4740_v45  ;;  %v4743_v58 = vpop.f32.mrb[110].mxu1 }
 0x7a7   : > { %v4744_v21 = vpop.f32.mrb[111].mxu1 }
 0x7a8   : > { %v4012_v2 = vadd.f32 %v4742_v56, %v3915_v15  ;;  %v4745_v40 = vadd.f32 %v4744_v21, %v4743_v58 }
 0x7aa   : > { %v8356_v5 = vadd.f32 %v4012_v2, %v8922_v10  ;;  %v4015_v44 = vadd.f32 %v4745_v40, %v3918_v27 }
 0x7ac   : > { %4072 = vst [vmem:[#allocation2 + $0x30] sm:$0xff] %v8356_v5  ;;  %v8360_v25 = vadd.f32 %v4015_v44, %v8923_v3  ;;  %4092 = vst [vmem:[%s6204_s5 + $0x30] sm:$0xff] (!%p4501_p6), %v8356_v5 }
 0x7ae   : > { %4073 = vst [vmem:[#allocation2 + $0x38] sm:$0xff] %v8360_v25  ;;  %4093 = vst [vmem:[%s6204_s5 + $0x38] sm:$0xff] (!%p4501_p6), %v8360_v25 }
 0x7b9   : > { %v4682_v22 = vpop.f32.mrb[112].mxu0 }
 0x7ba   : > { %v4683_v61 = vpop.f32.mrb[113].mxu0 }
 0x7bb   : > { %v4746_v11 = vpop.f32.mrb[112].mxu1  ;;  %v4684_v49 = vadd.f32 %v4683_v61, %v4682_v22  ;;  %v4685_v16 = vpop.f32.mrb[114].mxu0  ;;  %v8928_v22 = vld [vmem:[#allocation85_spill] sm:$0xff] }
 0x7bc   : > { %v4747_v53 = vpop.f32.mrb[113].mxu1  ;;  %v4686_v19 = vpop.f32.mrb[115].mxu0 }
 0x7bd   : > { %v3923_v42 = vadd.f32 %v4684_v49, %v8321_v24  ;;  %v4748_v6 = vadd.f32 %v4747_v53, %v4746_v11  ;;  %v4749_v26 = vpop.f32.mrb[114].mxu1  ;;  %v4687_v35 = vadd.f32 %v4686_v19, %v4685_v16  ;;  %v8929_v49 = vld [vmem:[#allocation76_spill] sm:$0xff] }
 0x7be   : > { %v4750_v48 = vpop.f32.mrb[115].mxu1 }
 0x7bf   : > { %v4020_v52 = vadd.f32 %v4748_v6, %v3923_v42  ;;  %v3926_v1 = vadd.f32 %v4687_v35, %v8321_v24  ;;  %v4751_v41 = vadd.f32 %v4750_v48, %v4749_v26 }
 0x7c1   : > { %v8366_v54 = vadd.f32 %v4020_v52, %v8924_v63  ;;  %v4023_v47 = vadd.f32 %v4751_v41, %v3926_v1  ;;  %v4688_v4 = vpop.f32.mrb[116].mxu0 }
 0x7c2   : > { %v4689_v43 = vpop.f32.mrb[117].mxu0 }
 0x7c3   : > { %4074 = vst [vmem:[#allocation2 + $0x40] sm:$0xff] %v8366_v54  ;;  %v8370_v38 = vadd.f32 %v4023_v47, %v8925_v46  ;;  %v4752_v36 = vpop.f32.mrb[116].mxu1  ;;  %v4690_v32 = vadd.f32 %v4689_v43, %v4688_v4  ;;  %v4691_v50 = vpop.f32.mrb[118].mxu0  ;;  %4094 = vst [vmem:[%s6204_s5 + $0x40] sm:$0xff] (!%p4501_p6), %v8366_v54 }
 0x7c4   : > { %v4753_v7 = vpop.f32.mrb[117].mxu1  ;;  %v4692_v30 = vpop.f32.mrb[119].mxu0 }
 0x7c5   : > { %4075 = vst [vmem:[#allocation2 + $0x48] sm:$0xff] %v8370_v38  ;;  %v3931_v59 = vadd.f32 %v4690_v32, %v8321_v24  ;;  %v4754_v57 = vadd.f32 %v4753_v7, %v4752_v36  ;;  %v4755_v17 = vpop.f32.mrb[118].mxu1  ;;  %v4693_v34 = vadd.f32 %v4692_v30, %v4691_v50  ;;  %v8930_v36 = vld [vmem:[#allocation90_spill] sm:$0xff]  ;;  %v8931_v7 = vld [vmem:[#allocation73_spill] sm:$0xff]  ;;  %4095 = vst [vmem:[%s6204_s5 + $0x48] sm:$0xff] (!%p4501_p6), %v8370_v38 }
 0x7c6   : > { %v4756_v9 = vpop.f32.mrb[119].mxu1 }
 0x7c7   : > { %v4028_v31 = vadd.f32 %v4754_v57, %v3931_v59  ;;  %v3934_v29 = vadd.f32 %v4693_v34, %v8321_v24  ;;  %v4757_v51 = vadd.f32 %v4756_v9, %v4755_v17 }
 0x7c9   : > { %v4060_v13 = vadd.f32 %v4028_v31, %v8926_v0  ;;  %v4031_v60 = vadd.f32 %v4757_v51, %v3934_v29 }
 0x7cb   : > { %4076 = vst [vmem:[#allocation2 + $0x50] sm:$0xff] %v4060_v13  ;;  %v4061_v12 = vadd.f32 %v4031_v60, %v8927_v62  ;;  %4096 = vst [vmem:[%s6204_s5 + $0x50] sm:$0xff] (!%p4501_p6), %v4060_v13 }
 0x7cc   : > { %v4694_v33 = vpop.f32.mrb[120].mxu0 }
 0x7cd   : > { %4077 = vst [vmem:[#allocation2 + $0x58] sm:$0xff] %v4061_v12  ;;  %v4695_v20 = vpop.f32.mrb[121].mxu0  ;;  %4097 = vst [vmem:[%s6204_s5 + $0x58] sm:$0xff] (!%p4501_p6), %v4061_v12 }
 0x7ce   : > { %v4696_v18 = vadd.f32 %v4695_v20, %v4694_v33  ;;  %v4697_v45 = vpop.f32.mrb[122].mxu0 }
 0x7cf   : > { %v4698_v15 = vpop.f32.mrb[123].mxu0 }
 0x7d0   : > { %v4699_v39 = vadd.f32 %v4698_v15, %v4697_v45  ;;  %v3939_v58 = vadd.f32 %v4696_v18, %v8321_v24 }
 0x7d2   : > { %v4758_v56 = vpop.f32.mrb[120].mxu1  ;;  %v3942_v40 = vadd.f32 %v4699_v39, %v8321_v24 }
 0x7d3   : > { %v4759_v27 = vpop.f32.mrb[121].mxu1 }
 0x7d4   : > { %v4760_v21 = vadd.f32 %v4759_v27, %v4758_v56  ;;  %v4761_v2 = vpop.f32.mrb[122].mxu1 }
 0x7d5   : > { %v4762_v10 = vpop.f32.mrb[123].mxu1 }
 0x7d6   : > { %v4036_v44 = vadd.f32 %v4760_v21, %v3939_v58  ;;  %v4763_v3 = vadd.f32 %v4762_v10, %v4761_v2 }
 0x7d8   : > { %v4062_v61 = vadd.f32 %v4036_v44, %v8928_v22  ;;  %v4039_v11 = vadd.f32 %v4763_v3, %v3942_v40 }
 0x7da   : > { %4078 = vst [vmem:[#allocation2 + $0x60] sm:$0xff] %v4062_v61  ;;  %v4063_v16 = vadd.f32 %v4039_v11, %v8929_v49  ;;  %4098 = vst [vmem:[%s6204_s5 + $0x60] sm:$0xff] (!%p4501_p6), %v4062_v61 }
 0x7dc   : > { %4079 = vst [vmem:[#allocation2 + $0x68] sm:$0xff] %v4063_v16  ;;  %v4700_v53 = vpop.f32.mrb[124].mxu0  ;;  %4099 = vst [vmem:[%s6204_s5 + $0x68] sm:$0xff] (!%p4501_p6), %v4063_v16 }
 0x7dd   : > { %v4701_v19 = vpop.f32.mrb[125].mxu0 }
 0x7de   : > { %v4702_v42 = vadd.f32 %v4701_v19, %v4700_v53  ;;  %v4703_v6 = vpop.f32.mrb[126].mxu0  ;;  %v4764_v26 = vpop.f32.mrb[124].mxu1 }
 0x7df   : > { %v4704_v35 = vpop.f32.mrb[127].mxu0  ;;  %v4765_v52 = vpop.f32.mrb[125].mxu1 }
 0x7e0   : > { %v3947_v48 = vadd.f32 %v4702_v42, %v8321_v24  ;;  %v4705_v1 = vadd.f32 %v4704_v35, %v4703_v6  ;;  %v4766_v41 = vadd.f32 %v4765_v52, %v4764_v26  ;;  %v4767_v63 = vpop.f32.mrb[126].mxu1 }
 0x7e1   : > { %v4768_v4 = vpop.f32.mrb[127].mxu1 }
 0x7e2   : > { %v3950_v47 = vadd.f32 %v4705_v1, %v8321_v24  ;;  %v4044_v43 = vadd.f32 %v4766_v41, %v3947_v48  ;;  %v4769_v46 = vadd.f32 %v4768_v4, %v4767_v63  ;;  %4085 = sbr.rel (%p4501_p6) target bundleno = 2025 (0x7e9), region = 88 }
 0x7e4   : > { %v4064_v32 = vadd.f32 %v4044_v43, %v8930_v36  ;;  %v4047_v50 = vadd.f32 %v4769_v46, %v3950_v47 }
 0x7e6   : > { %4080 = vst [vmem:[#allocation2 + $0x70] sm:$0xff] %v4064_v32  ;;  %v4065_v30 = vadd.f32 %v4047_v50, %v8931_v7  ;;  %4100 = vst [vmem:[%s6204_s5 + $0x70] sm:$0xff] (!%p4501_p6), %v4064_v32 }
 0x7e8   : > { %4081 = vst [vmem:[#allocation2 + $0x78] sm:$0xff] %v4065_v30  ;;  %4101 = vst [vmem:[%s6204_s5 + $0x78] sm:$0xff] (!%p4501_p6), %v4065_v30 }
 0x7e9 PF: > { %s8933_s0 = sld [smem:[#allocation24_spill]]  ;;  %s8934_s22 = sld [smem:[#allocation114_spill]] }
 0x7ea   : > { %s4116_s10 = sshll.u32 %s6204_s5, 4  ;;  %s4103_s1 = scalar_lea.sflag [#allocation5], %s6148_s16  ;;  %s8419_s10 = int_to_ptr.vmem [resolvable:$true] %s4116_s10 }
 0x7eb   : > { %s5566_s14 = scalar_lea.vmem %s8419_s10, 2048  ;;  %p8935_p1 = scmp.ne.s32.totalorder %s8664_s15, 0 }
 0x7ec   : > { %p5567_p4 = scmp.ne.s32.totalorder %s8419_s10, %s5566_s14  ;;  %s5715_s24 = smov [#allocation14]  }
 0x7ed   : > { %s5570_s6 = sshll.u32 %s5715_s24, 4  ;;  %s5571_s6 = int_to_ptr.vmem [resolvable:$false] %s5570_s6 }
 0x7ee   : > { %p5568_p2 = pnand %p5567_p4, %p8935_p1  ;;  %s5572_s28 = scalar_lea.vmem %s5571_s6, 4096 }
 0x7ef   : > { %s4513_s8 = sshll.u32 %s8933_s0, 11  ;;  %p5573_p0 = scmp.lt.s32.totalorder %s8419_s10, %s5571_s6 }
 0x7f0   : > { %s8416_s25 = scalar_lea.hbm %s8934_s22, %s4513_s8  ;;  %p5569_p8 = pneg %p5568_p2 }
 0x7f1   : > { %p5574_p11 = scmp.lt.s32.totalorder %s5572_s28, %s5566_s14 }
 0x7f3   : > { %p5575_p10 = por %p5574_p11, %p5573_p0 }
 0x7f5   : > { %p5576_p13 = pnand %p5575_p10, %p5569_p8 }
 0x7f7   : > { %5579 = shalt.err (!%p5576_p13)
}
 0x7f8   : > { %s5580_s5 = scalar_lea.hbm %s8416_s25, 2048  ;;  %s5584_s30 = scalar_lea.hbm %s8934_s22, 4096 }
 0x7f9   : > { %p5581_p9 = scmp.ne.s32.totalorder %s8416_s25, %s5580_s5  ;;  %p5585_p7 = scmp.lt.u32.totalorder %s8416_s25, %s8934_s22 }
 0x7fa   : > { %p5586_p5 = scmp.lt.u32.totalorder %s5584_s30, %s5580_s5  ;;  %p5588_p4 = scmp.lt.u32.totalorder %s5580_s5, %s8416_s25 }
 0x7fb   : > { %p5582_p3 = pnand %p5581_p9, %p8935_p1 }
 0x7fc   : > { %p5587_p6 = por %p5586_p5, %p5585_p7 }
 0x7fd   : > { %p5583_p12 = pneg %p5582_p3 }
 0x7fe   : > { %p5589_p2 = por %p5588_p4, %p5587_p6 }
 0x800   : > { %p5590_p8 = pnand %p5589_p2, %p5583_p12 }
 0x802   : > { %5593 = shalt.err (!%p5590_p8)
}
 0x803   : > { %s5716_s11 = smov 128   ;;  %s5717_s18 = smov 8  }
 0x804   : > { %4782 = dma.vmem_to_hbm [thread:$0]  (%p8935_p1), %s8419_s10, 2048, %s8416_s25, %s4103_s1, %s5716_s11, %s5716_s11, %s5717_s18  }
 0x805 PF: > { %p4808_p0 = scmp.ge.s32.totalorder %s5700_s19, 2  ;;  %s4131_s9 = sand.u32 1, %s5672_s12  }
 0x806   : > { %p8936_p11 = scmp.ne.s32.totalorder %s8666_s20, 0  ;;  %s4132_s21 = scalar_lea.sflag [#allocation5], %s4131_s9 }
 0x808   : > { %p4804_p10 = pnand %p4808_p0, %p8936_p11 }
 0x80a   : > { %5655 = dma.done.wait (!%p4804_p10), %s4132_s21, 2048  }
 0x80b   : > { %5657 = vsyncadd (!%p4804_p10), %s4132_s21, 4294965248  ;;  %s34_s19 = sadd.s32 1, %s5700_s19   ;;  %s8937_s30 = sld [smem:[#allocation20_spill]] }
 0x80c   : > { %p31_p13 = scmp.ge.s32.totalorder %s34_s19, 6   ;;  %s8938_s10 = sld [smem:[#allocation21_spill]] }
 0x80d   : > { %s8939_s11 = sld [smem:[#allocation27_spill]]  ;;  %s8940_s15 = sld [smem:[#allocation22_spill]] }
 0x80e   : > { %s8941_s14 = sld [smem:[#allocation32_spill]]  ;;  %s8942_s16 = sld [smem:[#allocation25_spill]] }
 0x80f   : > { %s8943_s26 = sld [smem:[#allocation26_spill]]  ;;  %s8944_s18 = sld [smem:[#allocation30_spill]] }
 0x810   : > { %s8945_s12 = smov %s5676_s13  ;;  %33 = sbr.rel (!%p31_p13) target bundleno = 25 (0x19), region = 179 }
 0x813   : > { %s8946_s13 = smov %s8940_s15  ;;  %s8947_s15 = smov %s5692_s17 }
 0x815   : > { %s8948_s17 = smov %s8943_s26 }
 0x817   :  { %4137 = vsyncpa [#allocation4], 1 }
 0x818   :  { %4139 = vsyncpa [#allocation4 + $0x1], 1 }
 0x819   :  { %4140 = vsyncpa [#allocation7], 1 }
 0x81a   :  { %4142 = vsyncpa [#allocation7 + $0x1], 1 }
 0x81b   :  { %4143 = vsyncpa [#allocation10], 1 }
 0x81c   :  { %4145 = vsyncpa [#allocation10 + $0x1], 1 }
 0x81d   :  { %4146 = vsyncpa [#allocation13], 1 }
 0x81e   :  { %4148 = vsyncpa [#allocation13 + $0x1], 1 }
 0x81f   :  { %4149 = vsyncpa [#allocation5], 1 }
 0x820   :  { %4151 = vsyncpa [#allocation5 + $0x1], 1 }

</bundles_post_ra>
